<compile_context>
chip_gen: v7x
topology: tpu7x:2x2x1
jax: 0.10.0
libtpu: 0.0.40
codegen_flags: <defaults>
</compile_context>

<pallas_src>
import functools
import math

import jax
import jax.numpy as jnp
from jax import lax
from jax.experimental import pallas as pl
from jax.experimental.pallas import tpu as pltpu

NEG_BIG = -1.0e30  # finite "minus infinity" so -inf arithmetic never produces NaN


def _erf(x):
    """Abramowitz & Stegun 7.1.26 polynomial erf (max abs err ~1.5e-7), VPU/EUP-only ops."""
    a1, a2, a3, a4, a5 = 0.254829592, -0.284496736, 1.421413741, -1.453152027, 1.061405429
    p = 0.3275911
    ax = jnp.abs(x)
    t = 1.0 / (1.0 + p * ax)
    poly = ((((a5 * t + a4) * t + a3) * t + a2) * t + a1) * t
    y = 1.0 - poly * jnp.exp(-(ax * ax))
    return jnp.where(x >= 0.0, y, -y)


def _gelu_exact(x):
    """PyTorch nn.GELU() default: 0.5*x*(1+erf(x/sqrt(2)))."""
    return 0.5 * x * (1.0 + _erf(x * np_inv_sqrt2))


np_inv_sqrt2 = float(1.0 / math.sqrt(2.0))


def global_attention_kernel(x_ref, bcol_ref, brow_ref, ut_ref,
                            w1n_ref, b1n_ref, w2n_ref, b2n_ref,
                            w1qt_ref, b1q_ref, w2qt_ref, b2q_ref,
                            out_ref,
                            qt_scr, m_scr, l_scr, acc_scr,
                            *, inv_sqrt_c):
    i = pl.program_id(0)
    tn = x_ref.shape[0]
    b_pad = out_ref.shape[0]

    # ---- one-time init: q^T = ques_nn(u)^T / sqrt(C) into VMEM scratch + zero state ----
    @pl.when(i == 0)
    def _init():
        z = jnp.dot(w1qt_ref[...], ut_ref[...],
                    preferred_element_type=jnp.float32) + b1q_ref[...]
        z = _gelu_exact(z)
        qt = jnp.dot(w2qt_ref[...], z.astype(jnp.bfloat16),
                     preferred_element_type=jnp.float32) + b2q_ref[...]
        qt_scr[...] = qt * inv_sqrt_c                                # [Cp, Bp]
        m_scr[...] = jnp.full(m_scr.shape, NEG_BIG, jnp.float32)     # [1, Bp]
        l_scr[...] = jnp.zeros(l_scr.shape, jnp.float32)             # [1, Bp]
        acc_scr[...] = jnp.zeros(acc_scr.shape, jnp.float32)         # [Bp, Cp]

    # ---- node_nn on this node block: Linear -> GELU(exact) -> Linear ----
    xb = x_ref[...]                                                  # bf16 [TN, Fp]
    h = jnp.dot(xb, w1n_ref[...], preferred_element_type=jnp.float32) + b1n_ref[...]
    h = _gelu_exact(h)
    h = jnp.dot(h.astype(jnp.bfloat16), w2n_ref[...],
                preferred_element_type=jnp.float32) + b2n_ref[...]   # f32 [TN, Cp]

    # ---- scaled scores against every graph's question vector: [TN, Bp] ----
    s = jnp.dot(h.astype(jnp.bfloat16), qt_scr[...].astype(jnp.bfloat16),
                preferred_element_type=jnp.float32)

    # ---- one-hot segment masks in both orientations (VPU compares, no transpose) ----
    bcol = bcol_ref[...]                                             # [TN, 1] int32
    brow = brow_ref[...]                                             # [1, TN] int32
    lane_ids = lax.broadcasted_iota(jnp.int32, (tn, b_pad), 1)
    sub_ids = lax.broadcasted_iota(jnp.int32, (b_pad, tn), 0)
    onehot_nb = (bcol == lane_ids)                                   # [TN, Bp] bool
    onehot_bn = (brow == sub_ids)                                    # [Bp, TN] bool

    # per-node logit = <h_n, q_{batch[n]}> / sqrt(C)   (padded nodes -> 0, inert)
    logits = jnp.sum(jnp.where(onehot_nb, s, 0.0), axis=1, keepdims=True)  # [TN, 1]

    # ---- online segmented softmax update ----
    m_old = m_scr[...]                                               # [1, Bp]
    blk_max = jnp.max(jnp.where(onehot_nb, logits, NEG_BIG),
                      axis=0, keepdims=True)                         # [1, Bp]
    m_new = jnp.maximum(m_old, blk_max)
    alpha = jnp.exp(m_old - m_new)                                   # finite (NEG_BIG trick)

    max_per_node = jnp.sum(jnp.where(onehot_nb, m_new, 0.0),
                           axis=1, keepdims=True)                    # [TN, 1]
    e = jnp.exp(logits - max_per_node)                               # [TN, 1]

    blk_l = jnp.sum(jnp.where(onehot_nb, e, 0.0),
                    axis=0, keepdims=True)                           # [1, Bp]
    l_scr[...] = alpha * l_scr[...] + blk_l
    m_scr[...] = m_new

    # ---- accumulate: acc = diag(alpha) @ acc + onehot_bn @ (e * h) ----
    eye = (lax.broadcasted_iota(jnp.int32, (b_pad, b_pad), 0) ==
           lax.broadcasted_iota(jnp.int32, (b_pad, b_pad), 1))
    diag_alpha = jnp.where(eye, alpha, 0.0)                          # [Bp, Bp] f32
    weighted = (e * h).astype(jnp.bfloat16)                          # [TN, Cp]
    scatter_w = jnp.where(onehot_bn, 1.0, 0.0).astype(jnp.bfloat16)  # [Bp, TN]
    acc_scr[...] = (jnp.dot(diag_alpha, acc_scr[...], preferred_element_type=jnp.float32)
                    + jnp.dot(scatter_w, weighted, preferred_element_type=jnp.float32))

    # ---- finalize on the last node block ----
    @pl.when(i == pl.num_programs(0) - 1)
    def _finalize():
        inv = pl.reciprocal(l_scr[...] + 1e-16, approx=True)         # [1, Bp]
        diag_inv = jnp.where(eye, inv, 0.0)                          # [Bp, Bp]
        out_ref[...] = jnp.dot(diag_inv, acc_scr[...],
                               preferred_element_type=jnp.float32)


def _round_up(v, m):
    return ((v + m - 1) // m) * m


def global_attention(x, u, batch, params, *, tn=256):
    """x: [N, F_in] f32, u: [B, C] f32, batch: [N] int32 -> out [B, C] f32."""
    (w1n, b1n, w2n, b2n, w1q, b1q, w2q, b2q) = params
    N, F_in = x.shape
    B, C = u.shape
    assert tn % 128 == 0, "node tile must be a multiple of 128 lanes"

    F_pad = _round_up(F_in, 128)
    C_pad = _round_up(C, 128)
    B_pad = _round_up(B, 8)
    N_pad = _round_up(max(N, 1), tn)

    bf16 = jnp.bfloat16
    # ---- pad / cast inputs (padding nodes get batch=-1 -> inert in the kernel) ----
    xp = jnp.zeros((N_pad, F_pad), bf16).at[:N, :F_in].set(x.astype(bf16))
    batch_p = jnp.full((N_pad,), -1, jnp.int32).at[:N].set(batch.astype(jnp.int32))
    bcol = batch_p.reshape(N_pad, 1)
    brow = batch_p.reshape(1, N_pad)

    # node branch weights, (in, out) layout, zero padded
    w1n_p = jnp.zeros((F_pad, C_pad), bf16).at[:F_in, :C].set(w1n.astype(bf16))
    b1n_p = jnp.zeros((1, C_pad), jnp.float32).at[:, :C].set(b1n.reshape(1, C))
    w2n_p = jnp.zeros((C_pad, C_pad), bf16).at[:C, :C].set(w2n.astype(bf16))
    b2n_p = jnp.zeros((1, C_pad), jnp.float32).at[:, :C].set(b2n.reshape(1, C))

    # ques branch pre-transposed so the kernel computes q^T with plain row-major matmuls
    u_t = jnp.zeros((C_pad, B_pad), bf16).at[:C, :B].set(u.T.astype(bf16))
    w1q_t = jnp.zeros((C_pad, C_pad), bf16).at[:C, :C].set(w1q.T.astype(bf16))
    b1q_c = jnp.zeros((C_pad, 1), jnp.float32).at[:C, :].set(b1q.reshape(C, 1))
    w2q_t = jnp.zeros((C_pad, C_pad), bf16).at[:C, :C].set(w2q.T.astype(bf16))
    b2q_c = jnp.zeros((C_pad, 1), jnp.float32).at[:C, :].set(b2q.reshape(C, 1))

    grid = (N_pad // tn,)
    in_specs = [
        pl.BlockSpec((tn, F_pad), lambda i: (i, 0)),        # x block
        pl.BlockSpec((tn, 1), lambda i: (i, 0)),            # batch, column layout
        pl.BlockSpec((1, tn), lambda i: (0, i)),            # batch, row layout
        pl.BlockSpec((C_pad, B_pad), lambda i: (0, 0)),     # u^T
        pl.BlockSpec((F_pad, C_pad), lambda i: (0, 0)),     # w1n
        pl.BlockSpec((1, C_pad), lambda i: (0, 0)),         # b1n
        pl.BlockSpec((C_pad, C_pad), lambda i: (0, 0)),     # w2n
        pl.BlockSpec((1, C_pad), lambda i: (0, 0)),         # b2n
        pl.BlockSpec((C_pad, C_pad), lambda i: (0, 0)),     # w1q^T
        pl.BlockSpec((C_pad, 1), lambda i: (0, 0)),         # b1q (column)
        pl.BlockSpec((C_pad, C_pad), lambda i: (0, 0)),     # w2q^T
        pl.BlockSpec((C_pad, 1), lambda i: (0, 0)),         # b2q (column)
    ]
    out_spec = pl.BlockSpec((B_pad, C_pad), lambda i: (0, 0))
    scratch = [
        pltpu.VMEM((C_pad, B_pad), jnp.float32),   # q^T (pre-scaled by 1/sqrt(C))
        pltpu.VMEM((1, B_pad), jnp.float32),       # running max m
        pltpu.VMEM((1, B_pad), jnp.float32),       # running sum l
        pltpu.VMEM((B_pad, C_pad), jnp.float32),   # output accumulator
    ]

    kernel = functools.partial(global_attention_kernel,
                               inv_sqrt_c=float(1.0 / math.sqrt(C)))
    out_pad = pl.pallas_call(
        kernel,
        out_shape=jax.ShapeDtypeStruct((B_pad, C_pad), jnp.float32),
        grid=grid,
        in_specs=in_specs,
        out_specs=out_spec,
        scratch_shapes=scratch,
        compiler_params=pltpu.CompilerParams(
            dimension_semantics=("arbitrary",),     # accumulators carried across node blocks
            vmem_limit_bytes=32 * 1024 * 1024),     # safe on v5e/v6e/v7x
    )(xp, bcol, brow, u_t,
      w1n_p, b1n_p, w2n_p, b2n_p,
      w1q_t, b1q_c, w2q_t, b2q_c)

    return out_pad[:B, :C]


def reference(x, u, batch, params):
    """Plain-JAX f32 reference mirroring the PyTorch forward."""
    (w1n, b1n, w2n, b2n, w1q, b1q, w2q, b2q) = params
    B = u.shape[0]
    h = jax.nn.gelu(x @ w1n + b1n, approximate=False) @ w2n + b2n
    q = jax.nn.gelu(u @ w1q + b1q, approximate=False) @ w2q + b2q
    qn = q[batch]
    logits = jnp.sum(h * qn, axis=-1) / jnp.sqrt(jnp.float32(h.shape[1]))
    seg_max = jax.ops.segment_max(logits, batch, num_segments=B)
    e = jnp.exp(logits - seg_max[batch])
    seg_sum = jax.ops.segment_sum(e, batch, num_segments=B)
    gate = e / (seg_sum[batch] + 1e-16)
    return jax.ops.segment_sum(gate[:, None] * h, batch, num_segments=B)


def init_params(key, num_node_features, channels):
    """Deterministic synthetic parameters. Weights stored pre-transposed (in, out)."""
    ks = jax.random.split(key, 8)
    s = 0.1
    w1n = s * jax.random.normal(ks[0], (num_node_features, channels), jnp.float32)
    b1n = s * jax.random.normal(ks[1], (1, channels), jnp.float32)
    w2n = s * jax.random.normal(ks[2], (channels, channels), jnp.float32)
    b2n = s * jax.random.normal(ks[3], (1, channels), jnp.float32)
    w1q = s * jax.random.normal(ks[4], (channels, channels), jnp.float32)
    b1q = s * jax.random.normal(ks[5], (1, channels), jnp.float32)
    w2q = s * jax.random.normal(ks[6], (channels, channels), jnp.float32)
    b2q = s * jax.random.normal(ks[7], (1, channels), jnp.float32)
    # TODO(synk): gate_nn parameters exist in __init__ but are unused in forward(); omitted.
    return (w1n, b1n, w2n, b2n, w1q, b1q, w2q, b2q)


if __name__ == "__main__":
    # Small but padding-exercising shapes: 3 graphs with 100/120/80 nodes each.
    N = 300          # total nodes
    F_IN = 20        # num_node_features (padded to 128 internally)
    C = 32           # num_out_features / channels (padded to 128 internally)
    B = 3            # number of graphs (padded to 8 internally)

    key = jax.random.PRNGKey(0)
    kx, ku, kp = jax.random.split(key, 3)

    x = jax.random.normal(kx, (N, F_IN), jnp.float32)
    u = jax.random.normal(ku, (B, C), jnp.float32)
    batch = jnp.concatenate([
        jnp.zeros((100,), jnp.int32),
        jnp.ones((120,), jnp.int32),
        jnp.full((80,), 2, jnp.int32),
    ])
    params = init_params(kp, F_IN, C)

    # tn=128 -> 3 node blocks, exercising the multi-block online-softmax path.
    out = jax.block_until_ready(global_attention(x, u, batch, params, tn=128))
    ref = jax.block_until_ready(reference(x, u, batch, params))

    assert out.shape == (B, C)
    max_err = float(jnp.max(jnp.abs(out - ref)))
    assert jnp.allclose(out, ref, atol=2.5e-2, rtol=2.5e-2), (
        f"mismatch: max abs err {max_err}")

    print("KERNEL_OK")
</pallas_src>

<mosaic_0001>
module attributes {stable_mosaic.version = 11 : i64} {
  func.func @global_attention_kernel(%arg0: i32, %arg1: memref<128x128xbf16, #tpu.memory_space<vmem>>, %arg2: memref<128x1xi32, #tpu.memory_space<vmem>>, %arg3: memref<1x128xi32, #tpu.memory_space<vmem>>, %arg4: memref<128x8xbf16, #tpu.memory_space<vmem>>, %arg5: memref<128x128xbf16, #tpu.memory_space<vmem>>, %arg6: memref<1x128xf32, #tpu.memory_space<vmem>>, %arg7: memref<128x128xbf16, #tpu.memory_space<vmem>>, %arg8: memref<1x128xf32, #tpu.memory_space<vmem>>, %arg9: memref<128x128xbf16, #tpu.memory_space<vmem>>, %arg10: memref<128x1xf32, #tpu.memory_space<vmem>>, %arg11: memref<128x128xbf16, #tpu.memory_space<vmem>>, %arg12: memref<128x1xf32, #tpu.memory_space<vmem>>, %arg13: memref<8x128xf32, #tpu.memory_space<vmem>>, %arg14: memref<128x8xf32, #tpu.memory_space<vmem>>, %arg15: memref<1x8xf32, #tpu.memory_space<vmem>>, %arg16: memref<1x8xf32, #tpu.memory_space<vmem>>, %arg17: memref<8x128xf32, #tpu.memory_space<vmem>>) attributes {dimension_semantics = [#tpu.dimension_semantics<arbitrary>], iteration_bounds = array<i64: 3>, scalar_prefetch = 0 : i64, scratch_operands = 4 : i64, tpu.core_type = #tpu.core_type<tc>, window_params = [{transform_indices = @transform_0, window_bounds = array<i64: 128, 128>}, {transform_indices = @transform_1, window_bounds = array<i64: 128, 1>}, {transform_indices = @transform_2, window_bounds = array<i64: 1, 128>}, {pipeline_mode = #tpu.pipeline_mode<synchronous>, transform_indices = @transform_3, window_bounds = array<i64: 128, 8>}, {pipeline_mode = #tpu.pipeline_mode<synchronous>, transform_indices = @transform_4, window_bounds = array<i64: 128, 128>}, {pipeline_mode = #tpu.pipeline_mode<synchronous>, transform_indices = @transform_5, window_bounds = array<i64: 1, 128>}, {pipeline_mode = #tpu.pipeline_mode<synchronous>, transform_indices = @transform_6, window_bounds = array<i64: 128, 128>}, {pipeline_mode = #tpu.pipeline_mode<synchronous>, transform_indices = @transform_7, window_bounds = array<i64: 1, 128>}, {pipeline_mode = #tpu.pipeline_mode<synchronous>, transform_indices = @transform_8, window_bounds = array<i64: 128, 128>}, {pipeline_mode = #tpu.pipeline_mode<synchronous>, transform_indices = @transform_9, window_bounds = array<i64: 128, 1>}, {pipeline_mode = #tpu.pipeline_mode<synchronous>, transform_indices = @transform_10, window_bounds = array<i64: 128, 128>}, {pipeline_mode = #tpu.pipeline_mode<synchronous>, transform_indices = @transform_11, window_bounds = array<i64: 128, 1>}, {pipeline_mode = #tpu.pipeline_mode<synchronous>, transform_indices = @transform_12, window_bounds = array<i64: 8, 128>}]} {
    %c0_i32 = arith.constant 0 : i32
    %0 = arith.cmpi eq, %arg0, %c0_i32 : i32
    %1 = arith.extui %0 : i1 to i32
    %c0_i32_0 = arith.constant 0 : i32
    %2 = arith.cmpi ne, %1, %c0_i32_0 : i32
    scf.if %2 {
      %c0_59 = arith.constant 0 : index
      %c0_60 = arith.constant 0 : index
      %122 = vector.load %arg9[%c0_59, %c0_60] : memref<128x128xbf16, #tpu.memory_space<vmem>>, vector<128x128xbf16>
      %c0_61 = arith.constant 0 : index
      %c0_62 = arith.constant 0 : index
      %123 = vector.load %arg4[%c0_61, %c0_62] : memref<128x8xbf16, #tpu.memory_space<vmem>>, vector<128x8xbf16>
      %cst_63 = arith.constant dense<0.000000e+00> : vector<128x8xf32>
      %124 = tpu.matmul %122, %123, %cst_63 {dimension_numbers = #tpu.dot_dimension_numbers<[1], [0], [0], [1], [0, 0, 1, 1], [], []>} : vector<128x128xbf16>, vector<128x8xbf16>, vector<128x8xf32> -> vector<128x8xf32>
      %c0_64 = arith.constant 0 : index
      %c0_65 = arith.constant 0 : index
      %125 = vector.load %arg10[%c0_64, %c0_65] : memref<128x1xf32, #tpu.memory_space<vmem>>, vector<128x1xf32>
      %126 = vector.broadcast %125 : vector<128x1xf32> to vector<128x8xf32>
      %127 = arith.addf %124, %126 : vector<128x8xf32>
      %cst_66 = arith.constant 5.000000e-01 : f32
      %128 = vector.broadcast %cst_66 : f32 to vector<128x8xf32>
      %129 = arith.mulf %128, %127 : vector<128x8xf32>
      %cst_67 = arith.constant 0.707106769 : f32
      %130 = vector.broadcast %cst_67 : f32 to vector<128x8xf32>
      %131 = arith.mulf %127, %130 : vector<128x8xf32>
      %132 = math.absf %131 : vector<128x8xf32>
      %cst_68 = arith.constant 0.327591091 : f32
      %133 = vector.broadcast %cst_68 : f32 to vector<128x8xf32>
      %134 = arith.mulf %133, %132 : vector<128x8xf32>
      %cst_69 = arith.constant 1.000000e+00 : f32
      %135 = vector.broadcast %cst_69 : f32 to vector<128x8xf32>
      %136 = arith.addf %135, %134 : vector<128x8xf32>
      %cst_70 = arith.constant 1.000000e+00 : f32
      %137 = vector.broadcast %cst_70 : f32 to vector<128x8xf32>
      %138 = arith.divf %137, %136 : vector<128x8xf32>
      %cst_71 = arith.constant 1.06140542 : f32
      %139 = vector.broadcast %cst_71 : f32 to vector<128x8xf32>
      %140 = arith.mulf %139, %138 : vector<128x8xf32>
      %cst_72 = arith.constant -1.45315206 : f32
      %141 = vector.broadcast %cst_72 : f32 to vector<128x8xf32>
      %142 = arith.addf %140, %141 : vector<128x8xf32>
      %143 = arith.mulf %142, %138 : vector<128x8xf32>
      %cst_73 = arith.constant 1.42141378 : f32
      %144 = vector.broadcast %cst_73 : f32 to vector<128x8xf32>
      %145 = arith.addf %143, %144 : vector<128x8xf32>
      %146 = arith.mulf %145, %138 : vector<128x8xf32>
      %cst_74 = arith.constant -0.284496725 : f32
      %147 = vector.broadcast %cst_74 : f32 to vector<128x8xf32>
      %148 = arith.addf %146, %147 : vector<128x8xf32>
      %149 = arith.mulf %148, %138 : vector<128x8xf32>
      %cst_75 = arith.constant 0.254829586 : f32
      %150 = vector.broadcast %cst_75 : f32 to vector<128x8xf32>
      %151 = arith.addf %149, %150 : vector<128x8xf32>
      %152 = arith.mulf %151, %138 : vector<128x8xf32>
      %153 = arith.mulf %132, %132 : vector<128x8xf32>
      %cst_76 = arith.constant 0.000000e+00 : f32
      %154 = vector.broadcast %cst_76 : f32 to vector<128x8xf32>
      %155 = arith.subf %154, %153 : vector<128x8xf32>
      %156 = math.exp %155 : vector<128x8xf32>
      %157 = arith.mulf %152, %156 : vector<128x8xf32>
      %cst_77 = arith.constant 1.000000e+00 : f32
      %158 = vector.broadcast %cst_77 : f32 to vector<128x8xf32>
      %159 = arith.subf %158, %157 : vector<128x8xf32>
      %cst_78 = arith.constant 0.000000e+00 : f32
      %160 = vector.broadcast %cst_78 : f32 to vector<128x8xf32>
      %161 = arith.cmpf oge, %131, %160 : vector<128x8xf32>
      %cst_79 = arith.constant 0.000000e+00 : f32
      %162 = vector.broadcast %cst_79 : f32 to vector<128x8xf32>
      %163 = arith.subf %162, %159 : vector<128x8xf32>
      %164 = arith.select %161, %159, %163 : vector<128x8xi1>, vector<128x8xf32>
      %cst_80 = arith.constant 1.000000e+00 : f32
      %165 = vector.broadcast %cst_80 : f32 to vector<128x8xf32>
      %166 = arith.addf %165, %164 : vector<128x8xf32>
      %167 = arith.mulf %129, %166 : vector<128x8xf32>
      %c0_81 = arith.constant 0 : index
      %c0_82 = arith.constant 0 : index
      %168 = vector.load %arg11[%c0_81, %c0_82] : memref<128x128xbf16, #tpu.memory_space<vmem>>, vector<128x128xbf16>
      %169 = arith.truncf %167 : vector<128x8xf32> to vector<128x8xbf16>
      %cst_83 = arith.constant dense<0.000000e+00> : vector<128x8xf32>
      %170 = tpu.matmul %168, %169, %cst_83 {dimension_numbers = #tpu.dot_dimension_numbers<[1], [0], [0], [1], [0, 0, 1, 1], [], []>} : vector<128x128xbf16>, vector<128x8xbf16>, vector<128x8xf32> -> vector<128x8xf32>
      %c0_84 = arith.constant 0 : index
      %c0_85 = arith.constant 0 : index
      %171 = vector.load %arg12[%c0_84, %c0_85] : memref<128x1xf32, #tpu.memory_space<vmem>>, vector<128x1xf32>
      %172 = vector.broadcast %171 : vector<128x1xf32> to vector<128x8xf32>
      %173 = arith.addf %170, %172 : vector<128x8xf32>
      %cst_86 = arith.constant 0.176776692 : f32
      %174 = vector.broadcast %cst_86 : f32 to vector<128x8xf32>
      %175 = arith.mulf %173, %174 : vector<128x8xf32>
      %c0_87 = arith.constant 0 : index
      %c0_88 = arith.constant 0 : index
      %176 = vector.load %arg14[%c0_87, %c0_88] : memref<128x8xf32, #tpu.memory_space<vmem>>, vector<128x8xf32>
      tpu.vector_store %arg14[%c0_87, %c0_88], %175 {strides = array<i32>} : memref<128x8xf32, #tpu.memory_space<vmem>>, vector<128x8xf32>,
      %cst_89 = arith.constant -1.000000e+30 : f32
      %177 = vector.broadcast %cst_89 : f32 to vector<1x8xf32>
      %c0_90 = arith.constant 0 : index
      %c0_91 = arith.constant 0 : index
      %178 = vector.load %arg15[%c0_90, %c0_91] : memref<1x8xf32, #tpu.memory_space<vmem>>, vector<1x8xf32>
      tpu.vector_store %arg15[%c0_90, %c0_91], %177 {strides = array<i32>} : memref<1x8xf32, #tpu.memory_space<vmem>>, vector<1x8xf32>,
      %cst_92 = arith.constant 0.000000e+00 : f32
      %179 = vector.broadcast %cst_92 : f32 to vector<1x8xf32>
      %c0_93 = arith.constant 0 : index
      %c0_94 = arith.constant 0 : index
      %180 = vector.load %arg16[%c0_93, %c0_94] : memref<1x8xf32, #tpu.memory_space<vmem>>, vector<1x8xf32>
      tpu.vector_store %arg16[%c0_93, %c0_94], %179 {strides = array<i32>} : memref<1x8xf32, #tpu.memory_space<vmem>>, vector<1x8xf32>,
      %cst_95 = arith.constant 0.000000e+00 : f32
      %181 = vector.broadcast %cst_95 : f32 to vector<8x128xf32>
      %c0_96 = arith.constant 0 : index
      %c0_97 = arith.constant 0 : index
      %182 = vector.load %arg17[%c0_96, %c0_97] : memref<8x128xf32, #tpu.memory_space<vmem>>, vector<8x128xf32>
      tpu.vector_store %arg17[%c0_96, %c0_97], %181 {strides = array<i32>} : memref<8x128xf32, #tpu.memory_space<vmem>>, vector<8x128xf32>,
    } else {
    }
    %c0 = arith.constant 0 : index
    %c0_1 = arith.constant 0 : index
    %3 = vector.load %arg1[%c0, %c0_1] : memref<128x128xbf16, #tpu.memory_space<vmem>>, vector<128x128xbf16>
    %c0_2 = arith.constant 0 : index
    %c0_3 = arith.constant 0 : index
    %4 = vector.load %arg5[%c0_2, %c0_3] : memref<128x128xbf16, #tpu.memory_space<vmem>>, vector<128x128xbf16>
    %cst = arith.constant dense<0.000000e+00> : vector<128x128xf32>
    %5 = tpu.matmul %3, %4, %cst {dimension_numbers = #tpu.dot_dimension_numbers<[1], [0], [0], [1], [0, 0, 1, 1], [], []>} : vector<128x128xbf16>, vector<128x128xbf16>, vector<128x128xf32> -> vector<128x128xf32>
    %c0_4 = arith.constant 0 : index
    %c0_5 = arith.constant 0 : index
    %6 = vector.load %arg6[%c0_4, %c0_5] : memref<1x128xf32, #tpu.memory_space<vmem>>, vector<1x128xf32>
    %7 = vector.broadcast %6 : vector<1x128xf32> to vector<128x128xf32>
    %8 = arith.addf %5, %7 : vector<128x128xf32>
    %cst_6 = arith.constant 5.000000e-01 : f32
    %9 = vector.broadcast %cst_6 : f32 to vector<128x128xf32>
    %10 = arith.mulf %9, %8 : vector<128x128xf32>
    %cst_7 = arith.constant 0.707106769 : f32
    %11 = vector.broadcast %cst_7 : f32 to vector<128x128xf32>
    %12 = arith.mulf %8, %11 : vector<128x128xf32>
    %13 = math.absf %12 : vector<128x128xf32>
    %cst_8 = arith.constant 0.327591091 : f32
    %14 = vector.broadcast %cst_8 : f32 to vector<128x128xf32>
    %15 = arith.mulf %14, %13 : vector<128x128xf32>
    %cst_9 = arith.constant 1.000000e+00 : f32
    %16 = vector.broadcast %cst_9 : f32 to vector<128x128xf32>
    %17 = arith.addf %16, %15 : vector<128x128xf32>
    %cst_10 = arith.constant 1.000000e+00 : f32
    %18 = vector.broadcast %cst_10 : f32 to vector<128x128xf32>
    %19 = arith.divf %18, %17 : vector<128x128xf32>
    %cst_11 = arith.constant 1.06140542 : f32
    %20 = vector.broadcast %cst_11 : f32 to vector<128x128xf32>
    %21 = arith.mulf %20, %19 : vector<128x128xf32>
    %cst_12 = arith.constant -1.45315206 : f32
    %22 = vector.broadcast %cst_12 : f32 to vector<128x128xf32>
    %23 = arith.addf %21, %22 : vector<128x128xf32>
    %24 = arith.mulf %23, %19 : vector<128x128xf32>
    %cst_13 = arith.constant 1.42141378 : f32
    %25 = vector.broadcast %cst_13 : f32 to vector<128x128xf32>
    %26 = arith.addf %24, %25 : vector<128x128xf32>
    %27 = arith.mulf %26, %19 : vector<128x128xf32>
    %cst_14 = arith.constant -0.284496725 : f32
    %28 = vector.broadcast %cst_14 : f32 to vector<128x128xf32>
    %29 = arith.addf %27, %28 : vector<128x128xf32>
    %30 = arith.mulf %29, %19 : vector<128x128xf32>
    %cst_15 = arith.constant 0.254829586 : f32
    %31 = vector.broadcast %cst_15 : f32 to vector<128x128xf32>
    %32 = arith.addf %30, %31 : vector<128x128xf32>
    %33 = arith.mulf %32, %19 : vector<128x128xf32>
    %34 = arith.mulf %13, %13 : vector<128x128xf32>
    %cst_16 = arith.constant 0.000000e+00 : f32
    %35 = vector.broadcast %cst_16 : f32 to vector<128x128xf32>
    %36 = arith.subf %35, %34 : vector<128x128xf32>
    %37 = math.exp %36 : vector<128x128xf32>
    %38 = arith.mulf %33, %37 : vector<128x128xf32>
    %cst_17 = arith.constant 1.000000e+00 : f32
    %39 = vector.broadcast %cst_17 : f32 to vector<128x128xf32>
    %40 = arith.subf %39, %38 : vector<128x128xf32>
    %cst_18 = arith.constant 0.000000e+00 : f32
    %41 = vector.broadcast %cst_18 : f32 to vector<128x128xf32>
    %42 = arith.cmpf oge, %12, %41 : vector<128x128xf32>
    %cst_19 = arith.constant 0.000000e+00 : f32
    %43 = vector.broadcast %cst_19 : f32 to vector<128x128xf32>
    %44 = arith.subf %43, %40 : vector<128x128xf32>
    %45 = arith.select %42, %40, %44 : vector<128x128xi1>, vector<128x128xf32>
    %cst_20 = arith.constant 1.000000e+00 : f32
    %46 = vector.broadcast %cst_20 : f32 to vector<128x128xf32>
    %47 = arith.addf %46, %45 : vector<128x128xf32>
    %48 = arith.mulf %10, %47 : vector<128x128xf32>
    %49 = arith.truncf %48 : vector<128x128xf32> to vector<128x128xbf16>
    %c0_21 = arith.constant 0 : index
    %c0_22 = arith.constant 0 : index
    %50 = vector.load %arg7[%c0_21, %c0_22] : memref<128x128xbf16, #tpu.memory_space<vmem>>, vector<128x128xbf16>
    %cst_23 = arith.constant dense<0.000000e+00> : vector<128x128xf32>
    %51 = tpu.matmul %49, %50, %cst_23 {dimension_numbers = #tpu.dot_dimension_numbers<[1], [0], [0], [1], [0, 0, 1, 1], [], []>} : vector<128x128xbf16>, vector<128x128xbf16>, vector<128x128xf32> -> vector<128x128xf32>
    %c0_24 = arith.constant 0 : index
    %c0_25 = arith.constant 0 : index
    %52 = vector.load %arg8[%c0_24, %c0_25] : memref<1x128xf32, #tpu.memory_space<vmem>>, vector<1x128xf32>
    %53 = vector.broadcast %52 : vector<1x128xf32> to vector<128x128xf32>
    %54 = arith.addf %51, %53 : vector<128x128xf32>
    %55 = arith.truncf %54 : vector<128x128xf32> to vector<128x128xbf16>
    %c0_26 = arith.constant 0 : index
    %c0_27 = arith.constant 0 : index
    %56 = vector.load %arg14[%c0_26, %c0_27] : memref<128x8xf32, #tpu.memory_space<vmem>>, vector<128x8xf32>
    %57 = arith.truncf %56 : vector<128x8xf32> to vector<128x8xbf16>
    %cst_28 = arith.constant dense<0.000000e+00> : vector<128x8xf32>
    %58 = tpu.matmul %55, %57, %cst_28 {dimension_numbers = #tpu.dot_dimension_numbers<[1], [0], [0], [1], [0, 0, 1, 1], [], []>} : vector<128x128xbf16>, vector<128x8xbf16>, vector<128x8xf32> -> vector<128x8xf32>
    %c0_29 = arith.constant 0 : index
    %c0_30 = arith.constant 0 : index
    %59 = vector.load %arg2[%c0_29, %c0_30] : memref<128x1xi32, #tpu.memory_space<vmem>>, vector<128x1xi32>
    %c0_31 = arith.constant 0 : index
    %c0_32 = arith.constant 0 : index
    %60 = vector.load %arg3[%c0_31, %c0_32] : memref<1x128xi32, #tpu.memory_space<vmem>>, vector<1x128xi32>
    %61 = tpu.iota {dimensions = array<i32: 1>} : vector<128x8xi32>
    %62 = tpu.iota {dimensions = array<i32: 0>} : vector<8x128xi32>
    %63 = vector.broadcast %59 : vector<128x1xi32> to vector<128x8xi32>
    %64 = arith.cmpi eq, %63, %61 : vector<128x8xi32>
    %65 = vector.broadcast %60 : vector<1x128xi32> to vector<8x128xi32>
    %66 = arith.cmpi eq, %65, %62 : vector<8x128xi32>
    %cst_33 = arith.constant 0.000000e+00 : f32
    %67 = vector.broadcast %cst_33 : f32 to vector<128x8xf32>
    %68 = arith.select %64, %58, %67 : vector<128x8xi1>, vector<128x8xf32>
    %cst_34 = arith.constant dense<0.000000e+00> : vector<128xf32>
    %69 = vector.multi_reduction <add>, %68, %cst_34 [1] : vector<128x8xf32> to vector<128xf32>
    %70 = vector.shape_cast %69 : vector<128xf32> to vector<128x1xf32>
    %c0_35 = arith.constant 0 : index
    %c0_36 = arith.constant 0 : index
    %71 = vector.load %arg15[%c0_35, %c0_36] : memref<1x8xf32, #tpu.memory_space<vmem>>, vector<1x8xf32>
    %cst_37 = arith.constant -1.000000e+30 : f32
    %72 = vector.shape_cast %70 : vector<128x1xf32> to vector<128x1xf32>
    %73 = vector.broadcast %72 : vector<128x1xf32> to vector<128x8xf32>
    %74 = vector.broadcast %cst_37 : f32 to vector<128x8xf32>
    %75 = arith.select %64, %73, %74 : vector<128x8xi1>, vector<128x8xf32>
    %cst_38 = arith.constant dense<0xFF800000> : vector<8xf32>
    %76 = vector.multi_reduction <maximumf>, %75, %cst_38 [0] : vector<128x8xf32> to vector<8xf32>
    %77 = vector.shape_cast %76 : vector<8xf32> to vector<1x8xf32>
    %78 = arith.maximumf %71, %77 : vector<1x8xf32>
    %79 = arith.subf %71, %78 : vector<1x8xf32>
    %80 = math.exp %79 : vector<1x8xf32>
    %cst_39 = arith.constant 0.000000e+00 : f32
    %81 = vector.shape_cast %78 : vector<1x8xf32> to vector<1x8xf32>
    %82 = vector.broadcast %81 : vector<1x8xf32> to vector<128x8xf32>
    %83 = vector.broadcast %cst_39 : f32 to vector<128x8xf32>
    %84 = arith.select %64, %82, %83 : vector<128x8xi1>, vector<128x8xf32>
    %cst_40 = arith.constant dense<0.000000e+00> : vector<128xf32>
    %85 = vector.multi_reduction <add>, %84, %cst_40 [1] : vector<128x8xf32> to vector<128xf32>
    %86 = vector.shape_cast %85 : vector<128xf32> to vector<128x1xf32>
    %87 = arith.subf %70, %86 : vector<128x1xf32>
    %88 = math.exp %87 : vector<128x1xf32>
    %cst_41 = arith.constant 0.000000e+00 : f32
    %89 = vector.shape_cast %88 : vector<128x1xf32> to vector<128x1xf32>
    %90 = vector.broadcast %89 : vector<128x1xf32> to vector<128x8xf32>
    %91 = vector.broadcast %cst_41 : f32 to vector<128x8xf32>
    %92 = arith.select %64, %90, %91 : vector<128x8xi1>, vector<128x8xf32>
    %cst_42 = arith.constant dense<0.000000e+00> : vector<8xf32>
    %93 = vector.multi_reduction <add>, %92, %cst_42 [0] : vector<128x8xf32> to vector<8xf32>
    %94 = vector.shape_cast %93 : vector<8xf32> to vector<1x8xf32>
    %c0_43 = arith.constant 0 : index
    %c0_44 = arith.constant 0 : index
    %95 = vector.load %arg16[%c0_43, %c0_44] : memref<1x8xf32, #tpu.memory_space<vmem>>, vector<1x8xf32>
    %96 = arith.mulf %80, %95 : vector<1x8xf32>
    %97 = arith.addf %96, %94 : vector<1x8xf32>
    %c0_45 = arith.constant 0 : index
    %c0_46 = arith.constant 0 : index
    %98 = vector.load %arg16[%c0_45, %c0_46] : memref<1x8xf32, #tpu.memory_space<vmem>>, vector<1x8xf32>
    tpu.vector_store %arg16[%c0_45, %c0_46], %97 {strides = array<i32>} : memref<1x8xf32, #tpu.memory_space<vmem>>, vector<1x8xf32>,
    %c0_47 = arith.constant 0 : index
    %c0_48 = arith.constant 0 : index
    %99 = vector.load %arg15[%c0_47, %c0_48] : memref<1x8xf32, #tpu.memory_space<vmem>>, vector<1x8xf32>
    tpu.vector_store %arg15[%c0_47, %c0_48], %78 {strides = array<i32>} : memref<1x8xf32, #tpu.memory_space<vmem>>, vector<1x8xf32>,
    %100 = tpu.iota {dimensions = array<i32: 0>} : vector<8x8xi32>
    %101 = tpu.iota {dimensions = array<i32: 1>} : vector<8x8xi32>
    %102 = arith.cmpi eq, %100, %101 : vector<8x8xi32>
    %cst_49 = arith.constant 0.000000e+00 : f32
    %103 = vector.shape_cast %80 : vector<1x8xf32> to vector<1x8xf32>
    %104 = vector.broadcast %103 : vector<1x8xf32> to vector<8x8xf32>
    %105 = vector.broadcast %cst_49 : f32 to vector<8x8xf32>
    %106 = arith.select %102, %104, %105 : vector<8x8xi1>, vector<8x8xf32>
    %107 = vector.broadcast %88 : vector<128x1xf32> to vector<128x128xf32>
    %108 = arith.mulf %107, %54 : vector<128x128xf32>
    %109 = arith.truncf %108 : vector<128x128xf32> to vector<128x128xbf16>
    %cst_50 = arith.constant 1.000000e+00 : f32
    %cst_51 = arith.constant 0.000000e+00 : f32
    %110 = vector.broadcast %cst_50 : f32 to vector<8x128xf32>
    %111 = vector.broadcast %cst_51 : f32 to vector<8x128xf32>
    %112 = arith.select %66, %110, %111 : vector<8x128xi1>, vector<8x128xf32>
    %113 = arith.truncf %112 : vector<8x128xf32> to vector<8x128xbf16>
    %c0_52 = arith.constant 0 : index
    %c0_53 = arith.constant 0 : index
    %114 = vector.load %arg17[%c0_52, %c0_53] : memref<8x128xf32, #tpu.memory_space<vmem>>, vector<8x128xf32>
    %cst_54 = arith.constant dense<0.000000e+00> : vector<8x128xf32>
    %115 = tpu.matmul %106, %114, %cst_54 {dimension_numbers = #tpu.dot_dimension_numbers<[1], [0], [0], [1], [0, 0, 1, 1], [], []>} : vector<8x8xf32>, vector<8x128xf32>, vector<8x128xf32> -> vector<8x128xf32>
    %cst_55 = arith.constant dense<0.000000e+00> : vector<8x128xf32>
    %116 = tpu.matmul %113, %109, %cst_55 {dimension_numbers = #tpu.dot_dimension_numbers<[1], [0], [0], [1], [0, 0, 1, 1], [], []>} : vector<8x128xbf16>, vector<128x128xbf16>, vector<8x128xf32> -> vector<8x128xf32>
    %117 = arith.addf %115, %116 : vector<8x128xf32>
    %c0_56 = arith.constant 0 : index
    %c0_57 = arith.constant 0 : index
    %118 = vector.load %arg17[%c0_56, %c0_57] : memref<8x128xf32, #tpu.memory_space<vmem>>, vector<8x128xf32>
    tpu.vector_store %arg17[%c0_56, %c0_57], %117 {strides = array<i32>} : memref<8x128xf32, #tpu.memory_space<vmem>>, vector<8x128xf32>,
    %c2_i32 = arith.constant 2 : i32
    %119 = arith.cmpi eq, %arg0, %c2_i32 : i32
    %120 = arith.extui %119 : i1 to i32
    %c0_i32_58 = arith.constant 0 : i32
    %121 = arith.cmpi ne, %120, %c0_i32_58 : i32
    scf.if %121 {
      %c0_59 = arith.constant 0 : index
      %c0_60 = arith.constant 0 : index
      %122 = vector.load %arg16[%c0_59, %c0_60] : memref<1x8xf32, #tpu.memory_space<vmem>>, vector<1x8xf32>
      %cst_61 = arith.constant 1.000000e-16 : f32
      %123 = vector.broadcast %cst_61 : f32 to vector<1x8xf32>
      %124 = arith.addf %122, %123 : vector<1x8xf32>
      %125 = tpu.reciprocal %124 {approx = true} : vector<1x8xf32> -> vector<1x8xf32>
      %cst_62 = arith.constant 0.000000e+00 : f32
      %126 = vector.shape_cast %125 : vector<1x8xf32> to vector<1x8xf32>
      %127 = vector.broadcast %126 : vector<1x8xf32> to vector<8x8xf32>
      %128 = vector.broadcast %cst_62 : f32 to vector<8x8xf32>
      %129 = arith.select %102, %127, %128 : vector<8x8xi1>, vector<8x8xf32>
      %c0_63 = arith.constant 0 : index
      %c0_64 = arith.constant 0 : index
      %130 = vector.load %arg17[%c0_63, %c0_64] : memref<8x128xf32, #tpu.memory_space<vmem>>, vector<8x128xf32>
      %cst_65 = arith.constant dense<0.000000e+00> : vector<8x128xf32>
      %131 = tpu.matmul %129, %130, %cst_65 {dimension_numbers = #tpu.dot_dimension_numbers<[1], [0], [0], [1], [0, 0, 1, 1], [], []>} : vector<8x8xf32>, vector<8x128xf32>, vector<8x128xf32> -> vector<8x128xf32>
      %c0_66 = arith.constant 0 : index
      %c0_67 = arith.constant 0 : index
      %132 = vector.load %arg13[%c0_66, %c0_67] : memref<8x128xf32, #tpu.memory_space<vmem>>, vector<8x128xf32>
      tpu.vector_store %arg13[%c0_66, %c0_67], %131 {strides = array<i32>} : memref<8x128xf32, #tpu.memory_space<vmem>>, vector<8x128xf32>,
    } else {
    }
    return
  }
  func.func @transform_0(%arg0: i32) -> (i32, i32) {
    %c0_i32 = arith.constant 0 : i32
    %c0_i32_0 = arith.constant 0 : i32
    return %arg0, %c0_i32 : i32, i32
  }
  func.func @transform_1(%arg0: i32) -> (i32, i32) {
    %c0_i32 = arith.constant 0 : i32
    %c0_i32_0 = arith.constant 0 : i32
    return %arg0, %c0_i32 : i32, i32
  }
  func.func @transform_2(%arg0: i32) -> (i32, i32) {
    %c0_i32 = arith.constant 0 : i32
    %c0_i32_0 = arith.constant 0 : i32
    return %c0_i32, %arg0 : i32, i32
  }
  func.func @transform_3(%arg0: i32) -> (i32, i32) {
    %c0_i32 = arith.constant 0 : i32
    %c0_i32_0 = arith.constant 0 : i32
    %c0_i32_1 = arith.constant 0 : i32
    return %c0_i32, %c0_i32_0 : i32, i32
  }
  func.func @transform_4(%arg0: i32) -> (i32, i32) {
    %c0_i32 = arith.constant 0 : i32
    %c0_i32_0 = arith.constant 0 : i32
    %c0_i32_1 = arith.constant 0 : i32
    return %c0_i32, %c0_i32_0 : i32, i32
  }
  func.func @transform_5(%arg0: i32) -> (i32, i32) {
    %c0_i32 = arith.constant 0 : i32
    %c0_i32_0 = arith.constant 0 : i32
    %c0_i32_1 = arith.constant 0 : i32
    return %c0_i32, %c0_i32_0 : i32, i32
  }
  func.func @transform_6(%arg0: i32) -> (i32, i32) {
    %c0_i32 = arith.constant 0 : i32
    %c0_i32_0 = arith.constant 0 : i32
    %c0_i32_1 = arith.constant 0 : i32
    return %c0_i32, %c0_i32_0 : i32, i32
  }
  func.func @transform_7(%arg0: i32) -> (i32, i32) {
    %c0_i32 = arith.constant 0 : i32
    %c0_i32_0 = arith.constant 0 : i32
    %c0_i32_1 = arith.constant 0 : i32
    return %c0_i32, %c0_i32_0 : i32, i32
  }
  func.func @transform_8(%arg0: i32) -> (i32, i32) {
    %c0_i32 = arith.constant 0 : i32
    %c0_i32_0 = arith.constant 0 : i32
    %c0_i32_1 = arith.constant 0 : i32
    return %c0_i32, %c0_i32_0 : i32, i32
  }
  func.func @transform_9(%arg0: i32) -> (i32, i32) {
    %c0_i32 = arith.constant 0 : i32
    %c0_i32_0 = arith.constant 0 : i32
    %c0_i32_1 = arith.constant 0 : i32
    return %c0_i32, %c0_i32_0 : i32, i32
  }
  func.func @transform_10(%arg0: i32) -> (i32, i32) {
    %c0_i32 = arith.constant 0 : i32
    %c0_i32_0 = arith.constant 0 : i32
    %c0_i32_1 = arith.constant 0 : i32
    return %c0_i32, %c0_i32_0 : i32, i32
  }
  func.func @transform_11(%arg0: i32) -> (i32, i32) {
    %c0_i32 = arith.constant 0 : i32
    %c0_i32_0 = arith.constant 0 : i32
    %c0_i32_1 = arith.constant 0 : i32
    return %c0_i32, %c0_i32_0 : i32, i32
  }
  func.func @transform_12(%arg0: i32) -> (i32, i32) {
    %c0_i32 = arith.constant 0 : i32
    %c0_i32_0 = arith.constant 0 : i32
    %c0_i32_1 = arith.constant 0 : i32
    return %c0_i32, %c0_i32_0 : i32, i32
  }
}

</mosaic_0001>

<bundles_post_ra>
// kernel: tpu_custom_call.1
= control target key start
LH: loop header
LB: loop body
LE: loop exit
PB: predicated region body
PF: predicated region fallthrough
CT: control target
= control target key end

     0   :  { %17 = vsyncpa [#allocation7], 0  ;;  %s3867_s21 = smov 0   ;;  %s5416_s0 = inlined_call_operand.vmem [shape: bf16[384,128], index: 0, kind: input, shape index: {}]   ;;  %s5417_s1 = inlined_call_operand.vmem [shape: s32[384,1], index: 1, kind: input, shape index: {}]   ;;  %s5418_s2 = inlined_call_operand.vmem [shape: s32[1,384], index: 2, kind: input, shape index: {}]   ;;  %s5419_s3 = inlined_call_operand.vmem [shape: bf16[128,8], index: 3, kind: input, shape index: {}]   ;;  %s5420_s4 = inlined_call_operand.vmem [shape: bf16[128,128], index: 4, kind: input, shape index: {}]   ;;  %s5421_s5 = inlined_call_operand.vmem [shape: f32[1,128], index: 5, kind: input, shape index: {}]   ;;  %s5422_s6 = inlined_call_operand.vmem [shape: bf16[128,128], index: 6, kind: input, shape index: {}]   ;;  %s5423_s7 = inlined_call_operand.vmem [shape: f32[1,128], index: 7, kind: input, shape index: {}]   ;;  %s5424_s8 = inlined_call_operand.vmem [shape: bf16[128,128], index: 8, kind: input, shape index: {}]   ;;  %s5425_s9 = inlined_call_operand.vmem [shape: f32[128,1], index: 9, kind: input, shape index: {}]   ;;  %s5426_s10 = inlined_call_operand.vmem [shape: bf16[128,128], index: 10, kind: input, shape index: {}]   ;;  %s5427_s11 = inlined_call_operand.vmem [shape: f32[128,1], index: 11, kind: input, shape index: {}]   ;;  %s5428_s12 = inlined_call_operand.hbm [shape: f32[8,128], index: 12, kind: output, shape index: {}]  }
   0x1 LB: > { %s3873_s22 = sadd.s32 4294967295, %s3790_s21   ;;  %p3165_p0 = scmp.ge.s32.totalorder %s3790_s21, 1  ;;  %s3790_s21 = sphi %s3867_s21, %s23_s21  }
   0x2   : > { %p378_p1 = scmp.lt.s32.totalorder %s3790_s21, 4 }
   0x4   : > { %p379_p2 = pnand %p3165_p0, %p378_p1 }
   0x6   : > { %382 = sbr.rel (%p379_p2) target bundleno = 2302 (0x8fe), region = 68 }
   0xd   : > { %s3166_s23 = sshll.u32 %s3873_s22, 4  ;;  %p435_p3 = scmp.lt.s32.totalorder %s3873_s22, 2 }
   0xe   : > { %p424_p4 = scmp.lt.s32.totalorder %s3166_s23, 47  ;;  %p3170_p5 = scmp.ne.s32.totalorder %s3873_s22, 0 }
   0xf   : > { %s3880_s24 = scalar_select %p435_p3, %s3873_s22, 2 }
  0x10   : > { %s5472_s23 = smov (!%p424_p4, %s3166_s23), 47  ;;  %442 = sbr.rel (%p3170_p5) target bundleno = 652 (0x28c), region = 72 }
  0x11   : > { %s437_s27 = scalar_lea.vmem %s5418_s2, %s3880_s24  ;;  %s3167_s28 = sshll.u32 %s5472_s23, 2 }
  0x12   : > { %s3169_s29 = sshll.u32 %s5472_s23, 3  ;;  %s3889_s14 = scalar_lea.vmem %s5416_s0, %s3167_s28 }
  0x13   : > { %s3894_s17 = scalar_lea.vmem %s5417_s1, %s3169_s29 }
  0x17   : > { %v3540_v0 = vld [vmem:[%s5419_s3] sm:$0xff]   ;;  %v3541_v1 = vld [vmem:[%s5419_s3 + $0x8] sm:$0xff]   ;;  %v3792_v2 = vmov 0   ;;  %v3542_v3 = vld [vmem:[%s5419_s3 + $0x10] sm:$0xff]  }
  0x18   : > { %3538 = vset.pattern.permute.xlu0 %v3792_v2  ;;  %3539 = vset.pattern.permute.xlu1 %v3792_v2  ;;  %v3543_v4 = vld [vmem:[%s5419_s3 + $0x18] sm:$0xff]   ;;  %v3548_v5 = vld [vmem:[%s5424_s8] sm:$0xff]   ;;  %v3545_v8 = vld [vmem:[%s5419_s3 + $0x28] sm:$0xff]  }
  0x19   : > { %3324 = vmatprep.subr.bf16.mxu0 %v3540_v0  ;;  %3340 = vmatprep.mubr.bf16.mxu0 %v3548_v5  ;;  %v3544_v6 = vld [vmem:[%s5419_s3 + $0x20] sm:$0xff]   ;;  %v477_v9 = vld [vmem:[%s5425_s9 + $0x10] sm:$0xff]  ;;  %v476_v10 = vld [vmem:[%s5425_s9 + $0x8] sm:$0xff] }
  0x1a   : > { %3325 = vmatpush3.bf16.msra.mxu0 %v3540_v0  ;;  %v475_v7 = vld [vmem:[%s5425_s9] sm:$0xff]  ;;  %503 = vperm.xlu1 %3539, %v477_v9   ;;  %v478_v11 = vld [vmem:[%s5425_s9 + $0x18] sm:$0xff]  ;;  %v3546_v12 = vld [vmem:[%s5419_s3 + $0x30] sm:$0xff]  }
  0x1b   : > { %3326 = vmatprep.subr.bf16.mxu0 %v3541_v1  ;;  %493 = vperm.xlu0 %3538, %v475_v7   ;;  %v479_v13 = vld [vmem:[%s5425_s9 + $0x20] sm:$0xff]  ;;  %v480_v14 = vld [vmem:[%s5425_s9 + $0x28] sm:$0xff]  ;;  %v3547_v15 = vld [vmem:[%s5419_s3 + $0x38] sm:$0xff]  }
  0x1c   : > { %v481_v16 = vld [vmem:[%s5425_s9 + $0x30] sm:$0xff]  ;;  %v482_v17 = vld [vmem:[%s5425_s9 + $0x38] sm:$0xff]  ;;  %v483_v18 = vld [vmem:[%s5425_s9 + $0x40] sm:$0xff] }
  0x1d   : > { %v3549_v19 = vld [vmem:[%s5424_s8 + $0x8] sm:$0xff]   ;;  %v3550_v21 = vld [vmem:[%s5424_s8 + $0x10] sm:$0xff]   ;;  %v486_v23 = vld [vmem:[%s5425_s9 + $0x58] sm:$0xff] }
  0x1e   : > { %3327 = vmatpush3.bf16.msra.mxu0 %v3541_v1  ;;  %508 = vperm.xlu1 %3539, %v478_v11   ;;  %v484_v20 = vld [vmem:[%s5425_s9 + $0x48] sm:$0xff]  ;;  %v485_v22 = vld [vmem:[%s5425_s9 + $0x50] sm:$0xff]  ;;  %v487_v24 = vld [vmem:[%s5425_s9 + $0x60] sm:$0xff] }
  0x1f   : > { %3328 = vmatprep.subr.bf16.mxu0 %v3542_v3  ;;  %498 = vperm.xlu0 %3538, %v476_v10   ;;  %v3551_v25 = vld [vmem:[%s5424_s8 + $0x18] sm:$0xff]   ;;  %v488_v26 = vld [vmem:[%s5425_s9 + $0x68] sm:$0xff]  ;;  %v3552_v27 = vld [vmem:[%s5424_s8 + $0x20] sm:$0xff]  }
  0x20   : > { %v489_v28 = vld [vmem:[%s5425_s9 + $0x70] sm:$0xff]  ;;  %v490_v29 = vld [vmem:[%s5425_s9 + $0x78] sm:$0xff]  ;;  %v1220_v30 = vld [vmem:[%s5427_s11] sm:$0xff] }
  0x21   : > { %v3553_v31 = vld [vmem:[%s5424_s8 + $0x28] sm:$0xff]   ;;  %v3554_v33 = vld [vmem:[%s5424_s8 + $0x30] sm:$0xff]   ;;  %v1223_v35 = vld [vmem:[%s5427_s11 + $0x18] sm:$0xff] }
  0x22   : > { %3329 = vmatpush3.bf16.msra.mxu0 %v3542_v3  ;;  %518 = vperm.xlu1 %3539, %v480_v14   ;;  %v1221_v32 = vld [vmem:[%s5427_s11 + $0x8] sm:$0xff]  ;;  %v1222_v34 = vld [vmem:[%s5427_s11 + $0x10] sm:$0xff]  ;;  %v1224_v36 = vld [vmem:[%s5427_s11 + $0x20] sm:$0xff] }
  0x23   : > { %3330 = vmatprep.subr.bf16.mxu0 %v3543_v4  ;;  %513 = vperm.xlu0 %3538, %v479_v13   ;;  %v3555_v37 = vld [vmem:[%s5424_s8 + $0x38] sm:$0xff]   ;;  %v1225_v38 = vld [vmem:[%s5427_s11 + $0x28] sm:$0xff]  ;;  %v1226_v39 = vld [vmem:[%s5427_s11 + $0x30] sm:$0xff] }
  0x24   : > { %v1227_v40 = vld [vmem:[%s5427_s11 + $0x38] sm:$0xff]  ;;  %v1228_v41 = vld [vmem:[%s5427_s11 + $0x40] sm:$0xff]  ;;  %v1229_v42 = vld [vmem:[%s5427_s11 + $0x48] sm:$0xff] }
  0x25   : > { %v1230_v43 = vld [vmem:[%s5427_s11 + $0x50] sm:$0xff]  ;;  %v1231_v44 = vld [vmem:[%s5427_s11 + $0x58] sm:$0xff]  ;;  %v1232_v45 = vld [vmem:[%s5427_s11 + $0x60] sm:$0xff] }
  0x26   : > { %3331 = vmatpush3.bf16.msra.mxu0 %v3543_v4  ;;  %528 = vperm.xlu1 %3539, %v482_v17   ;;  %v1233_v46 = vld [vmem:[%s5427_s11 + $0x68] sm:$0xff]  ;;  %v1234_v47 = vld [vmem:[%s5427_s11 + $0x70] sm:$0xff]  ;;  %v1235_v48 = vld [vmem:[%s5427_s11 + $0x78] sm:$0xff] }
  0x27   : > { %3332 = vmatprep.subr.bf16.mxu0 %v3544_v6  ;;  %523 = vperm.xlu0 %3538, %v481_v16  }
  0x2a   : > { %3333 = vmatpush3.bf16.msra.mxu0 %v3544_v6  ;;  %538 = vperm.xlu1 %3539, %v484_v20  }
  0x2b   : > { %3334 = vmatprep.subr.bf16.mxu0 %v3545_v8  ;;  %533 = vperm.xlu0 %3538, %v483_v18   ;;  %v3556_v18 = vld [vmem:[%s5426_s10] sm:$0xff]  }
  0x2c   : > { %3372 = vmatprep.mubr.bf16.mxu1 %v3556_v18 }
  0x2e   : > { %3335 = vmatpush3.bf16.msra.mxu0 %v3545_v8  ;;  %548 = vperm.xlu1 %3539, %v486_v23  }
  0x2f   : > { %3336 = vmatprep.subr.bf16.mxu0 %v3546_v12  ;;  %543 = vperm.xlu0 %3538, %v485_v22  }
  0x32   : > { %3337 = vmatpush3.bf16.msra.mxu0 %v3546_v12  ;;  %558 = vperm.xlu1 %3539, %v488_v26  }
  0x33   : > { %3338 = vmatprep.subr.bf16.mxu0 %v3547_v15  ;;  %553 = vperm.xlu0 %3538, %v487_v24  }
  0x36   : > { %3339 = vmatpush3.bf16.msra.mxu0 %v3547_v15  ;;  %568 = vperm.xlu1 %3539, %v490_v29  }
  0x37   : > { %563 = vperm.xlu0 %3538, %v489_v28  }
  0x39   : > { %3341 = vmatmul.mubr.bf16.vlgmr.msra.gmra.mrb[0].mxu0 %v3549_v19 }
  0x3a   : > { %3344 = vmatprep.mubr.bf16.mxu0 %v3550_v21  ;;  %1243 = vperm.xlu1 %3539, %v1221_v32  }
  0x3b   : > { %1238 = vperm.xlu0 %3538, %v1220_v30  }
  0x3e   : > { %1253 = vperm.xlu1 %3539, %v1223_v35  }
  0x3f   : > { %1248 = vperm.xlu0 %3538, %v1222_v34  }
  0x41   : > { %3345 = vmatmul.mubr.bf16.gmra.mrb[4].mxu0 %v3551_v25 }
  0x42   : > { %3348 = vmatprep.mubr.bf16.mxu0 %v3552_v27  ;;  %1263 = vperm.xlu1 %3539, %v1225_v38  }
  0x43   : > { %1258 = vperm.xlu0 %3538, %v1224_v36  }
  0x46   : > { %1273 = vperm.xlu1 %3539, %v1227_v40  }
  0x47   : > { %1268 = vperm.xlu0 %3538, %v1226_v39  }
  0x49   : > { %3349 = vmatmul.mubr.bf16.gmra.mrb[8].mxu0 %v3553_v31 }
  0x4a   : > { %3352 = vmatprep.mubr.bf16.mxu0 %v3554_v33  ;;  %1283 = vperm.xlu1 %3539, %v1229_v42  }
  0x4b   : > { %1278 = vperm.xlu0 %3538, %v1228_v41  }
  0x4e   : > { %1293 = vperm.xlu1 %3539, %v1231_v44  }
  0x4f   : > { %1288 = vperm.xlu0 %3538, %v1230_v43  }
  0x51   : > { %3353 = vmatmul.mubr.bf16.gmra.mrb[12].mxu0 %v3555_v37 }
  0x52   : > { %1303 = vperm.xlu1 %3539, %v1233_v46  }
  0x53   : > { %1298 = vperm.xlu0 %3538, %v1232_v45  }
  0x56   : > { %1313 = vperm.xlu1 %3539, %v1235_v48  }
  0x57   : > { %1308 = vperm.xlu0 %3538, %v1234_v47  }
  0x99   : > { %v504_v50 = vpop.permute.xlu1 %503 }
  0x9a   : > { %v494_v49 = vpop.permute.xlu0 %493 }
  0x9d   : > { %v509_v53 = vpop.permute.xlu1 %508 }
  0x9e   : > { %v499_v51 = vpop.permute.xlu0 %498 }
  0xa1   : > { %v519_v0 = vpop.permute.xlu1 %518 }
  0xa2   : > { %v514_v63 = vpop.permute.xlu0 %513 }
  0xa5   : > { %v529_v14 = vpop.permute.xlu1 %528 }
  0xa6   : > { %v524_v13 = vpop.permute.xlu0 %523 }
  0xaa   : > { %v534_v31 = vpop.permute.xlu0 %533 }
 0x10c   : > { %v3342_v52 = vpop.f32.mrb[0].mxu0 }
 0x10d   : > { %v710_v54 = vadd.f32 %v3342_v52, %v504_v50  ;;  %v701_v55 = vpop.f32.mrb[1].mxu0 }
 0x10e   : > { %v3343_v56 = vpop.f32.mrb[2].mxu0  ;;  %v702_v58 = vadd.f32 %v701_v55, %v494_v49 }
 0x10f   : > { %v4041_v57 = vmul.f32 0.70710677, %v710_v54  ;;  %v4043_v59 = vadd.f32 %v3343_v56, %v509_v53  ;;  %v704_v60 = vpop.f32.mrb[3].mxu0  ;;  %v4091_v40 = vmul.f32 0.5, %v710_v54  ;;  %v544_v56 = vpop.permute.xlu0 %543 }
 0x110   : > { %v4049_v2 = vmul.f32 0.70710677, %v702_v58  ;;  %v4052_v7 = vadd.f32 %v704_v60, %v499_v51  ;;  %v4096_v45 = vmul.f32 0.5, %v702_v58 }
 0x111   : > { %v798_v61 = vand.u32 2147483647, %v4041_v57  ;;  %v4047_v62 = vmul.f32 0.70710677, %v4043_v59  ;;  %v4104_v58 = vmul.f32 0.5, %v4043_v59  ;;  %vm1118_vm0 = vcmp.ge.f32.partialorder %v4041_v57, 0.0 }
 0x112   : > { %v796_v10 = vand.u32 2147483647, %v4049_v2  ;;  %v4056_v15 = vmul.f32 0.70710677, %v4052_v7  ;;  %vm1116_vm10 = vcmp.ge.f32.partialorder %v4049_v2, 0.0 }
 0x113   : > { %v814_v1 = vmul.f32 0.3275911, %v798_v61  ;;  %v799_v3 = vand.u32 2147483647, %v4047_v62  ;;  %v1022_v19 = vmul.f32 %v798_v61, %v798_v61  ;;  %vm1119_vm1 = vcmp.ge.f32.partialorder %v4047_v62, 0.0 }
 0x114   : > { %v3346_v4 = vpop.f32.mrb[4].mxu0  ;;  %v812_v21 = vmul.f32 0.3275911, %v796_v10  ;;  %v1020_v24 = vmul.f32 %v796_v10, %v796_v10  ;;  %v797_v28 = vand.u32 2147483647, %v4056_v15  ;;  %vm1117_vm11 = vcmp.ge.f32.partialorder %v4056_v15, 0.0 }
 0x115   : > { %v830_v5 = vadd.f32 1.0, %v814_v1  ;;  %v815_v6 = vmul.f32 0.3275911, %v799_v3  ;;  %v717_v8 = vpop.f32.mrb[5].mxu0  ;;  %v4058_v16 = vadd.f32 %v3346_v4, %v524_v13  ;;  %v1038_v32 = vsub.f32 0.0, %v1022_v19 }
 0x116   : > { %v3347_v9 = vpop.f32.mrb[6].mxu0  ;;  %v4060_v17 = vadd.f32 %v717_v8, %v514_v63  ;;  %v1023_v36 = vmul.f32 %v799_v3, %v799_v3  ;;  %v1036_v41 = vsub.f32 0.0, %v1020_v24  ;;  %v828_v46 = vadd.f32 1.0, %v812_v21 }
 0x117   : > { %3564 = vrcp.f32 %v830_v5  ;;  %v831_v11 = vadd.f32 1.0, %v815_v6  ;;  %v720_v12 = vpop.f32.mrb[7].mxu0  ;;  %v4065_v20 = vadd.f32 %v3347_v9, %v529_v14  ;;  %v4068_v22 = vmul.f32 0.70710677, %v4058_v16  ;;  %v4125_v14 = vpop.permute.xlu1 %538 }
 0x118   : > { %v4070_v23 = vadd.f32 %v720_v12, %v519_v0  ;;  %v4073_v25 = vmul.f32 0.70710677, %v4060_v17  ;;  %v1056_v50 = vmul.f32 1.442695, %v1038_v32  ;;  %v1021_v51 = vmul.f32 %v797_v28, %v797_v28 }
 0x119   : > { %3566 = vrcp.f32 %v831_v11  ;;  %v4076_v26 = vmul.f32 0.70710677, %v4065_v20  ;;  %v802_v29 = vand.u32 2147483647, %v4068_v22  ;;  %v1039_v53 = vsub.f32 0.0, %v1023_v36 }
 0x11a   : > { %v800_v33 = vand.u32 2147483647, %v4073_v25  ;;  %v4087_v38 = vmul.f32 0.70710677, %v4070_v23  ;;  %v1052_v61 = vmul.f32 1.442695, %v1036_v41 }
 0x11b   : > { %v4082_v34 = vand.u32 2147483647, %v4076_v26  ;;  %v818_v37 = vmul.f32 0.3275911, %v802_v29  ;;  %v813_v1 = vmul.f32 0.3275911, %v797_v28  ;;  %v1026_v21 = vmul.f32 %v802_v29, %v802_v29 }
 0x11c   : > { %v3350_v27 = vpop.f32.mrb[8].mxu0  ;;  %v816_v42 = vmul.f32 0.3275911, %v800_v33  ;;  %v4099_v48 = vand.u32 2147483647, %v4087_v38  ;;  %v1037_v9 = vsub.f32 0.0, %v1021_v51  ;;  %v549_v51 = vpop.permute.xlu1 %548 }
 0x11d   : > { %v733_v30 = vpop.f32.mrb[9].mxu0  ;;  %v819_v43 = vmul.f32 0.3275911, %v4082_v34  ;;  %v834_v47 = vadd.f32 1.0, %v818_v37  ;;  %v4110_v4 = vadd.f32 %v3350_v27, %v544_v56  ;;  %v1058_v10 = vmul.f32 1.442695, %v1039_v53 }
 0x11e   : > { %v4084_v35 = vpop.f32.mrb[10].mxu0  ;;  %v832_v52 = vadd.f32 1.0, %v816_v42  ;;  %v817_v55 = vmul.f32 0.3275911, %v4099_v48  ;;  %v4121_v12 = vadd.f32 %v733_v30, %v534_v31  ;;  %v4128_v24 = vmul.f32 0.5, %v4052_v7 }
 0x11f   : > { %v4089_v39 = vpop.f32.mrb[11].mxu0  ;;  %3568 = vrcp.f32 %v834_v47  ;;  %v835_v54 = vadd.f32 1.0, %v819_v43  ;;  %v4119_v11 = vmul.f32 0.70710677, %v4110_v4  ;;  %v829_v27 = vadd.f32 1.0, %v813_v1 }
 0x120   : > { %3570 = vrcp.f32 %v832_v52  ;;  %v833_v3 = vadd.f32 1.0, %v817_v55  ;;  %5443 = vst [vmem:[#allocation9_spill] sm:$0xff] %v4128_v24  ;;  %v1054_v36 = vmul.f32 1.442695, %v1037_v9  ;;  %v1024_v30 = vmul.f32 %v800_v33, %v800_v33 }
 0x121   : > { %v4094_v44 = vpop.eup %3564  ;;  %3572 = vrcp.f32 %v828_v46  ;;  %v806_v28 = vand.u32 2147483647, %v4119_v11  ;;  %v4133_v31 = vmul.f32 0.70710677, %v4121_v12  ;;  %v4136_v37 = vmul.f32 0.5, %v4058_v16 }
 0x122   : > { %v878_v49 = vmul.f32 1.0614054, %v4094_v44  ;;  %3574 = vpow2.f32 %v1056_v50  ;;  %v4139_v29 = vmul.f32 0.5, %v4060_v17  ;;  %v1042_v43 = vsub.f32 0.0, %v1026_v21 }
 0x123   : > { %v4108_v0 = vpop.eup %3566  ;;  %3576 = vrcp.f32 %v835_v54  ;;  %v822_v7 = vmul.f32 0.3275911, %v806_v28  ;;  %v4143_v46 = vand.u32 2147483647, %v4133_v31  ;;  %v4148_v33 = vmul.f32 0.5, %v4065_v20 }
 0x124   : > { %v894_v60 = vadd.f32 -1.4531521, %v878_v49  ;;  %v4106_v63 = vpop.f32.mrb[12].mxu0  ;;  %v879_v8 = vmul.f32 1.0614054, %v4108_v0  ;;  %3578 = vpow2.f32 %v1052_v61  ;;  %v1027_v16 = vmul.f32 %v4082_v34, %v4082_v34 }
 0x125   : > { %v4112_v5 = vpop.f32.mrb[13].mxu0  ;;  %3580 = vrcp.f32 %v833_v3  ;;  %v4153_v49 = vmul.f32 0.5, %v4070_v23  ;;  %v838_v17 = vadd.f32 1.0, %v822_v7  ;;  %v1040_v54 = vsub.f32 0.0, %v1024_v30 }
 0x126   : > { %v910_v6 = vmul.f32 %v4094_v44, %v894_v60  ;;  %v4116_v59 = vpop.f32.mrb[14].mxu0  ;;  %v895_v19 = vadd.f32 -1.4531521, %v879_v8  ;;  %3582 = vpow2.f32 %v1058_v10  ;;  %v820_v55 = vmul.f32 0.3275911, %v4143_v46 }
 0x127   : > { %v4123_v13 = vpop.f32.mrb[15].mxu0  ;;  %v1025_v34 = vmul.f32 %v4099_v48, %v4099_v48  ;;  %3584 = vrcp.f32 %v838_v17  ;;  %v4166_v23 = vadd.f32 %v4084_v35, %v549_v51  ;;  %v1064_v3 = vmul.f32 1.442695, %v1042_v43 }
 0x128   : > { %v926_v18 = vadd.f32 1.4214138, %v910_v6  ;;  %v911_v32 = vmul.f32 %v4108_v0, %v895_v19  ;;  %3586 = vrcp.f32 %v829_v27  ;;  %v1043_v9 = vsub.f32 0.0, %v1027_v16 }
 0x129   : > { %v4145_v47 = vpop.eup %3568  ;;  %3588 = vpow2.f32 %v1054_v36  ;;  %v836_v10 = vadd.f32 1.0, %v820_v55  ;;  %v1060_v21 = vmul.f32 1.442695, %v1040_v54  ;;  %v1041_v30 = vsub.f32 0.0, %v1025_v34 }
 0x12a   : > { %v942_v41 = vmul.f32 %v4094_v44, %v926_v18  ;;  %v927_v42 = vadd.f32 1.4214138, %v911_v32  ;;  %v4155_v50 = vpop.eup %3570  ;;  %v882_v53 = vmul.f32 1.0614054, %v4145_v47  ;;  %v4180_v7 = vmul.f32 0.70710677, %v4166_v23 }
 0x12b   : > { %v4160_v56 = vpop.eup %3572  ;;  %v880_v20 = vmul.f32 1.0614054, %v4155_v50  ;;  %3590 = vrcp.f32 %v836_v10  ;;  %v1030_v51 = vmul.f32 %v806_v28, %v806_v28  ;;  %vm1122_vm2 = vcmp.ge.f32.partialorder %v4068_v22, 0.0 }
 0x12c   : > { %v943_v52 = vmul.f32 %v4108_v0, %v927_v42  ;;  %v4168_v60 = vpop.eup %3574  ;;  %v958_v61 = vadd.f32 -0.28449672, %v942_v41  ;;  %v898_v1 = vadd.f32 -1.4531521, %v882_v53  ;;  %3592 = vpow2.f32 %v1064_v3 }
 0x12d   : > { %v4170_v6 = vpop.eup %3576  ;;  %v896_v8 = vadd.f32 -1.4531521, %v880_v20  ;;  %v1066_v20 = vmul.f32 1.442695, %v1043_v9  ;;  %3594 = vpow2.f32 %v1060_v21  ;;  %vm1120_vm3 = vcmp.ge.f32.partialorder %v4073_v25, 0.0 }
 0x12e   : > { %v4172_v18 = vpop.eup %3578  ;;  %v959_v19 = vadd.f32 -0.28449672, %v943_v52  ;;  %v914_v48 = vmul.f32 %v4145_v47, %v898_v1  ;;  %v883_v35 = vmul.f32 1.0614054, %v4170_v6  ;;  %v974_v36 = vmul.f32 %v4094_v44, %v958_v61 }
 0x12f   : > { %v4176_v32 = vpop.eup %3580  ;;  %v912_v27 = vmul.f32 %v4155_v50, %v896_v8  ;;  %v807_v52 = vand.u32 2147483647, %v4180_v7  ;;  %v1062_v1 = vmul.f32 1.442695, %v1041_v30  ;;  %3596 = vpow2.f32 %v1066_v20 }
 0x130   : > { %v930_v41 = vadd.f32 1.4214138, %v914_v48  ;;  %v899_v42 = vadd.f32 -1.4531521, %v883_v35  ;;  %v3583_v43 = vpop.eup %3582  ;;  %v881_v17 = vmul.f32 1.0614054, %v4176_v32  ;;  %v975_v53 = vmul.f32 %v4108_v0, %v959_v19 }
 0x131   : > { %v928_v16 = vadd.f32 1.4214138, %v912_v27  ;;  %v823_v3 = vmul.f32 0.3275911, %v807_v52  ;;  %v990_v8 = vadd.f32 0.2548296, %v974_v36  ;;  %v4189_v35 = vpop.eup %3584  ;;  %3598 = vpow2.f32 %v1062_v1 }
 0x132   : > { %v946_v54 = vmul.f32 %v4145_v47, %v930_v41  ;;  %v915_v55 = vmul.f32 %v4170_v6, %v899_v42  ;;  %v897_v61 = vadd.f32 -1.4531521, %v881_v17  ;;  %v1046_v19 = vsub.f32 0.0, %v1030_v51  ;;  %v4192_v41 = vpop.eup %3586 }
 0x133   : > { %v944_v34 = vmul.f32 %v4155_v50, %v928_v16  ;;  %v839_v24 = vadd.f32 1.0, %v823_v3  ;;  %v991_v42 = vadd.f32 0.2548296, %v975_v53  ;;  %v4196_v30 = vpop.eup %3588  ;;  %v886_v17 = vmul.f32 1.0614054, %v4189_v35 }
 0x134   : > { %v962_v10 = vadd.f32 -0.28449672, %v946_v54  ;;  %v931_v48 = vadd.f32 1.4214138, %v915_v55  ;;  %v913_v27 = vmul.f32 %v4176_v32, %v897_v61  ;;  %v1006_v54 = vmul.f32 %v4094_v44, %v990_v8  ;;  %v4210_v8 = vpop.permute.xlu0 %553 }
 0x135   : > { %v960_v28 = vadd.f32 -0.28449672, %v944_v34  ;;  %3600 = vrcp.f32 %v839_v24  ;;  %v4201_v34 = vpop.eup %3590  ;;  %v902_v3 = vadd.f32 -1.4531521, %v886_v17  ;;  %v1072_v20 = vmul.f32 1.442695, %v1046_v19 }
 0x136   : > { %v978_v9 = vmul.f32 %v4145_v47, %v962_v10  ;;  %v947_v16 = vmul.f32 %v4170_v6, %v931_v48  ;;  %v929_v36 = vadd.f32 1.4214138, %v913_v27  ;;  %v3593_v10 = vpop.eup %3592  ;;  %v1007_v48 = vmul.f32 %v4108_v0, %v991_v42 }
 0x137   : > { %v976_v21 = vmul.f32 %v4155_v50, %v960_v28  ;;  %v4207_v1 = vmul.f32 0.5, %v4110_v4  ;;  %v884_v44 = vmul.f32 1.0614054, %v4201_v34  ;;  %v1028_v19 = vmul.f32 %v4143_v46, %v4143_v46  ;;  %v3595_v17 = vpop.eup %3594 }
 0x138   : > { %v994_v51 = vadd.f32 0.2548296, %v978_v9  ;;  %v963_v55 = vadd.f32 -0.28449672, %v947_v16  ;;  %v945_v61 = vmul.f32 %v4176_v32, %v929_v36  ;;  %v918_v9 = vmul.f32 %v4189_v35, %v902_v3 }
 0x139   : > { %v992_v53 = vadd.f32 0.2548296, %v976_v21  ;;  %v4217_v16 = vmul.f32 %v4168_v60, %v1006_v54  ;;  %v900_v4 = vadd.f32 -1.4531521, %v884_v44  ;;  %3602 = vpow2.f32 %v1072_v20  ;;  %v3597_v3 = vpop.eup %3596 }
 0x13a   : > { %v979_v28 = vmul.f32 %v4170_v6, %v963_v55  ;;  %v1010_v24 = vmul.f32 %v4145_v47, %v994_v51  ;;  %v961_v27 = vadd.f32 -0.28449672, %v945_v61  ;;  %v934_v36 = vadd.f32 1.4214138, %v918_v9 }
 0x13b   : > { %v1008_v0 = vmul.f32 %v4155_v50, %v992_v53  ;;  %v4223_v47 = vadd.f32 %v4089_v39, %v4125_v14  ;;  %v1087_v51 = vmul.f32 %v3583_v43, %v1007_v48  ;;  %v916_v46 = vmul.f32 %v4201_v34, %v900_v4  ;;  %v3599_v43 = vpop.eup %3598 }
 0x13c   : > { %v995_v42 = vadd.f32 0.2548296, %v979_v28  ;;  %v977_v21 = vmul.f32 %v4176_v32, %v961_v27  ;;  %v1031_v60 = vmul.f32 %v807_v52, %v807_v52  ;;  %v1090_v54 = vmul.f32 %v3593_v10, %v1010_v24 }
 0x13d   : > { %v950_v50 = vmul.f32 %v4189_v35, %v934_v36  ;;  %v1044_v53 = vsub.f32 0.0, %v1028_v19  ;;  %v1102_v28 = vsub.f32 1.0, %v4217_v16  ;;  %v1088_v20 = vmul.f32 %v3595_v17, %v1008_v0 }
 0x13e   : > { %v1011_v55 = vmul.f32 %v4170_v6, %v995_v42  ;;  %v993_v61 = vadd.f32 0.2548296, %v977_v21  ;;  %v4231_v39 = vmul.f32 0.5, %v4121_v12  ;;  %v932_v14 = vadd.f32 1.4214138, %v916_v46  ;;  %v564_v6 = vpop.permute.xlu0 %563 }
 0x13f   : > { %v966_v48 = vadd.f32 -0.28449672, %v950_v50  ;;  %v4236_v44 = vmul.f32 0.70710677, %v4223_v47  ;;  %v4238_v24 = vpop.eup %3600  ;;  %v1103_v27 = vsub.f32 1.0, %v1087_v51  ;;  %v1047_v9 = vsub.f32 0.0, %v1031_v60 }
 0x140   : > { %v1091_v52 = vmul.f32 %v3597_v3, %v1011_v55  ;;  %v1009_v10 = vmul.f32 %v4176_v32, %v993_v61  ;;  %v948_v12 = vmul.f32 %v4201_v34, %v932_v14  ;;  %v4243_v19 = vadd.f32 %v4106_v63, %v564_v6 }
 0x141   : > { %v1106_v16 = vsub.f32 1.0, %v1090_v54  ;;  %v982_v32 = vmul.f32 %v4189_v35, %v966_v48  ;;  %v1068_v42 = vmul.f32 1.442695, %v1044_v53  ;;  %v1104_v4 = vsub.f32 1.0, %v1088_v20 }
 0x142   : > { %v1089_v0 = vmul.f32 %v3599_v43, %v1009_v10  ;;  %vm1123_vm4 = vcmp.ge.f32.partialorder %v4076_v26, 0.0  ;;  %v964_v21 = vadd.f32 -0.28449672, %v948_v12  ;;  %v4249_v36 = vmul.f32 0.5, %v4166_v23  ;;  %v559_v10 = vpop.permute.xlu1 %558 }
 0x143   : > { %v887_v17 = vmul.f32 1.0614054, %v4238_v24  ;;  %v1134_v51 = vsub.f32 0.0, %v1102_v28  ;;  %v1107_v55 = vsub.f32 1.0, %v1091_v52  ;;  %vm1121_vm5 = vcmp.ge.f32.partialorder %v4087_v38, 0.0  ;;  %v3603_v53 = vpop.eup %3602 }
 0x144   : > { %v998_v63 = vadd.f32 0.2548296, %v982_v32  ;;  %v805_v46 = vand.u32 2147483647, %v4236_v44  ;;  %v1135_v60 = vsub.f32 0.0, %v1103_v27  ;;  %v1105_v54 = vsub.f32 1.0, %v1089_v0 }
 0x145   : > { %v903_v61 = vadd.f32 -1.4531521, %v887_v17  ;;  %v1074_v50 = vmul.f32 1.442695, %v1047_v9  ;;  %v1138_v3 = vsub.f32 0.0, %v1106_v16  ;;  %v980_v23 = vmul.f32 %v4201_v34, %v964_v21 }
 0x146   : > { %v1014_v20 = vmul.f32 %v4189_v35, %v998_v63  ;;  %v821_v14 = vmul.f32 0.3275911, %v805_v46  ;;  %v1136_v43 = vsub.f32 0.0, %v1104_v4  ;;  %3604 = vpow2.f32 %v1068_v42 }
 0x147   : > { %v919_v6 = vmul.f32 %v4238_v24, %v903_v61  ;;  %v4259_v52 = vadd.f32 %v4112_v5, %v4210_v8  ;;  %v1150_v48 = vsel %vm1118_vm0, %v1102_v28, %v1134_v51  ;;  %v1139_v12 = vsub.f32 0.0, %v1107_v55  ;;  %v569_v61 = vpop.permute.xlu1 %568 }
 0x148   : > { %v1094_v9 = vmul.f32 %v3603_v53, %v1014_v20  ;;  %v837_v0 = vadd.f32 1.0, %v821_v14  ;;  %v1151_v35 = vsel %vm1119_vm1, %v1103_v27, %v1135_v60  ;;  %v1137_v32 = vsub.f32 0.0, %v1105_v54 }
 0x149   : > { %v935_v21 = vadd.f32 1.4214138, %v919_v6  ;;  %3606 = vpow2.f32 %v1074_v50  ;;  %v1154_v42 = vsel %vm1122_vm2, %v1106_v16, %v1138_v3  ;;  %v996_v17 = vadd.f32 0.2548296, %v980_v23 }
 0x14a   : > { %3608 = vrcp.f32 %v837_v0  ;;  %v4268_v5 = vmul.f32 0.70710677, %v4243_v19  ;;  %v1166_v8 = vadd.f32 1.0, %v1150_v48  ;;  %v1152_v57 = vsel %vm1120_vm3, %v1104_v4, %v1136_v43 }
 0x14b   : > { %vm1126_vm6 = vcmp.ge.f32.partialorder %v4119_v11, 0.0  ;;  %v951_v62 = vmul.f32 %v4238_v24, %v935_v21  ;;  %v1029_v28 = vmul.f32 %v805_v46, %v805_v46  ;;  %v1155_v27 = vsel %vm1123_vm4, %v1107_v55, %v1139_v12 }
 0x14c   : > { %v1110_v51 = vsub.f32 1.0, %v1094_v9  ;;  %v810_v22 = vand.u32 2147483647, %v4268_v5  ;;  %v4278_v16 = vmul.f32 0.70710677, %v4259_v52  ;;  %v1167_v63 = vadd.f32 1.0, %v1151_v35 }
 0x14d   : > { %v1170_v60 = vadd.f32 1.0, %v1154_v42  ;;  %v1153_v25 = vsel %vm1121_vm5, %v1105_v54, %v1137_v32  ;;  %v967_v4 = vadd.f32 -0.28449672, %v951_v62  ;;  %v1168_v50 = vadd.f32 1.0, %v1152_v57 }
 0x14e   : > { %v1012_v53 = vmul.f32 %v4201_v34, %v996_v17  ;;  %v826_v46 = vmul.f32 0.3275911, %v810_v22  ;;  %v808_v26 = vand.u32 2147483647, %v4278_v16  ;;  %v1171_v55 = vadd.f32 1.0, %v1155_v27 }
 0x14f   : > { %v983_v3 = vmul.f32 %v4238_v24, %v967_v4  ;;  %v1045_v20 = vsub.f32 0.0, %v1029_v28  ;;  %v4286_v23 = vadd.f32 %v4116_v59, %v569_v61  ;;  %v1169_v14 = vadd.f32 1.0, %v1153_v25 }
 0x150   : > { %v1142_v43 = vsub.f32 0.0, %v1110_v51  ;;  %v842_v6 = vadd.f32 1.0, %v826_v46  ;;  %v824_v38 = vmul.f32 0.3275911, %v808_v26  ;;  %v3605_v54 = vpop.eup %3604  ;;  %v1182_v48 = vmul.f32 %v1166_v8, %v4091_v40 }
 0x151   : > { %v1183_v12 = vmul.f32 %v1167_v63, %v4104_v58  ;;  %v4291_v34 = vmul.f32 %v1170_v60, %v4136_v37  ;;  %v999_v9 = vadd.f32 0.2548296, %v983_v3  ;;  %v4294_v0 = vmul.f32 %v1168_v50, %v4139_v29 }
 0x152   : > { %v4296_v35 = vmul.f32 %v3605_v54, %v1012_v53  ;;  %vm1127_vm7 = vcmp.ge.f32.partialorder %v4180_v7, 0.0  ;;  %3610 = vrcp.f32 %v842_v6  ;;  %v840_v59 = vadd.f32 1.0, %v824_v38 }
 0x153   : > { %v3607_v32 = vpop.eup %3606  ;;  %v1015_v21 = vmul.f32 %v4238_v24, %v999_v9  ;;  %v1070_v42 = vmul.f32 1.442695, %v1045_v20  ;;  %v4301_v40 = vmul.f32 0.70710677, %v4286_v23  ;;  %v4304_v58 = vadd.f32 %v4123_v13, %v559_v10 }
 0x154   : > { %v4306_v37 = vpop.eup %3608  ;;  %v1187_v29 = vmul.f32 %v1171_v55, %v4148_v33  ;;  %v1185_v17 = vmul.f32 %v1169_v14, %v4153_v49  ;;  %v1158_v8 = vsel %vm1126_vm6, %v1110_v51, %v1142_v43  ;;  %v876_v57 = vmul.f32 1.0614054, %v4160_v56 }
 0x155   : > { %v1095_v62 = vmul.f32 %v3607_v32, %v1015_v21  ;;  %v885_v24 = vmul.f32 1.0614054, %v4306_v37  ;;  %3612 = vrcp.f32 %v840_v59  ;;  %v877_v28 = vmul.f32 1.0614054, %v4192_v41 }
 0x156   : > { %v1108_v13 = vsub.f32 1.0, %v4296_v35  ;;  %v1034_v10 = vmul.f32 %v810_v22, %v810_v22  ;;  %v811_v27 = vand.u32 2147483647, %v4301_v40  ;;  %v4318_v33 = vmul.f32 0.70710677, %v4304_v58 }
 0x157   : > { %v1111_v49 = vsub.f32 1.0, %v1095_v62  ;;  %v901_v63 = vadd.f32 -1.4531521, %v885_v24  ;;  %3614 = vpow2.f32 %v1070_v42  ;;  %v892_v11 = vadd.f32 -1.4531521, %v876_v57 }
 0x158   : > { %v1174_v51 = vadd.f32 1.0, %v1158_v8  ;;  %v1032_v60 = vmul.f32 %v808_v26, %v808_v26  ;;  %v827_v25 = vmul.f32 0.3275911, %v811_v27  ;;  %v809_v4 = vand.u32 2147483647, %v4318_v33 }
 0x159   : > { %v1143_v61 = vsub.f32 0.0, %v1111_v49  ;;  %v917_v50 = vmul.f32 %v4306_v37, %v901_v63  ;;  %v893_v53 = vadd.f32 -1.4531521, %v877_v28  ;;  %v908_v22 = vmul.f32 %v4160_v56, %v892_v11 }
 0x15a   : > { %v1140_v46 = vsub.f32 0.0, %v1108_v13  ;;  %v1050_v55 = vsub.f32 0.0, %v1034_v10  ;;  %v843_v3 = vadd.f32 1.0, %v827_v25  ;;  %v825_v20 = vmul.f32 0.3275911, %v809_v4 }
 0x15b   : > { %v1159_v14 = vsel %vm1127_vm7, %v1111_v49, %v1143_v61  ;;  %v933_v43 = vadd.f32 1.4214138, %v917_v50  ;;  %v909_v26 = vmul.f32 %v4192_v41, %v893_v53  ;;  %v924_v6 = vadd.f32 1.4214138, %v908_v22 }
 0x15c   : > { %v4328_v38 = vpop.eup %3610  ;;  %v1190_v54 = vmul.f32 %v1174_v51, %v4207_v1  ;;  %vm1124_vm8 = vcmp.ge.f32.partialorder %v4133_v31, 0.0  ;;  %v1175_v9 = vadd.f32 1.0, %v1159_v14  ;;  %3616 = vrcp.f32 %v843_v3 }
 0x15d   : > { %v841_v59 = vadd.f32 1.0, %v825_v20  ;;  %v949_v32 = vmul.f32 %v4306_v37, %v933_v43  ;;  %v890_v21 = vmul.f32 1.0614054, %v4328_v38  ;;  %v1048_v42 = vsub.f32 0.0, %v1032_v60 }
 0x15e   : > { %v925_v7 = vadd.f32 1.4214138, %v909_v26  ;;  %v1191_v8 = vmul.f32 %v1175_v9, %v4249_v36  ;;  %v1080_v57 = vmul.f32 1.442695, %v1050_v55  ;;  %v940_v62 = vmul.f32 %v4160_v56, %v924_v6 }
 0x15f   : > { %v4336_v24 = vpack.c.bf16 %v1183_v12, %v1182_v48  ;;  %v4338_v28 = vpop.eup %3612  ;;  %v965_v1 = vadd.f32 -0.28449672, %v949_v32  ;;  %v906_v10 = vadd.f32 -1.4531521, %v890_v21  ;;  %v1035_v49 = vmul.f32 %v811_v27, %v811_v27 }
 0x160   : > { %3618 = vrcp.f32 %v841_v59  ;;  %v888_v63 = vmul.f32 1.0614054, %v4338_v28  ;;  %v941_v11 = vmul.f32 %v4192_v41, %v925_v7  ;;  %v956_v51 = vadd.f32 -0.28449672, %v940_v62 }
 0x161   : > { %v4343_v60 = vpack.c.bf16 %v1185_v17, %v4294_v0  ;;  %v3615_v36 = vpop.eup %3614  ;;  %v981_v25 = vmul.f32 %v4306_v37, %v965_v1  ;;  %v922_v48 = vmul.f32 %v4328_v38, %v906_v10  ;;  %v1076_v12 = vmul.f32 1.442695, %v1048_v42 }
 0x162   : > { %v4348_v61 = vpack.c.bf16 %v1187_v29, %v4291_v34  ;;  %v904_v50 = vadd.f32 -1.4531521, %v888_v63  ;;  %v957_v27 = vadd.f32 -0.28449672, %v941_v11  ;;  %v972_v53 = vmul.f32 %v4160_v56, %v956_v51 }
 0x163   : > { %v4351_v22 = vpack.c.bf16 %v1191_v8, %v1190_v54  ;;  %v773_v55 = vmul.f32 0.5, %v4223_v47  ;;  %v997_v3 = vadd.f32 0.2548296, %v981_v25  ;;  %v938_v0 = vadd.f32 1.4214138, %v922_v48 }
 0x164   : > { %v1051_v17 = vsub.f32 0.0, %v1035_v49  ;;  %vm1125_vm9 = vcmp.ge.f32.partialorder %v4236_v44, 0.0  ;;  %3620 = vpow2.f32 %v1080_v57  ;;  %v920_v20 = vmul.f32 %v4338_v28, %v904_v50 }
 0x165   : > { %v973_v14 = vmul.f32 %v4192_v41, %v957_v27  ;;  %v988_v34 = vadd.f32 0.2548296, %v972_v53  ;;  %v1156_v29 = vsel %vm1124_vm8, %v1108_v13, %v1140_v46  ;;  %v1013_v43 = vmul.f32 %v4306_v37, %v997_v3 }
 0x166   : > { %v954_v47 = vmul.f32 %v4328_v38, %v938_v0  ;;  %v1033_v26 = vmul.f32 %v809_v4, %v809_v4  ;;  %v4363_v6 = vpop.eup %3616  ;;  %v936_v54 = vadd.f32 1.4214138, %v920_v20  ;;  %3622 = vpow2.f32 %v1076_v12 }
 0x167   : > { %v989_v9 = vadd.f32 0.2548296, %v973_v14  ;;  %v1004_v59 = vmul.f32 %v4160_v56, %v988_v34  ;;  %v1093_v35 = vmul.f32 %v3615_v36, %v1013_v43  ;;  %v891_v31 = vmul.f32 1.0614054, %v4363_v6 }
 0x168   : > { %v970_v32 = vadd.f32 -0.28449672, %v954_v47  ;;  %v1082_v13 = vmul.f32 1.442695, %v1051_v17  ;;  %v1172_v37 = vadd.f32 1.0, %v1156_v29  ;;  %v952_v46 = vmul.f32 %v4338_v28, %v936_v54 }
 0x169   : > { %v1005_v4 = vmul.f32 %v4192_v41, %v989_v9  ;;  %v1084_v21 = vmul.f32 %v4172_v18, %v1004_v59  ;;  %v1109_v7 = vsub.f32 1.0, %v1093_v35  ;;  %v907_v57 = vadd.f32 -1.4531521, %v891_v31 }
 0x16a   : > { %v3619_v42 = vpop.eup %3618  ;;  %v986_v8 = vmul.f32 %v4328_v38, %v970_v32  ;;  %v1049_v56 = vsub.f32 0.0, %v1033_v26  ;;  %v968_v62 = vadd.f32 -0.28449672, %v952_v46  ;;  %3624 = vpow2.f32 %v1082_v13 }
 0x16b   : > { %v889_v1 = vmul.f32 1.0614054, %v3619_v42  ;;  %v1085_v10 = vmul.f32 %v4196_v30, %v1005_v4  ;;  %v1100_v49 = vsub.f32 1.0, %v1084_v21  ;;  %v1141_v63 = vsub.f32 0.0, %v1109_v7 }
 0x16c   : > { %v1002_v11 = vadd.f32 0.2548296, %v986_v8  ;;  %v923_v51 = vmul.f32 %v4363_v6, %v907_v57  ;;  %v984_v41 = vmul.f32 %v4338_v28, %v968_v62  ;;  %v1078_v27 = vmul.f32 1.442695, %v1049_v56 }
 0x16d   : > { %v905_v36 = vadd.f32 -1.4531521, %v889_v1  ;;  %v1101_v18 = vsub.f32 1.0, %v1085_v10  ;;  %v1132_v25 = vsub.f32 0.0, %v1100_v49  ;;  %v1157_v48 = vsel %vm1125_vm9, %v1109_v7, %v1141_v63 }
 0x16e   : > { %v1018_v12 = vmul.f32 %v4328_v38, %v1002_v11  ;;  %v939_v50 = vadd.f32 1.4214138, %v923_v51  ;;  %v3621_v53 = vpop.eup %3620  ;;  %v1173_v30 = vadd.f32 1.0, %v1157_v48  ;;  %v1000_v3 = vadd.f32 0.2548296, %v984_v41 }
 0x16f   : > { %v921_v0 = vmul.f32 %v3619_v42, %v905_v36  ;;  %v1133_v17 = vsub.f32 0.0, %v1101_v18  ;;  %v1188_v20 = vmul.f32 %v1172_v37, %v4231_v39  ;;  %v1148_v29 = vsel %vm1116_vm10, %v1100_v49, %v1132_v25  ;;  %v5444_v37 = vld [vmem:[#allocation9_spill] sm:$0xff] }
 0x170   : > { %v1098_v14 = vmul.f32 %v3621_v53, %v1018_v12  ;;  %v955_v34 = vmul.f32 %v4363_v6, %v939_v50  ;;  %v3623_v43 = vpop.eup %3622  ;;  %v1189_v44 = vmul.f32 %v1173_v30, %v773_v55  ;;  %v1016_v47 = vmul.f32 %v4338_v28, %v1000_v3  ;;  %v3562_v3 = vld [vmem:[%s5426_s10 + $0x30] sm:$0xff]  }
 0x171   : > { %v937_v38 = vadd.f32 1.4214138, %v921_v0  ;;  %v1149_v26 = vsel %vm1117_vm11, %v1101_v18, %v1133_v17  ;;  %3626 = vpow2.f32 %v1078_v27  ;;  %v1164_v9 = vadd.f32 1.0, %v1148_v29  ;;  %v3563_v0 = vld [vmem:[%s5426_s10 + $0x38] sm:$0xff]  }
 0x172   : > { %v971_v54 = vadd.f32 -0.28449672, %v955_v34  ;;  %v1165_v59 = vadd.f32 1.0, %v1149_v26  ;;  %v1096_v35 = vmul.f32 %v3623_v43, %v1016_v47  ;;  %v1216_v32 = vpack.c.bf16 %v1189_v44, %v1188_v20  ;;  %v1244_v34 = vpop.permute.xlu1 %1243 }
 0x173   : > { %v953_v39 = vmul.f32 %v3619_v42, %v937_v38  ;;  %v1114_v31 = vsub.f32 1.0, %v1098_v14  ;;  %v1180_v2 = vmul.f32 %v1164_v9, %v4096_v45  ;;  %vm1130_vm12 = vcmp.ge.f32.partialorder %v4268_v5, 0.0  ;;  %v1239_v14 = vpop.permute.xlu0 %1238 }
 0x174   : > { %v987_v13 = vmul.f32 %v4363_v6, %v971_v54  ;;  %v1181_v55 = vmul.f32 %v1165_v59, %v5444_v37  ;;  %v3625_v28 = vpop.eup %3624  ;;  %v1112_v15 = vsub.f32 1.0, %v1096_v35  ;;  %vm1128_vm13 = vcmp.ge.f32.partialorder %v4278_v16, 0.0 }
 0x175   : > { %v969_v46 = vadd.f32 -0.28449672, %v953_v39  ;;  %v1146_v8 = vsub.f32 0.0, %v1114_v31  ;;  %vm1131_vm14 = vcmp.ge.f32.partialorder %v4301_v40, 0.0  ;;  %v778_v5 = vmul.f32 0.5, %v4243_v19 }
 0x176   : > { %v1003_v4 = vadd.f32 0.2548296, %v987_v13  ;;  %v1212_v21 = vpack.c.bf16 %v1181_v55, %v1180_v2  ;;  %v1144_v45 = vsub.f32 0.0, %v1112_v15  ;;  %vm1129_vm15 = vcmp.ge.f32.partialorder %v4318_v33, 0.0  ;;  %v3559_v33 = vld [vmem:[%s5426_s10 + $0x18] sm:$0xff]   ;;  %v1254_v43 = vpop.permute.xlu1 %1253 }
 0x177   : > { %v985_v7 = vmul.f32 %v3619_v42, %v969_v46  ;;  %v1162_v49 = vsel %vm1130_vm12, %v1114_v31, %v1146_v8  ;;  %v776_v40 = vmul.f32 0.5, %v4259_v52  ;;  %v777_v27 = vmul.f32 0.5, %v4304_v58  ;;  %v3557_v52 = vld [vmem:[%s5426_s10 + $0x8] sm:$0xff]   ;;  %v3558_v58 = vld [vmem:[%s5426_s10 + $0x10] sm:$0xff]   ;;  %v1249_v29 = vpop.permute.xlu0 %1248 }
 0x178   : > { %v1019_v57 = vmul.f32 %v4363_v6, %v1003_v4  ;;  %3356 = vmatprep.subr.bf16.mxu1 %v1212_v21  ;;  %v1178_v6 = vadd.f32 1.0, %v1162_v49  ;;  %v1160_v41 = vsel %vm1128_vm13, %v1112_v15, %v1144_v45  ;;  %vm1494_vm0 = vcmask 57344  }
 0x179   : > { %v1001_v56 = vadd.f32 0.2548296, %v985_v7  ;;  %3357 = vmatpush3.bf16.msra.mxu1 %v1212_v21  ;;  %v3793_v17 = vmov -1e+30   ;;  %v3794_v20 = vmov 0.0   ;;  %vm1477_vm1 = vcmask 64512  }
 0x17a   : > { %v1099_v62 = vmul.f32 %v3625_v28, %v1019_v57  ;;  %3358 = vmatprep.subr.bf16.mxu1 %v4336_v24  ;;  %v1194_v16 = vmul.f32 %v1178_v6, %v778_v5  ;;  %1495 = vst.msk [vmem:[#allocation3] sm:$0x1] %vm1494_vm0, %v3793_v17  ;;  %1496 = vst.msk [vmem:[#allocation4] sm:$0x1] %vm1494_vm0, %v3794_v20  ;;  %v1264_v47 = vpop.permute.xlu1 %1263 }
 0x17b   : > { %v1017_v1 = vmul.f32 %v3619_v42, %v1001_v56  ;;  %v3627_v10 = vpop.eup %3626  ;;  %v779_v42 = vmul.f32 0.5, %v4286_v23  ;;  %1497 = vst [vmem:[#allocation5] sm:$0xff] %v3794_v20  ;;  %v1259_v44 = vpop.permute.xlu0 %1258 }
 0x17c   : > { %v1115_v63 = vsub.f32 1.0, %v1099_v62 }
 0x17d   : > { %v1097_v11 = vmul.f32 %v3627_v10, %v1017_v1  ;;  %3359 = vmatpush3.bf16.msra.mxu1 %v4336_v24  ;;  %v1176_v24 = vadd.f32 1.0, %v1160_v41 }
 0x17e   : > { %v1147_v51 = vsub.f32 0.0, %v1115_v63  ;;  %3360 = vmatprep.subr.bf16.mxu1 %v4343_v60  ;;  %v1274_v59 = vpop.permute.xlu1 %1273 }
 0x17f   : > { %v1113_v36 = vsub.f32 1.0, %v1097_v11  ;;  %v1192_v23 = vmul.f32 %v1176_v24, %v776_v40  ;;  %v1269_v38 = vpop.permute.xlu0 %1268 }
 0x180   : > { %v1163_v18 = vsel %vm1131_vm14, %v1115_v63, %v1147_v51 }
 0x181   : > { %v1179_v25 = vadd.f32 1.0, %v1163_v18  ;;  %v1145_v48 = vsub.f32 0.0, %v1113_v36  ;;  %3361 = vmatpush3.bf16.msra.mxu1 %v4343_v60 }
 0x182   : > { %3362 = vmatprep.subr.bf16.mxu1 %v4348_v61  ;;  %v1284_v4 = vpop.permute.xlu1 %1283 }
 0x183   : > { %v1195_v12 = vmul.f32 %v1179_v25, %v779_v42  ;;  %v1161_v50 = vsel %vm1129_vm15, %v1113_v36, %v1145_v48  ;;  %v1279_v46 = vpop.permute.xlu0 %1278 }
 0x184   : > { %v1177_v53 = vadd.f32 1.0, %v1161_v50 }
 0x185   : > { %3363 = vmatpush3.bf16.msra.mxu1 %v4348_v61  ;;  %v1219_v19 = vpack.c.bf16 %v1195_v12, %v1194_v16  ;;  %v3560_v61 = vld [vmem:[%s5426_s10 + $0x20] sm:$0xff]  }
 0x186   : > { %v1193_v30 = vmul.f32 %v1177_v53, %v777_v27  ;;  %3364 = vmatprep.subr.bf16.mxu1 %v1216_v32  ;;  %v1294_v11 = vpop.permute.xlu1 %1293 }
 0x187   : > { %v1289_v1 = vpop.permute.xlu0 %1288 }
 0x188   : > { %v1218_v60 = vpack.c.bf16 %v1193_v30, %v1192_v23 }
 0x189   : > { %3365 = vmatpush3.bf16.msra.mxu1 %v1216_v32 }
 0x18a   : > { %3366 = vmatprep.subr.bf16.mxu1 %v4351_v22  ;;  %v1304_v16 = vpop.permute.xlu1 %1303 }
 0x18b   : > { %v1299_v18 = vpop.permute.xlu0 %1298 }
 0x18d   : > { %3367 = vmatpush3.bf16.msra.mxu1 %v4351_v22  ;;  %v3561_v22 = vld [vmem:[%s5426_s10 + $0x28] sm:$0xff]  }
 0x18e   : > { %3368 = vmatprep.subr.bf16.mxu1 %v1218_v60 }
 0x18f   : > { %v1309_v53 = vpop.permute.xlu0 %1308 }
 0x191   : > { %3369 = vmatpush3.bf16.msra.mxu1 %v1218_v60  ;;  %v1314_v60 = vpop.permute.xlu1 %1313 }
 0x192   : > { %3370 = vmatprep.subr.bf16.mxu1 %v1219_v19 }
 0x195   : > { %3371 = vmatpush3.bf16.msra.mxu1 %v1219_v19 }
 0x198   : > { %3373 = vmatmul.mubr.bf16.vlgmr.msra.gmra.mrb[0].mxu1 %v3557_v52 }
 0x199   : > { %3376 = vmatprep.mubr.bf16.mxu1 %v3558_v58 }
 0x1a0   : > { %3377 = vmatmul.mubr.bf16.gmra.mrb[4].mxu1 %v3559_v33 }
 0x1a1   : > { %3380 = vmatprep.mubr.bf16.mxu1 %v3560_v61 }
 0x1a8   : > { %3381 = vmatmul.mubr.bf16.gmra.mrb[8].mxu1 %v3561_v22 }
 0x1a9   : > { %3384 = vmatprep.mubr.bf16.mxu1 %v3562_v3 }
 0x1b0   : > { %3385 = vmatmul.mubr.bf16.gmra.mrb[12].mxu1 %v3563_v0 }
 0x26b   : > { %v3374_v26 = vpop.f32.mrb[0].mxu1 }
 0x26c   : > { %v1407_v54 = vadd.f32 %v3374_v26, %v1249_v29  ;;  %v1398_v9 = vpop.f32.mrb[1].mxu1 }
 0x26d   : > { %v1399_v35 = vadd.f32 %v1398_v9, %v1239_v14  ;;  %v3375_v39 = vpop.f32.mrb[2].mxu1 }
 0x26e   : > { %v1463_v32 = vmul.f32 0.17677669, %v1407_v54  ;;  %v1410_v31 = vadd.f32 %v3375_v39, %v1254_v43  ;;  %v1401_v13 = vpop.f32.mrb[3].mxu1 }
 0x26f   : > { %v1461_v2 = vmul.f32 0.17677669, %v1399_v35  ;;  %v1402_v37 = vadd.f32 %v1401_v13, %v1244_v34 }
 0x270   : > { %1480 = vst.msk [vmem:[#allocation2 + $0x10] sm:$0xff] %vm1477_vm1, %v1463_v32  ;;  %v1464_v55 = vmul.f32 0.17677669, %v1410_v31 }
 0x271   : > { %1478 = vst.msk [vmem:[#allocation2] sm:$0xff] %vm1477_vm1, %v1461_v2  ;;  %v1462_v28 = vmul.f32 0.17677669, %v1402_v37 }
 0x272   : > { %1481 = vst.msk [vmem:[#allocation2 + $0x18] sm:$0xff] %vm1477_vm1, %v1464_v55 }
 0x273   : > { %1479 = vst.msk [vmem:[#allocation2 + $0x8] sm:$0xff] %vm1477_vm1, %v1462_v28  ;;  %v3378_v21 = vpop.f32.mrb[4].mxu1 }
 0x274   : > { %v1423_v15 = vadd.f32 %v3378_v21, %v1269_v38  ;;  %v1414_v7 = vpop.f32.mrb[5].mxu1 }
 0x275   : > { %v1415_v8 = vadd.f32 %v1414_v7, %v1259_v44  ;;  %v3379_v57 = vpop.f32.mrb[6].mxu1 }
 0x276   : > { %v1467_v56 = vmul.f32 0.17677669, %v1423_v15  ;;  %v1426_v62 = vadd.f32 %v3379_v57, %v1274_v59  ;;  %v1417_v45 = vpop.f32.mrb[7].mxu1 }
 0x277   : > { %v1465_v10 = vmul.f32 0.17677669, %v1415_v8  ;;  %v1418_v49 = vadd.f32 %v1417_v45, %v1264_v47 }
 0x278   : > { %1484 = vst.msk [vmem:[#allocation2 + $0x30] sm:$0xff] %vm1477_vm1, %v1467_v56  ;;  %v1468_v63 = vmul.f32 0.17677669, %v1426_v62 }
 0x279   : > { %1482 = vst.msk [vmem:[#allocation2 + $0x20] sm:$0xff] %vm1477_vm1, %v1465_v10  ;;  %v1466_v51 = vmul.f32 0.17677669, %v1418_v49 }
 0x27a   : > { %1485 = vst.msk [vmem:[#allocation2 + $0x38] sm:$0xff] %vm1477_vm1, %v1468_v63 }
 0x27b   : > { %1483 = vst.msk [vmem:[#allocation2 + $0x28] sm:$0xff] %vm1477_vm1, %v1466_v51  ;;  %v3382_v6 = vpop.f32.mrb[8].mxu1 }
 0x27c   : > { %v1439_v41 = vadd.f32 %v3382_v6, %v1289_v1  ;;  %v1430_v36 = vpop.f32.mrb[9].mxu1 }
 0x27d   : > { %v1431_v5 = vadd.f32 %v1430_v36, %v1279_v46  ;;  %v3383_v42 = vpop.f32.mrb[10].mxu1 }
 0x27e   : > { %v1471_v25 = vmul.f32 0.17677669, %v1439_v41  ;;  %v1442_v48 = vadd.f32 %v3383_v42, %v1294_v11  ;;  %v1433_v24 = vpop.f32.mrb[11].mxu1 }
 0x27f   : > { %v1469_v12 = vmul.f32 0.17677669, %v1431_v5  ;;  %v1434_v50 = vadd.f32 %v1433_v24, %v1284_v4 }
 0x280   : > { %1488 = vst.msk [vmem:[#allocation2 + $0x50] sm:$0xff] %vm1477_vm1, %v1471_v25  ;;  %v1472_v40 = vmul.f32 0.17677669, %v1442_v48 }
 0x281   : > { %1486 = vst.msk [vmem:[#allocation2 + $0x40] sm:$0xff] %vm1477_vm1, %v1469_v12  ;;  %v1470_v27 = vmul.f32 0.17677669, %v1434_v50 }
 0x282   : > { %1489 = vst.msk [vmem:[#allocation2 + $0x58] sm:$0xff] %vm1477_vm1, %v1472_v40 }
 0x283   : > { %1487 = vst.msk [vmem:[#allocation2 + $0x48] sm:$0xff] %vm1477_vm1, %v1470_v27  ;;  %v3386_v19 = vpop.f32.mrb[12].mxu1 }
 0x284   : > { %v1455_v23 = vadd.f32 %v3386_v19, %v1309_v53  ;;  %v1446_v30 = vpop.f32.mrb[13].mxu1 }
 0x285   : > { %v1447_v52 = vadd.f32 %v1446_v30, %v1299_v18  ;;  %v3387_v58 = vpop.f32.mrb[14].mxu1 }
 0x286   : > { %v1475_v33 = vmul.f32 0.17677669, %v1455_v23  ;;  %v1458_v61 = vadd.f32 %v3387_v58, %v1314_v60  ;;  %v1449_v22 = vpop.f32.mrb[15].mxu1 }
 0x287   : > { %v1473_v3 = vmul.f32 0.17677669, %v1447_v52  ;;  %v1450_v0 = vadd.f32 %v1449_v22, %v1304_v16 }
 0x288   : > { %1492 = vst.msk [vmem:[#allocation2 + $0x70] sm:$0xff] %vm1477_vm1, %v1475_v33  ;;  %v1476_v17 = vmul.f32 0.17677669, %v1458_v61 }
 0x289   : > { %1490 = vst.msk [vmem:[#allocation2 + $0x60] sm:$0xff] %vm1477_vm1, %v1473_v3  ;;  %v1474_v20 = vmul.f32 0.17677669, %v1450_v0 }
 0x28a   : > { %1493 = vst.msk [vmem:[#allocation2 + $0x78] sm:$0xff] %vm1477_vm1, %v1476_v17 }
 0x28b   : > { %1491 = vst.msk [vmem:[#allocation2 + $0x68] sm:$0xff] %vm1477_vm1, %v1474_v20 }
 0x28c PF: > { %v3630_v14 = vld [vmem:[%s5420_s4] sm:$0xff]   ;;  %v3631_v34 = vld [vmem:[%s5420_s4 + $0x8] sm:$0xff]   ;;  %v3632_v29 = vld [vmem:[%s5420_s4 + $0x10] sm:$0xff]   ;;  %p3225_p6 = scmp.ne.s32.totalorder %s3873_s22, 2 }
 0x28d   : > { %3388 = vmatprep.subr.bf16.mxu0 %v3630_v14  ;;  %v3633_v43 = vld [vmem:[%s5420_s4 + $0x18] sm:$0xff]   ;;  %v3638_v44 = vld [vmem:[%s3889_s14] sm:$0xff]   ;;  %v3635_v38 = vld [vmem:[%s5420_s4 + $0x28] sm:$0xff]  }
 0x28e   : > { %3389 = vmatpush3.bf16.msra.mxu0 %v3630_v14  ;;  %3404 = vmatprep.mubr.bf16.mxu0 %v3638_v44  ;;  %v3634_v47 = vld [vmem:[%s5420_s4 + $0x20] sm:$0xff]   ;;  %v3636_v26 = vld [vmem:[%s5420_s4 + $0x30] sm:$0xff]   ;;  %v3637_v54 = vld [vmem:[%s5420_s4 + $0x38] sm:$0xff]  }
 0x28f   : > { %3390 = vmatprep.subr.bf16.mxu0 %v3631_v34  ;;  %v3639_v9 = vld [vmem:[%s3889_s14 + $0x8] sm:$0xff]   ;;  %v3640_v59 = vld [vmem:[%s3889_s14 + $0x10] sm:$0xff]   ;;  %v3641_v35 = vld [vmem:[%s3889_s14 + $0x18] sm:$0xff]  }
 0x290   : > { %v3642_v39 = vld [vmem:[%s3889_s14 + $0x20] sm:$0xff]   ;;  %v3643_v32 = vld [vmem:[%s3889_s14 + $0x28] sm:$0xff]   ;;  %v3644_v31 = vld [vmem:[%s3889_s14 + $0x30] sm:$0xff]  }
 0x291   : > { %v3645_v13 = vld [vmem:[%s3889_s14 + $0x38] sm:$0xff]   ;;  %v3646_v2 = vld [vmem:[%s5422_s6] sm:$0xff]   ;;  %v3647_v37 = vld [vmem:[%s5422_s6 + $0x8] sm:$0xff]  }
 0x292   : > { %3391 = vmatpush3.bf16.msra.mxu0 %v3631_v34  ;;  %3420 = vmatprep.subr.bf16.mxu1 %v3646_v2  ;;  %v3648_v55 = vld [vmem:[%s5422_s6 + $0x10] sm:$0xff]   ;;  %v3649_v46 = vld [vmem:[%s5422_s6 + $0x18] sm:$0xff]   ;;  %v3650_v28 = vld [vmem:[%s5422_s6 + $0x20] sm:$0xff]  }
 0x293   : > { %3392 = vmatprep.subr.bf16.mxu0 %v3632_v29  ;;  %3421 = vmatpush3.bf16.msra.mxu1 %v3646_v2  ;;  %v3651_v4 = vld [vmem:[%s5422_s6 + $0x28] sm:$0xff]   ;;  %v3652_v21 = vld [vmem:[%s5422_s6 + $0x30] sm:$0xff]   ;;  %v3653_v15 = vld [vmem:[%s5422_s6 + $0x38] sm:$0xff]  }
 0x294   : > { %3422 = vmatprep.subr.bf16.mxu1 %v3647_v37  ;;  %v4502_v7 = vld [vmem:[%s5421_s5] ss:$0 sm:$0xff] }
 0x296   : > { %3393 = vmatpush3.bf16.msra.mxu0 %v3632_v29 }
 0x297   : > { %3394 = vmatprep.subr.bf16.mxu0 %v3633_v43  ;;  %3423 = vmatpush3.bf16.msra.mxu1 %v3647_v37 }
 0x298   : > { %3424 = vmatprep.subr.bf16.mxu1 %v3648_v55 }
 0x29a   : > { %3395 = vmatpush3.bf16.msra.mxu0 %v3633_v43 }
 0x29b   : > { %3396 = vmatprep.subr.bf16.mxu0 %v3634_v47  ;;  %3425 = vmatpush3.bf16.msra.mxu1 %v3648_v55 }
 0x29c   : > { %3426 = vmatprep.subr.bf16.mxu1 %v3649_v46 }
 0x29e   : > { %3397 = vmatpush3.bf16.msra.mxu0 %v3634_v47 }
 0x29f   : > { %3398 = vmatprep.subr.bf16.mxu0 %v3635_v38  ;;  %3427 = vmatpush3.bf16.msra.mxu1 %v3649_v46 }
 0x2a0   : > { %3428 = vmatprep.subr.bf16.mxu1 %v3650_v28 }
 0x2a2   : > { %3399 = vmatpush3.bf16.msra.mxu0 %v3635_v38 }
 0x2a3   : > { %3400 = vmatprep.subr.bf16.mxu0 %v3636_v26  ;;  %3429 = vmatpush3.bf16.msra.mxu1 %v3650_v28 }
 0x2a4   : > { %3430 = vmatprep.subr.bf16.mxu1 %v3651_v4 }
 0x2a6   : > { %3401 = vmatpush3.bf16.msra.mxu0 %v3636_v26 }
 0x2a7   : > { %3402 = vmatprep.subr.bf16.mxu0 %v3637_v54  ;;  %3431 = vmatpush3.bf16.msra.mxu1 %v3651_v4 }
 0x2a8   : > { %3432 = vmatprep.subr.bf16.mxu1 %v3652_v21 }
 0x2aa   : > { %3403 = vmatpush3.bf16.msra.mxu0 %v3637_v54 }
 0x2ab   : > { %3433 = vmatpush3.bf16.msra.mxu1 %v3652_v21 }
 0x2ac   : > { %3434 = vmatprep.subr.bf16.mxu1 %v3653_v15 }
 0x2ad   : > { %3405 = vmatmul.mubr.bf16.vlgmr.msra.gmra.mrb[0].mxu0 %v3639_v9 }
 0x2ae   : > { %3408 = vmatprep.mubr.bf16.mxu0 %v3640_v59 }
 0x2af   : > { %3435 = vmatpush3.bf16.msra.mxu1 %v3653_v15 }
 0x2b5   : > { %3409 = vmatmul.mubr.bf16.gmra.mrb[4].mxu0 %v3641_v35 }
 0x2b6   : > { %3412 = vmatprep.mubr.bf16.mxu0 %v3642_v39 }
 0x2bd   : > { %3413 = vmatmul.mubr.bf16.gmra.mrb[8].mxu0 %v3643_v32 }
 0x2be   : > { %3416 = vmatprep.mubr.bf16.mxu0 %v3644_v31 }
 0x2c5   : > { %3417 = vmatmul.mubr.bf16.gmra.mrb[12].mxu0 %v3645_v13 }
 0x380   : > { %v3406_v8 = vpop.f32.mrb[0].mxu0 }
 0x381   : > { %v1676_v57 = vadd.f32 %v3406_v8, %v4502_v7  ;;  %v1667_v56 = vpop.f32.mrb[1].mxu0 }
 0x382   : > { %v1668_v62 = vadd.f32 %v4502_v7, %v1667_v56  ;;  %v3407_v45 = vpop.f32.mrb[2].mxu0 }
 0x383   : > { %v4506_v1 = vmul.f32 0.70710677, %v1676_v57  ;;  %v1679_v10 = vadd.f32 %v3407_v45, %v4502_v7  ;;  %v1670_v49 = vpop.f32.mrb[3].mxu0  ;;  %v4525_v19 = vmul.f32 0.5, %v1676_v57 }
 0x384   : > { %v4512_v51 = vmul.f32 0.70710677, %v1668_v62  ;;  %v1671_v6 = vadd.f32 %v4502_v7, %v1670_v49  ;;  %v4537_v61 = vmul.f32 0.5, %v1668_v62 }
 0x385   : > { %v1764_v63 = vand.u32 2147483647, %v4506_v1  ;;  %v4510_v11 = vmul.f32 0.70710677, %v1679_v10  ;;  %v4545_v20 = vmul.f32 0.5, %v1679_v10  ;;  %vm2084_vm2 = vcmp.ge.f32.partialorder %v4506_v1, 0.0 }
 0x386   : > { %v1762_v48 = vand.u32 2147483647, %v4512_v51  ;;  %v4517_v24 = vmul.f32 0.70710677, %v1671_v6  ;;  %v4561_v15 = vmul.f32 0.5, %v1671_v6  ;;  %vm2082_vm12 = vcmp.ge.f32.partialorder %v4512_v51, 0.0 }
 0x387   : > { %v1780_v41 = vmul.f32 0.3275911, %v1764_v63  ;;  %v1765_v36 = vand.u32 2147483647, %v4510_v11  ;;  %v1988_v40 = vmul.f32 %v1764_v63, %v1764_v63  ;;  %vm2085_vm3 = vcmp.ge.f32.partialorder %v4510_v11, 0.0 }
 0x388   : > { %v3410_v18 = vpop.f32.mrb[4].mxu0  ;;  %v1778_v23 = vmul.f32 0.3275911, %v1762_v48  ;;  %v1763_v30 = vand.u32 2147483647, %v4517_v24  ;;  %v1986_v52 = vmul.f32 %v1762_v48, %v1762_v48  ;;  %vm2083_vm13 = vcmp.ge.f32.partialorder %v4517_v24, 0.0 }
 0x389   : > { %v1796_v5 = vadd.f32 1.0, %v1780_v41  ;;  %v1781_v42 = vmul.f32 0.3275911, %v1765_v36  ;;  %v1683_v25 = vpop.f32.mrb[5].mxu0  ;;  %v4520_v27 = vadd.f32 %v3410_v18, %v4502_v7  ;;  %v2004_v17 = vsub.f32 0.0, %v1988_v40 }
 0x38a   : > { %v3411_v16 = vpop.f32.mrb[6].mxu0  ;;  %v4523_v53 = vadd.f32 %v4502_v7, %v1683_v25  ;;  %v1989_v14 = vmul.f32 %v1765_v36, %v1765_v36  ;;  %v1794_v43 = vadd.f32 1.0, %v1778_v23  ;;  %v1987_v44 = vmul.f32 %v1763_v30, %v1763_v30 }
 0x38b   : > { %3654 = vrcp.f32 %v1796_v5  ;;  %v1797_v12 = vadd.f32 1.0, %v1781_v42  ;;  %v1686_v50 = vpop.f32.mrb[7].mxu0  ;;  %v4529_v60 = vadd.f32 %v3411_v16, %v4502_v7  ;;  %v4532_v58 = vmul.f32 0.70710677, %v4520_v27 }
 0x38c   : > { %v4535_v33 = vadd.f32 %v4502_v7, %v1686_v50  ;;  %v4540_v22 = vmul.f32 0.70710677, %v4523_v53  ;;  %v2002_v54 = vsub.f32 0.0, %v1986_v52  ;;  %v1779_v39 = vmul.f32 0.3275911, %v1763_v30 }
 0x38d   : > { %3656 = vrcp.f32 %v1797_v12  ;;  %v4543_v3 = vmul.f32 0.70710677, %v4529_v60  ;;  %v1768_v34 = vand.u32 2147483647, %v4532_v58  ;;  %v2022_v2 = vmul.f32 1.442695, %v2004_v17 }
 0x38e   : > { %v1766_v47 = vand.u32 2147483647, %v4540_v22  ;;  %v4553_v59 = vmul.f32 0.70710677, %v4535_v33  ;;  %v2005_v37 = vsub.f32 0.0, %v1989_v14  ;;  %3658 = vrcp.f32 %v1794_v43 }
 0x38f   : > { %v1769_v38 = vand.u32 2147483647, %v4543_v3  ;;  %v1784_v9 = vmul.f32 0.3275911, %v1768_v34  ;;  %v2003_v4 = vsub.f32 0.0, %v1987_v44  ;;  %v1795_v45 = vadd.f32 1.0, %v1779_v39 }
 0x390   : > { %v3414_v0 = vpop.f32.mrb[8].mxu0  ;;  %v1782_v32 = vmul.f32 0.3275911, %v1766_v47  ;;  %v1767_v46 = vand.u32 2147483647, %v4553_v59  ;;  %v1992_v25 = vmul.f32 %v1768_v34, %v1768_v34  ;;  %v1990_v16 = vmul.f32 %v1766_v47, %v1766_v47 }
 0x391   : > { %v1699_v29 = vpop.f32.mrb[9].mxu0  ;;  %v1785_v31 = vmul.f32 0.3275911, %v1769_v38  ;;  %v1800_v55 = vadd.f32 1.0, %v1784_v9  ;;  %v2018_v62 = vmul.f32 1.442695, %v2002_v54  ;;  %v4568_v36 = vadd.f32 %v3414_v0, %v4502_v7 }
 0x392   : > { %v4550_v26 = vpop.f32.mrb[10].mxu0  ;;  %v1798_v21 = vadd.f32 1.0, %v1782_v32  ;;  %v1783_v57 = vmul.f32 0.3275911, %v1767_v46  ;;  %v2024_v63 = vmul.f32 1.442695, %v2005_v37  ;;  %v4580_v50 = vadd.f32 %v4502_v7, %v1699_v29 }
 0x393   : > { %v4555_v35 = vpop.f32.mrb[11].mxu0  ;;  %3660 = vrcp.f32 %v1800_v55  ;;  %v1801_v8 = vadd.f32 1.0, %v1785_v31  ;;  %v2020_v42 = vmul.f32 1.442695, %v2003_v4  ;;  %v4577_v12 = vmul.f32 0.70710677, %v4568_v36 }
 0x394   : > { %3662 = vrcp.f32 %v1798_v21  ;;  %v1799_v41 = vadd.f32 1.0, %v1783_v57  ;;  %v4585_v52 = vmul.f32 0.5, %v4520_v27  ;;  %v4588_v0 = vmul.f32 0.5, %v4523_v53 }
 0x395   : > { %v4557_v13 = vpop.eup %3654  ;;  %3664 = vpow2.f32 %v2022_v2  ;;  %v1993_v17 = vmul.f32 %v1769_v38, %v1769_v38  ;;  %v1772_v14 = vand.u32 2147483647, %v4577_v12  ;;  %v2008_v43 = vsub.f32 0.0, %v1992_v25 }
 0x396   : > { %v1844_v28 = vmul.f32 1.0614054, %v4557_v13  ;;  %3666 = vrcp.f32 %v1801_v8  ;;  %v4594_v44 = vmul.f32 0.70710677, %v4580_v50  ;;  %v2006_v47 = vsub.f32 0.0, %v1990_v16 }
 0x397   : > { %v4565_v49 = vpop.eup %3656  ;;  %3668 = vpow2.f32 %v2018_v62  ;;  %v4597_v27 = vmul.f32 0.5, %v4529_v60  ;;  %v1788_v54 = vmul.f32 0.3275911, %v1772_v14  ;;  %v2009_v31 = vsub.f32 0.0, %v1993_v17 }
 0x398   : > { %v1860_v56 = vadd.f32 -1.4531521, %v1844_v28  ;;  %v4563_v10 = vpop.f32.mrb[12].mxu0  ;;  %v1845_v5 = vmul.f32 1.0614054, %v4565_v49  ;;  %3670 = vrcp.f32 %v1799_v41  ;;  %v4599_v53 = vpop.eup %3658  ;;  %v4607_v2 = vmul.f32 0.5, %v4535_v33 }
 0x399   : > { %v4570_v18 = vpop.f32.mrb[13].mxu0  ;;  %3672 = vpow2.f32 %v2024_v63  ;;  %v4602_v39 = vand.u32 2147483647, %v4594_v44  ;;  %v1991_v37 = vmul.f32 %v1767_v46, %v1767_v46  ;;  %v1804_v55 = vadd.f32 1.0, %v1788_v54 }
 0x39a   : > { %v1876_v6 = vmul.f32 %v4557_v13, %v1860_v56  ;;  %v4574_v48 = vpop.f32.mrb[14].mxu0  ;;  %v1861_v30 = vadd.f32 -1.4531521, %v1845_v5  ;;  %3674 = vrcp.f32 %v1795_v45  ;;  %v2030_v21 = vmul.f32 1.442695, %v2008_v43 }
 0x39b   : > { %v4582_v40 = vpop.f32.mrb[15].mxu0  ;;  %v1786_v8 = vmul.f32 0.3275911, %v4602_v39  ;;  %3676 = vrcp.f32 %v1804_v55  ;;  %v4618_v33 = vadd.f32 %v4550_v26, %v4502_v7  ;;  %v2026_v63 = vmul.f32 1.442695, %v2006_v47 }
 0x39c   : > { %v1892_v23 = vadd.f32 1.4214138, %v1876_v6  ;;  %v1877_v29 = vmul.f32 %v4565_v49, %v1861_v30  ;;  %3678 = vpow2.f32 %v2020_v42  ;;  %v2032_v5 = vmul.f32 1.442695, %v2009_v31 }
 0x39d   : > { %v4604_v32 = vpop.eup %3660  ;;  %v2007_v25 = vsub.f32 0.0, %v1991_v37  ;;  %v1802_v16 = vadd.f32 1.0, %v1786_v8  ;;  %v1996_v26 = vmul.f32 %v1772_v14, %v1772_v14  ;;  %v4631_v47 = vmul.f32 0.70710677, %v4618_v33 }
 0x39e   : > { %v1908_v34 = vmul.f32 %v4557_v13, %v1892_v23  ;;  %v1893_v9 = vadd.f32 1.4214138, %v1877_v29  ;;  %v4609_v28 = vpop.eup %3662  ;;  %v1848_v4 = vmul.f32 1.0614054, %v4604_v32  ;;  %vm2088_vm4 = vcmp.ge.f32.partialorder %v4532_v58, 0.0 }
 0x39f   : > { %v3665_v57 = vpop.eup %3664  ;;  %v1846_v62 = vmul.f32 1.0614054, %v4609_v28  ;;  %3680 = vrcp.f32 %v1802_v16  ;;  %v1773_v14 = vand.u32 2147483647, %v4631_v47  ;;  %vm2086_vm5 = vcmp.ge.f32.partialorder %v4540_v22, 0.0 }
 0x3a0   : > { %v1924_v38 = vadd.f32 -0.28449672, %v1908_v34  ;;  %v1909_v60 = vmul.f32 %v4565_v49, %v1893_v9  ;;  %v1864_v45 = vadd.f32 -1.4531521, %v1848_v4  ;;  %v4620_v41 = vpop.eup %3666  ;;  %3682 = vpow2.f32 %v2030_v21 }
 0x3a1   : > { %v1862_v6 = vadd.f32 -1.4531521, %v1846_v62  ;;  %v4622_v23 = vpop.eup %3668  ;;  %v1849_v34 = vmul.f32 1.0614054, %v4620_v41  ;;  %3684 = vpow2.f32 %v2026_v63  ;;  %v4640_v62 = vmul.f32 0.5, %v4568_v36 }
 0x3a2   : > { %v1940_v56 = vmul.f32 %v4557_v13, %v1924_v38  ;;  %v1925_v46 = vadd.f32 -0.28449672, %v1909_v60  ;;  %v1880_v17 = vmul.f32 %v4604_v32, %v1864_v45  ;;  %v4627_v29 = vpop.eup %3670  ;;  %v2012_v45 = vsub.f32 0.0, %v1996_v26 }
 0x3a3   : > { %v1878_v43 = vmul.f32 %v4609_v28, %v1862_v6  ;;  %v1865_v9 = vadd.f32 -1.4531521, %v1849_v34  ;;  %v3673_v31 = vpop.eup %3672  ;;  %v1847_v55 = vmul.f32 1.0614054, %v4627_v29  ;;  %v1789_v6 = vmul.f32 0.3275911, %v1773_v14 }
 0x3a4   : > { %v1941_v30 = vmul.f32 %v4565_v49, %v1925_v46  ;;  %v1956_v42 = vadd.f32 0.2548296, %v1940_v56  ;;  %v1896_v38 = vadd.f32 1.4214138, %v1880_v17  ;;  %v4635_v60 = vpop.eup %3674  ;;  %v2028_v56 = vmul.f32 1.442695, %v2007_v25 }
 0x3a5   : > { %v1894_v37 = vadd.f32 1.4214138, %v1878_v43  ;;  %v1881_v8 = vmul.f32 %v4620_v41, %v1865_v9  ;;  %v1863_v46 = vadd.f32 -1.4531521, %v1847_v55  ;;  %3686 = vpow2.f32 %v2032_v5  ;;  %v4644_v17 = vpop.eup %3676 }
 0x3a6   : > { %v1957_v54 = vadd.f32 0.2548296, %v1941_v30  ;;  %v1912_v4 = vmul.f32 %v4604_v32, %v1896_v38  ;;  %v1972_v63 = vmul.f32 %v4557_v13, %v1956_v42  ;;  %v1805_v38 = vadd.f32 1.0, %v1789_v6  ;;  %v4648_v36 = vpop.eup %3678 }
 0x3a7   : > { %v1910_v21 = vmul.f32 %v4609_v28, %v1894_v37  ;;  %v1897_v30 = vadd.f32 1.4214138, %v1881_v8  ;;  %v1879_v25 = vmul.f32 %v4627_v29, %v1863_v46  ;;  %3688 = vpow2.f32 %v2028_v56 }
 0x3a8   : > { %v1928_v16 = vadd.f32 -0.28449672, %v1912_v4  ;;  %v1973_v34 = vmul.f32 %v4565_v49, %v1957_v54  ;;  %v1994_v13 = vmul.f32 %v4602_v39, %v4602_v39  ;;  %v1852_v37 = vmul.f32 1.0614054, %v4644_v17 }
 0x3a9   : > { %v1926_v43 = vadd.f32 -0.28449672, %v1910_v21  ;;  %v1913_v26 = vmul.f32 %v4620_v41, %v1897_v30  ;;  %v1895_v42 = vadd.f32 1.4214138, %v1879_v25  ;;  %v2038_v49 = vmul.f32 1.442695, %v2012_v45  ;;  %v4656_v8 = vpop.eup %3680 }
 0x3aa   : > { %v1944_v9 = vmul.f32 %v4604_v32, %v1928_v16  ;;  %v2052_v54 = vmul.f32 %v3665_v57, %v1972_v63  ;;  %3690 = vrcp.f32 %v1805_v38  ;;  %v2053_v21 = vmul.f32 %v3673_v31, %v1973_v34  ;;  %v3683_v16 = vpop.eup %3682 }
 0x3ab   : > { %v1942_v5 = vmul.f32 %v4609_v28, %v1926_v43  ;;  %v1929_v4 = vadd.f32 -0.28449672, %v1913_v26  ;;  %v1911_v6 = vmul.f32 %v4627_v29, %v1895_v42  ;;  %v1868_v56 = vadd.f32 -1.4531521, %v1852_v37  ;;  %v3685_v45 = vpop.eup %3684 }
 0x3ac   : > { %v1960_v55 = vadd.f32 0.2548296, %v1944_v9  ;;  %v1850_v43 = vmul.f32 1.0614054, %v4656_v8  ;;  %v2010_v25 = vsub.f32 0.0, %v1994_v13  ;;  %v4667_v34 = vadd.f32 %v4502_v7, %v4555_v35 }
 0x3ad   : > { %v1958_v46 = vadd.f32 0.2548296, %v1942_v5  ;;  %v1945_v30 = vmul.f32 %v4620_v41, %v1929_v4  ;;  %v1927_v63 = vadd.f32 -0.28449672, %v1911_v6  ;;  %v1884_v31 = vmul.f32 %v4644_v17, %v1868_v56 }
 0x3ae   : > { %v1976_v39 = vmul.f32 %v4604_v32, %v1960_v55  ;;  %v2068_v38 = vsub.f32 1.0, %v2052_v54  ;;  %v1866_v9 = vadd.f32 -1.4531521, %v1850_v43  ;;  %v1997_v26 = vmul.f32 %v1773_v14, %v1773_v14 }
 0x3af   : > { %v1974_v57 = vmul.f32 %v4609_v28, %v1958_v46  ;;  %v1961_v32 = vadd.f32 0.2548296, %v1945_v30  ;;  %v2069_v5 = vsub.f32 1.0, %v2053_v21  ;;  %v1943_v13 = vmul.f32 %v4627_v29, %v1927_v63  ;;  %v3687_v37 = vpop.eup %3686 }
 0x3b0   : > { %v1900_v42 = vadd.f32 1.4214138, %v1884_v31  ;;  %3692 = vpow2.f32 %v2038_v49  ;;  %v2056_v28 = vmul.f32 %v3683_v16, %v1976_v39  ;;  %v1882_v4 = vmul.f32 %v4656_v8, %v1866_v9 }
 0x3b1   : > { %v1977_v55 = vmul.f32 %v4620_v41, %v1961_v32  ;;  %v2034_v46 = vmul.f32 1.442695, %v2010_v25  ;;  %v2054_v35 = vmul.f32 %v3685_v45, %v1974_v57  ;;  %v1959_v6 = vadd.f32 0.2548296, %v1943_v13  ;;  %v3689_v14 = vpop.eup %3688 }
 0x3b2   : > { %v1916_v54 = vmul.f32 %v4644_v17, %v1900_v42  ;;  %v4675_v56 = vmul.f32 0.5, %v4580_v50  ;;  %v2100_v21 = vsub.f32 0.0, %v2068_v38  ;;  %v1898_v43 = vadd.f32 1.4214138, %v1882_v4 }
 0x3b3   : > { %v2057_v30 = vmul.f32 %v3687_v37, %v1977_v55  ;;  %v2013_v63 = vsub.f32 0.0, %v1997_v26  ;;  %v2101_v49 = vsub.f32 0.0, %v2069_v5  ;;  %v1975_v41 = vmul.f32 %v4627_v29, %v1959_v6 }
 0x3b4   : > { %v1932_v16 = vadd.f32 -0.28449672, %v1916_v54  ;;  %v4680_v39 = vmul.f32 0.70710677, %v4667_v34  ;;  %v4682_v25 = vpop.eup %3690  ;;  %v2072_v45 = vsub.f32 1.0, %v2056_v28  ;;  %v1914_v50 = vmul.f32 %v4656_v8, %v1898_v43 }
 0x3b5   : > { %3694 = vpow2.f32 %v2034_v46  ;;  %v4688_v57 = vadd.f32 %v4563_v10, %v4502_v7  ;;  %v2070_v31 = vsub.f32 1.0, %v2054_v35  ;;  %vm2089_vm6 = vcmp.ge.f32.partialorder %v4543_v3, 0.0 }
 0x3b6   : > { %v2055_v29 = vmul.f32 %v3689_v14, %v1975_v41  ;;  %v1948_v32 = vmul.f32 %v4644_v17, %v1932_v16  ;;  %v4693_v9 = vmul.f32 0.5, %v4618_v33  ;;  %v2116_v26 = vsel %vm2084_vm2, %v2068_v38, %v2100_v21 }
 0x3b7   : > { %v2073_v13 = vsub.f32 1.0, %v2057_v30  ;;  %v1930_v42 = vadd.f32 -0.28449672, %v1914_v50  ;;  %v1853_v37 = vmul.f32 1.0614054, %v4682_v25  ;;  %v2117_v10 = vsel %vm2085_vm3, %v2069_v5, %v2101_v49 }
 0x3b8   : > { %vm2087_vm7 = vcmp.ge.f32.partialorder %v4553_v59, 0.0  ;;  %v1964_v28 = vadd.f32 0.2548296, %v1948_v32  ;;  %v2040_v55 = vmul.f32 1.442695, %v2013_v63  ;;  %v2104_v46 = vsub.f32 0.0, %v2072_v45 }
 0x3b9   : > { %v1771_v4 = vand.u32 2147483647, %v4680_v39  ;;  %v2071_v35 = vsub.f32 1.0, %v2055_v29  ;;  %v1946_v33 = vmul.f32 %v4656_v8, %v1930_v42  ;;  %v1869_v6 = vadd.f32 -1.4531521, %v1853_v37 }
 0x3ba   : > { %v3693_v1 = vpop.eup %3692  ;;  %v2102_v38 = vsub.f32 0.0, %v2070_v31  ;;  %v1980_v54 = vmul.f32 %v4644_v17, %v1964_v28  ;;  %v4706_v11 = vadd.f32 %v4502_v7, %v4570_v18  ;;  %v2132_v5 = vadd.f32 1.0, %v2116_v26 }
 0x3bb   : > { %v1787_v14 = vmul.f32 0.3275911, %v1771_v4  ;;  %v2105_v21 = vsub.f32 0.0, %v2073_v13  ;;  %v1962_v30 = vadd.f32 0.2548296, %v1946_v33  ;;  %v1885_v43 = vmul.f32 %v4682_v25, %v1869_v6 }
 0x3bc   : > { %v2133_v63 = vadd.f32 1.0, %v2117_v10  ;;  %v2060_v49 = vmul.f32 %v3693_v1, %v1980_v54  ;;  %vm2092_vm8 = vcmp.ge.f32.partialorder %v4577_v12, 0.0  ;;  %3696 = vpow2.f32 %v2040_v55 }
 0x3bd   : > { %v1803_v41 = vadd.f32 1.0, %v1787_v14  ;;  %v2120_v16 = vsel %vm2088_vm4, %v2072_v45, %v2104_v46  ;;  %v2103_v17 = vsub.f32 0.0, %v2071_v35  ;;  %v1978_v50 = vmul.f32 %v4656_v8, %v1962_v30 }
 0x3be   : > { %v1901_v29 = vadd.f32 1.4214138, %v1885_v43  ;;  %v2118_v18 = vsel %vm2086_vm5, %v2070_v31, %v2102_v38  ;;  %v2076_v32 = vsub.f32 1.0, %v2060_v49  ;;  %v4716_v26 = vmul.f32 0.70710677, %v4688_v57 }
 0x3bf   : > { %3698 = vrcp.f32 %v1803_v41  ;;  %v3695_v42 = vpop.eup %3694  ;;  %v4719_v37 = vmul.f32 %v2132_v5, %v4525_v19  ;;  %v2121_v58 = vsel %vm2089_vm6, %v2073_v13, %v2105_v21  ;;  %v1995_v10 = vmul.f32 %v1771_v4, %v1771_v4 }
 0x3c0   : > { %v1917_v45 = vmul.f32 %v4682_v25, %v1901_v29  ;;  %v2136_v8 = vadd.f32 1.0, %v2120_v16  ;;  %v2058_v28 = vmul.f32 %v3695_v42, %v1978_v50  ;;  %v1776_v22 = vand.u32 2147483647, %v4716_v26 }
 0x3c1   : > { %v4726_v31 = vmul.f32 0.70710677, %v4706_v11  ;;  %v2134_v55 = vadd.f32 1.0, %v2118_v18  ;;  %v2119_v46 = vsel %vm2087_vm7, %v2071_v35, %v2103_v17  ;;  %v2108_v33 = vsub.f32 0.0, %v2076_v32 }
 0x3c2   : > { %v1933_v19 = vadd.f32 -0.28449672, %v1917_v45  ;;  %v4731_v6 = vmul.f32 %v2133_v63, %v4545_v20  ;;  %v2137_v3 = vadd.f32 1.0, %v2121_v58  ;;  %v1792_v13 = vmul.f32 0.3275911, %v1776_v22 }
 0x3c3   : > { %v1774_v4 = vand.u32 2147483647, %v4726_v31  ;;  %vm2090_vm9 = vcmp.ge.f32.partialorder %v4594_v44, 0.0  ;;  %v4737_v38 = vmul.f32 0.5, %v4667_v34  ;;  %v2011_v54 = vsub.f32 0.0, %v1995_v10 }
 0x3c4   : > { %v1949_v1 = vmul.f32 %v4682_v25, %v1933_v19  ;;  %v4741_v59 = vadd.f32 %v4574_v48, %v4502_v7  ;;  %v2135_v35 = vadd.f32 1.0, %v2119_v46  ;;  %v2074_v14 = vsub.f32 1.0, %v2058_v28 }
 0x3c5   : > { %v1808_v20 = vadd.f32 1.0, %v1792_v13  ;;  %v1790_v5 = vmul.f32 0.3275911, %v1774_v4  ;;  %v4744_v21 = vmul.f32 %v2136_v8, %v4585_v52  ;;  %v4747_v30 = vmul.f32 %v2134_v55, %v4588_v0 }
 0x3c6   : > { %v2124_v43 = vsel %vm2092_vm8, %v2076_v32, %v2108_v33  ;;  %v1965_v34 = vadd.f32 0.2548296, %v1949_v1  ;;  %v3697_v63 = vpop.eup %3696  ;;  %v4752_v49 = vmul.f32 %v2137_v3, %v4597_v27  ;;  %vm2093_vm10 = vcmp.ge.f32.partialorder %v4631_v47, 0.0 }
 0x3c7   : > { %3700 = vrcp.f32 %v1808_v20  ;;  %v2000_v48 = vmul.f32 %v1776_v22, %v1776_v22  ;;  %v1806_v41 = vadd.f32 1.0, %v1790_v5  ;;  %v2036_v52 = vmul.f32 1.442695, %v2011_v54 }
 0x3c8   : > { %v1981_v16 = vmul.f32 %v4682_v25, %v1965_v34  ;;  %v4757_v17 = vmul.f32 0.70710677, %v4741_v59  ;;  %v4761_v12 = vadd.f32 %v4502_v7, %v4582_v40  ;;  %v4766_v27 = vmul.f32 %v2135_v35, %v4607_v2 }
 0x3c9   : > { %v4763_v0 = vpop.eup %3698  ;;  %v2140_v50 = vadd.f32 1.0, %v2124_v43  ;;  %v2106_v29 = vsub.f32 0.0, %v2074_v14  ;;  %v1842_v18 = vmul.f32 1.0614054, %v4599_v53  ;;  %3702 = vrcp.f32 %v1806_v41 }
 0x3ca   : > { %v2061_v32 = vmul.f32 %v3697_v63, %v1981_v16  ;;  %v1851_v25 = vmul.f32 1.0614054, %v4763_v0  ;;  %v1843_v42 = vmul.f32 1.0614054, %v4635_v60  ;;  %v2016_v58 = vsub.f32 0.0, %v2000_v48 }
 0x3cb   : > { %v1998_v45 = vmul.f32 %v1774_v4, %v1774_v4  ;;  %v1777_v7 = vand.u32 2147483647, %v4757_v17  ;;  %v4773_v40 = vmul.f32 0.70710677, %v4761_v12  ;;  %3704 = vpow2.f32 %v2036_v52 }
 0x3cc   : > { %v2077_v10 = vsub.f32 1.0, %v2061_v32  ;;  %v1867_v2 = vadd.f32 -1.4531521, %v1851_v25  ;;  %v1858_v8 = vadd.f32 -1.4531521, %v1842_v18  ;;  %v4776_v28 = vmul.f32 %v2140_v50, %v4640_v62  ;;  %v2346_v18 = vld [vmem:[#allocation2] sm:$0xff] }
 0x3cd   : > { %v2122_v22 = vsel %vm2090_vm9, %v2074_v14, %v2106_v29  ;;  %v1793_v55 = vmul.f32 0.3275911, %v1777_v7  ;;  %v1775_v46 = vand.u32 2147483647, %v4773_v40  ;;  %v1859_v3 = vadd.f32 -1.4531521, %v1843_v42 }
 0x3ce   : > { %v2109_v33 = vsub.f32 0.0, %v2077_v10  ;;  %v1883_v19 = vmul.f32 %v4763_v0, %v1867_v2  ;;  %v1874_v13 = vmul.f32 %v4599_v53, %v1858_v8  ;;  %v2046_v4 = vmul.f32 1.442695, %v2016_v58  ;;  %v2347_v32 = vld [vmem:[#allocation2 + $0x8] sm:$0xff]  ;;  %v2348_v8 = vld [vmem:[#allocation2 + $0x10] sm:$0xff] }
 0x3cf   : > { %v2014_v1 = vsub.f32 0.0, %v1998_v45  ;;  %v1809_v54 = vadd.f32 1.0, %v1793_v55  ;;  %v1791_v35 = vmul.f32 0.3275911, %v1775_v46  ;;  %v1875_v44 = vmul.f32 %v4635_v60, %v1859_v3 }
 0x3d0   : > { %v2125_v62 = vsel %vm2093_vm10, %v2077_v10, %v2109_v33  ;;  %v1899_v20 = vadd.f32 1.4214138, %v1883_v19  ;;  %v1890_v14 = vadd.f32 1.4214138, %v1874_v13  ;;  %v2138_v43 = vadd.f32 1.0, %v2122_v22  ;;  %v2349_v22 = vld [vmem:[#allocation2 + $0x18] sm:$0xff] }
 0x3d1   : > { %v4786_v5 = vpop.eup %3700  ;;  %v2141_v34 = vadd.f32 1.0, %v2125_v62  ;;  %3706 = vrcp.f32 %v1809_v54  ;;  %v1807_v63 = vadd.f32 1.0, %v1791_v35  ;;  %v2001_v16 = vmul.f32 %v1777_v7, %v1777_v7 }
 0x3d2   : > { %v1915_v48 = vmul.f32 %v4763_v0, %v1899_v20  ;;  %v1856_v41 = vmul.f32 1.0614054, %v4786_v5  ;;  %v1891_v52 = vadd.f32 1.4214138, %v1875_v44  ;;  %3708 = vpow2.f32 %v2046_v4 }
 0x3d3   : > { %v4791_v50 = vmul.f32 %v2141_v34, %v4693_v9  ;;  %v1906_v47 = vmul.f32 %v4599_v53, %v1890_v14  ;;  %v2163_v29 = vpack.c.bf16 %v4731_v6, %v4719_v37  ;;  %v4796_v25 = vpop.eup %3702  ;;  %v2042_v45 = vmul.f32 1.442695, %v2014_v1 }
 0x3d4   : > { %v1931_v42 = vadd.f32 -0.28449672, %v1915_v48  ;;  %v1872_v58 = vadd.f32 -1.4531521, %v1856_v41  ;;  %3710 = vrcp.f32 %v1807_v63  ;;  %v1854_v7 = vmul.f32 1.0614054, %v4796_v25 }
 0x3d5   : > { %v1907_v10 = vmul.f32 %v4635_v60, %v1891_v52  ;;  %v1922_v9 = vadd.f32 -0.28449672, %v1906_v47  ;;  %v2164_v2 = vpack.c.bf16 %v4766_v27, %v4747_v30  ;;  %v3705_v55 = vpop.eup %3704  ;;  %v2017_v3 = vsub.f32 0.0, %v2001_v16  ;;  %v2350_v16 = vld [vmem:[#allocation2 + $0x20] sm:$0xff]  ;;  %v2351_v52 = vld [vmem:[#allocation2 + $0x28] sm:$0xff] }
 0x3d6   : > { %v1947_v33 = vmul.f32 %v4763_v0, %v1931_v42  ;;  %v1888_v19 = vmul.f32 %v4786_v5, %v1872_v58  ;;  %v2165_v13 = vpack.c.bf16 %v4752_v49, %v4744_v21  ;;  %v1870_v4 = vadd.f32 -1.4531521, %v1854_v7  ;;  %v2358_v21 = vld [vmem:[#allocation2 + $0x60] sm:$0xff]  ;;  %v2359_v49 = vld [vmem:[#allocation2 + $0x68] sm:$0xff] }
 0x3d7   : > { %v1923_v1 = vadd.f32 -0.28449672, %v1907_v10  ;;  %v1938_v54 = vmul.f32 %v4599_v53, %v1922_v9  ;;  %v2167_v35 = vpack.c.bf16 %v4791_v50, %v4776_v28  ;;  %v2362_v44 = vpack.c.bf16 %v2347_v32, %v2346_v18  ;;  %v2467_v28 = vld [vmem:[%s3894_s17] sm:$0xff] }
 0x3d8   : > { %v1963_v62 = vadd.f32 0.2548296, %v1947_v33  ;;  %v1904_v20 = vadd.f32 1.4214138, %v1888_v19  ;;  %v2363_v14 = vpack.c.bf16 %v2349_v22, %v2348_v8  ;;  %vm2091_vm11 = vcmp.ge.f32.partialorder %v4680_v39, 0.0  ;;  %v2356_v39 = vld [vmem:[#allocation2 + $0x50] sm:$0xff] }
 0x3d9   : > { %v1886_v34 = vmul.f32 %v4796_v25, %v1870_v4  ;;  %v1999_v63 = vmul.f32 %v1775_v46, %v1775_v46  ;;  %v1939_v48 = vmul.f32 %v4635_v60, %v1923_v1  ;;  %v1954_v41 = vadd.f32 0.2548296, %v1938_v54  ;;  %3452 = vmatprep.subr.bf16.mxu0 %v2362_v44  ;;  %v2353_v4 = vld [vmem:[#allocation2 + $0x38] sm:$0xff] }
 0x3da   : > { %v4813_v47 = vmul.f32 %v2138_v43, %v4675_v56  ;;  %v1979_v42 = vmul.f32 %v4763_v0, %v1963_v62  ;;  %v1920_v58 = vmul.f32 %v4786_v5, %v1904_v20  ;;  %v2048_v7 = vmul.f32 1.442695, %v2017_v3  ;;  %3453 = vmatpush3.bf16.msra.mxu0 %v2362_v44  ;;  %v2352_v3 = vld [vmem:[#allocation2 + $0x30] sm:$0xff] }
 0x3db   : > { %v4817_v18 = vpop.eup %3706  ;;  %v1902_v32 = vadd.f32 1.4214138, %v1886_v34  ;;  %3712 = vpow2.f32 %v2042_v45  ;;  %v1955_v46 = vadd.f32 0.2548296, %v1939_v48  ;;  %v1970_v10 = vmul.f32 %v4599_v53, %v1954_v41  ;;  %3454 = vmatprep.subr.bf16.mxu0 %v2363_v14 }
 0x3dc   : > { %v2059_v56 = vmul.f32 %v3705_v55, %v1979_v42  ;;  %v1936_v43 = vadd.f32 -0.28449672, %v1920_v58  ;;  %v1857_v0 = vmul.f32 1.0614054, %v4817_v18  ;;  %v2364_v9 = vpack.c.bf16 %v2351_v52, %v2350_v16  ;;  %v3709_v8 = vpop.eup %3708  ;;  %v2354_v58 = vld [vmem:[#allocation2 + $0x40] sm:$0xff] }
 0x3dd   : > { %v1918_v22 = vmul.f32 %v4796_v25, %v1902_v32  ;;  %v2015_v33 = vsub.f32 0.0, %v1999_v63  ;;  %v1971_v19 = vmul.f32 %v4635_v60, %v1955_v46  ;;  %v2050_v45 = vmul.f32 %v4622_v23, %v1970_v10 }
 0x3de   : > { %v4826_v53 = vpop.eup %3710  ;;  %v2075_v1 = vsub.f32 1.0, %v2059_v56  ;;  %v1952_v55 = vmul.f32 %v4786_v5, %v1936_v43  ;;  %v1873_v54 = vadd.f32 -1.4531521, %v1857_v0  ;;  %3714 = vpow2.f32 %v2048_v7  ;;  %3455 = vmatpush3.bf16.msra.mxu0 %v2363_v14  ;;  %v2355_v7 = vld [vmem:[#allocation2 + $0x48] sm:$0xff] }
 0x3df   : > { %v1934_v62 = vadd.f32 -0.28449672, %v1918_v22  ;;  %v1855_v20 = vmul.f32 1.0614054, %v4826_v53  ;;  %v2051_v44 = vmul.f32 %v4648_v36, %v1971_v19  ;;  %v2066_v34 = vsub.f32 1.0, %v2050_v45  ;;  %3456 = vmatprep.subr.bf16.mxu0 %v2364_v9 }
 0x3e0   : > { %v2107_v63 = vsub.f32 0.0, %v2075_v1  ;;  %v1968_v60 = vadd.f32 0.2548296, %v1952_v55  ;;  %v1889_v23 = vmul.f32 %v4817_v18, %v1873_v54  ;;  %v2365_v48 = vpack.c.bf16 %v2353_v4, %v2352_v3  ;;  %v2357_v4 = vld [vmem:[#allocation2 + $0x58] sm:$0xff] }
 0x3e1   : > { %v1950_v41 = vmul.f32 %v4796_v25, %v1934_v62  ;;  %v1871_v16 = vadd.f32 -1.4531521, %v1855_v20  ;;  %v2067_v52 = vsub.f32 1.0, %v2051_v44  ;;  %v2098_v42 = vsub.f32 0.0, %v2066_v34 }
 0x3e2   : > { %v2123_v32 = vsel %vm2091_vm11, %v2075_v1, %v2107_v63  ;;  %v1984_v36 = vmul.f32 %v4786_v5, %v1968_v60  ;;  %v1905_v46 = vadd.f32 1.4214138, %v1889_v23  ;;  %v2044_v14 = vmul.f32 1.442695, %v2015_v33  ;;  %3457 = vmatpush3.bf16.msra.mxu0 %v2364_v9 }
 0x3e3   : > { %v2139_v10 = vadd.f32 1.0, %v2123_v32  ;;  %v1966_v56 = vadd.f32 0.2548296, %v1950_v41  ;;  %v1887_v43 = vmul.f32 %v4826_v53, %v1871_v16  ;;  %v2099_v0 = vsub.f32 0.0, %v2067_v52  ;;  %3458 = vmatprep.subr.bf16.mxu0 %v2365_v48 }
 0x3e4   : > { %v2064_v22 = vmul.f32 %v3709_v8, %v1984_v36  ;;  %v1921_v19 = vmul.f32 %v4817_v18, %v1905_v46  ;;  %v2114_v45 = vsel %vm2082_vm12, %v2066_v34, %v2098_v42  ;;  %v2366_v3 = vpack.c.bf16 %v2355_v7, %v2354_v58 }
 0x3e5   : > { %v3713_v1 = vpop.eup %3712  ;;  %v2155_v5 = vmul.f32 %v2139_v10, %v4737_v38  ;;  %v1982_v33 = vmul.f32 %v4796_v25, %v1966_v56  ;;  %v1903_v55 = vadd.f32 1.4214138, %v1887_v43  ;;  %v2115_v54 = vsel %vm2083_vm13, %v2067_v52, %v2099_v0 }
 0x3e6   : > { %v1937_v9 = vadd.f32 -0.28449672, %v1921_v19  ;;  %3716 = vpow2.f32 %v2044_v14  ;;  %v2130_v8 = vadd.f32 1.0, %v2114_v45  ;;  %v2131_v62 = vadd.f32 1.0, %v2115_v54  ;;  %3459 = vmatpush3.bf16.msra.mxu0 %v2365_v48  ;;  %v2475_v54 = vld [vmem:[%s3894_s17 + $0x40] sm:$0xff] }
 0x3e7   : > { %v2062_v20 = vmul.f32 %v3713_v1, %v1982_v33  ;;  %v1919_v51 = vmul.f32 %v4826_v53, %v1903_v55  ;;  %v2166_v44 = vpack.c.bf16 %v2155_v5, %v4813_v47  ;;  %v2367_v34 = vpack.c.bf16 %v2357_v4, %v2356_v39  ;;  %3460 = vmatprep.subr.bf16.mxu0 %v2366_v3  ;;  %v2468_v39 = vld [vmem:[%s3894_s17 + $0x8] sm:$0xff]  ;;  %v2471_v1 = vld [vmem:[%s3894_s17 + $0x20] sm:$0xff]  ;;  %v2474_v5 = vld [vmem:[%s3894_s17 + $0x38] sm:$0xff] }
 0x3e8   : > { %v3715_v63 = vpop.eup %3714  ;;  %v2080_v60 = vsub.f32 1.0, %v2064_v22  ;;  %v1953_v38 = vmul.f32 %v4817_v18, %v1937_v9  ;;  %v2146_v25 = vmul.f32 %v2130_v8, %v4537_v61  ;;  %v2147_v24 = vmul.f32 %v2131_v62, %v4561_v15  ;;  %v2472_v4 = vld [vmem:[%s3894_s17 + $0x28] sm:$0xff]  ;;  %v2473_v33 = vld [vmem:[%s3894_s17 + $0x30] sm:$0xff]  ;;  %v2478_v9 = vld [vmem:[%s3894_s17 + $0x58] sm:$0xff] }
 0x3e9   : > { %v1935_v23 = vadd.f32 -0.28449672, %v1919_v51  ;;  %v2078_v52 = vsub.f32 1.0, %v2062_v20  ;;  %vm2096_vm14 = vcmp.ge.f32.partialorder %v4716_v26, 0.0  ;;  %vm2094_vm15 = vcmp.ge.f32.partialorder %v4726_v31, 0.0  ;;  %v2476_v55 = vld [vmem:[%s3894_s17 + $0x48] sm:$0xff] }
 0x3ea   : > { %v1969_v41 = vadd.f32 0.2548296, %v1953_v38  ;;  %v2162_v16 = vpack.c.bf16 %v2147_v24, %v2146_v25  ;;  %3461 = vmatpush3.bf16.msra.mxu0 %v2366_v3  ;;  %v2112_v58 = vsub.f32 0.0, %v2080_v60  ;;  %vm2097_vm0 = vcmp.ge.f32.partialorder %v4757_v17, 0.0  ;;  %v2469_v3 = vld [vmem:[%s3894_s17 + $0x10] sm:$0xff]  ;;  %v2480_v62 = vld [vmem:[%s3894_s17 + $0x68] sm:$0xff] }
 0x3eb   : > { %v1951_v42 = vmul.f32 %v4826_v53, %v1935_v23  ;;  %3462 = vmatprep.subr.bf16.mxu0 %v2367_v34  ;;  %v2110_v15 = vsub.f32 0.0, %v2078_v52  ;;  %v1744_v27 = vmul.f32 0.5, %v4688_v57  ;;  %v1745_v26 = vmul.f32 0.5, %v4741_v59  ;;  %v2477_v8 = vld [vmem:[%s3894_s17 + $0x50] sm:$0xff]  ;;  %v2479_v20 = vld [vmem:[%s3894_s17 + $0x60] sm:$0xff]  ;;  %v2482_v51 = vld [vmem:[%s3894_s17 + $0x78] sm:$0xff] }
 0x3ec   : > { %v1985_v47 = vmul.f32 %v4817_v18, %v1969_v41  ;;  %3436 = vmatprep.mubr.bf16.mxu1 %v2162_v16  ;;  %v2128_v18 = vsel %vm2096_vm14, %v2080_v60, %v2112_v58  ;;  %vm2095_vm1 = vcmp.ge.f32.partialorder %v4773_v40, 0.0  ;;  %v1742_v17 = vmul.f32 0.5, %v4706_v11  ;;  %v2360_v11 = vld [vmem:[#allocation2 + $0x70] sm:$0xff] }
 0x3ed   : > { %v1967_v48 = vadd.f32 0.2548296, %v1951_v42  ;;  %3437 = vmatmul.mubr.bf16.vlgmr.msra.gmra.mrb[0].mxu1 %v2163_v29  ;;  %v2144_v37 = vadd.f32 1.0, %v2128_v18  ;;  %v2126_v6 = vsel %vm2094_vm15, %v2078_v52, %v2110_v15  ;;  %v1743_v0 = vmul.f32 0.5, %v4761_v12  ;;  %v2361_v12 = vld [vmem:[#allocation2 + $0x78] sm:$0xff] }
 0x3ee   : > { %v2065_v61 = vmul.f32 %v3715_v63, %v1985_v47  ;;  %3440 = vmatprep.mubr.bf16.mxu1 %v2164_v2  ;;  %3463 = vmatpush3.bf16.msra.mxu0 %v2367_v34  ;;  %v2142_v10 = vadd.f32 1.0, %v2126_v6  ;;  %v2368_v40 = vpack.c.bf16 %v2359_v49, %v2358_v21  ;;  %v3795_v50 = vmov 0   ;;  %v3212_v63 = vld [vmem:[%s5423_s7] ss:$0 sm:$0xff] }
 0x3ef   : > { %v1983_v7 = vmul.f32 %v4826_v53, %v1967_v48  ;;  %v2160_v31 = vmul.f32 %v2144_v37, %v1744_v27  ;;  %3629 = vset.pattern.permute.xlu1 %v3795_v50  ;;  %3628 = vset.pattern.permute.xlu0 %v3795_v50  ;;  %vm2573_vm3 = vcmask 64512  }
 0x3f0   : > { %v3717_v32 = vpop.eup %3716  ;;  %v2081_v36 = vsub.f32 1.0, %v2065_v61  ;;  %v2158_v59 = vmul.f32 %v2142_v10, %v1742_v17  ;;  %3464 = vmatprep.subr.bf16.mxu0 %v2368_v40  ;;  %2495 = vperm.xlu1 %3629, %v2469_v3  }
 0x3f1   : > { %v2063_v46 = vmul.f32 %v3717_v32, %v1983_v7  ;;  %2489 = vperm.xlu0 %3628, %v2467_v28  }
 0x3f2   : > { %v2113_v14 = vsub.f32 0.0, %v2081_v36  ;;  %3465 = vmatpush3.bf16.msra.mxu0 %v2368_v40 }
 0x3f3   : > { %v2079_v29 = vsub.f32 1.0, %v2063_v46 }
 0x3f4   : > { %v2129_v30 = vsel %vm2097_vm0, %v2081_v36, %v2113_v14 }
 0x3f5   : > { %v2145_v2 = vadd.f32 1.0, %v2129_v30  ;;  %v2111_v53 = vsub.f32 0.0, %v2079_v29  ;;  %3441 = vmatmul.mubr.bf16.gmra.mrb[4].mxu1 %v2165_v13  ;;  %v2369_v13 = vpack.c.bf16 %v2361_v12, %v2360_v11  ;;  %2492 = vperm.xlu0 %3628, %v2468_v39   ;;  %v5430_v11 = vlaneseq }
 0x3f6   : > { %3444 = vmatprep.mubr.bf16.mxu1 %v2166_v44  ;;  %v2481_v44 = vld [vmem:[%s3894_s17 + $0x70] sm:$0xff] }
 0x3f7   : > { %v2161_v56 = vmul.f32 %v2145_v2, %v1745_v26  ;;  %v2127_v43 = vsel %vm2095_vm1, %v2079_v29, %v2111_v53  ;;  %3466 = vmatprep.subr.bf16.mxu0 %v2369_v13 }
 0x3f8   : > { %v2143_v57 = vadd.f32 1.0, %v2127_v43  ;;  %3467 = vmatpush3.bf16.msra.mxu0 %v2369_v13  ;;  %v4948_v13 = vand.u32 127, %v5430_v11 }
 0x3f9   : > { %v2169_v22 = vpack.c.bf16 %v2161_v56, %v2160_v31  ;;  %2501 = vperm.xlu0 %3628, %v2471_v1  }
 0x3fa   : > { %v2159_v19 = vmul.f32 %v2143_v57, %v1743_v0 }
 0x3fc   : > { %v2168_v45 = vpack.c.bf16 %v2159_v19, %v2158_v59 }
 0x3fd   : > { %3445 = vmatmul.mubr.bf16.gmra.mrb[8].mxu1 %v2167_v35  ;;  %v2470_v35 = vld [vmem:[%s3894_s17 + $0x18] sm:$0xff]  ;;  %2507 = vperm.xlu0 %3628, %v2473_v33  }
 0x3fe   : > { %3448 = vmatprep.mubr.bf16.mxu1 %v2168_v45  ;;  %2498 = vperm.xlu1 %3629, %v2470_v35  }
 0x401   : > { %2513 = vperm.xlu0 %3628, %v2475_v54  }
 0x402   : > { %2504 = vperm.xlu1 %3629, %v2472_v4  }
 0x405   : > { %3449 = vmatmul.mubr.bf16.gmra.mrb[12].mxu1 %v2169_v22  ;;  %2519 = vperm.xlu0 %3628, %v2477_v8  }
 0x406   : > { %2510 = vperm.xlu1 %3629, %v2474_v5  }
 0x409   : > { %2525 = vperm.xlu0 %3628, %v2479_v20  }
 0x40a   : > { %2516 = vperm.xlu1 %3629, %v2476_v55  }
 0x40d   : > { %2531 = vperm.xlu0 %3628, %v2481_v44  }
 0x40e   : > { %2522 = vperm.xlu1 %3629, %v2478_v9  }
 0x412   : > { %2528 = vperm.xlu1 %3629, %v2480_v62  }
 0x416   : > { %2534 = vperm.xlu1 %3629, %v2482_v51  }
 0x46f   : > { %v4941_v49 = vpop.permute.xlu1 %2495 }
 0x470   : > { %v4939_v21 = vpop.permute.xlu0 %2489  ;;  %vm2538_vm2 = vcmp.eq.s32.totalorder %v4941_v49, %v4948_v13 }
 0x471   : > { %vm2536_vm4 = vcmp.eq.s32.totalorder %v4939_v21, %v4948_v13 }
 0x474   : > { %v4943_v40 = vpop.permute.xlu0 %2492 }
 0x475   : > { %vm2537_vm5 = vcmp.eq.s32.totalorder %v4943_v40, %v4948_v13 }
 0x478   : > { %v4950_v3 = vpop.permute.xlu0 %2501 }
 0x479   : > { %vm2540_vm8 = vcmp.eq.s32.totalorder %v4950_v3, %v4948_v13 }
 0x47c   : > { %v4958_v50 = vpop.permute.xlu0 %2507 }
 0x47d   : > { %v4945_v12 = vpop.permute.xlu1 %2498  ;;  %vm2542_vm7 = vcmp.eq.s32.totalorder %v4958_v50, %v4948_v13 }
 0x47e   : > { %vm2539_vm6 = vcmp.eq.s32.totalorder %v4945_v12, %v4948_v13 }
 0x480   : > { %v4977_v62 = vpop.permute.xlu0 %2513 }
 0x481   : > { %v4952_v28 = vpop.permute.xlu1 %2504  ;;  %vm2544_vm12 = vcmp.eq.s32.totalorder %v4977_v62, %v4948_v13 }
 0x482   : > { %vm2541_vm10 = vcmp.eq.s32.totalorder %v4952_v28, %v4948_v13 }
 0x485   : > { %v4966_v33 = vpop.permute.xlu1 %2510 }
 0x486   : > { %vm2543_vm9 = vcmp.eq.s32.totalorder %v4966_v33, %v4948_v13 }
 0x4c0   : > { %v3438_v34 = vpop.f32.mrb[0].mxu1 }
 0x4c1   : > { %v2275_v60 = vpop.f32.mrb[1].mxu1  ;;  %v4897_v16 = vadd.f32 %v3438_v34, %v3212_v63  ;;  %v4985_v34 = vpop.permute.xlu1 %2516 }
 0x4c2   : > { %v3439_v38 = vpop.f32.mrb[2].mxu1  ;;  %v4893_v23 = vadd.f32 %v3212_v63, %v2275_v60  ;;  %vm2545_vm14 = vcmp.eq.s32.totalorder %v4985_v34, %v4948_v13 }
 0x4c3   : > { %v4891_v25 = vadd.f32 %v3439_v38, %v3212_v63  ;;  %v2278_v24 = vpop.f32.mrb[3].mxu1 }
 0x4c4   : > { %v4895_v41 = vadd.f32 %v3212_v63, %v2278_v24 }
 0x4c5   : > { %v2339_v42 = vpack.c.bf16 %v4891_v25, %v4897_v16 }
 0x4c6   : > { %v2338_v52 = vpack.c.bf16 %v4895_v41, %v4893_v23 }
 0x4c8   : > { %v3442_v58 = vpop.f32.mrb[4].mxu1  ;;  %3468 = vmatprep.mubr.bf16.mxu0 %v2338_v52 }
 0x4c9   : > { %v2291_v47 = vpop.f32.mrb[5].mxu1  ;;  %3469 = vmatmul.mubr.bf16.vlgmr.msra.gmra.mrb[16].mxu0 %v2339_v42  ;;  %v4909_v18 = vadd.f32 %v3442_v58, %v3212_v63 }
 0x4ca   : > { %v3443_v48 = vpop.f32.mrb[6].mxu1  ;;  %v4905_v7 = vadd.f32 %v3212_v63, %v2291_v47 }
 0x4cb   : > { %v4903_v61 = vadd.f32 %v3443_v48, %v3212_v63  ;;  %v2294_v15 = vpop.f32.mrb[7].mxu1  ;;  %5445 = vst [vmem:[#allocation10_spill] sm:$0xff] %v4909_v18  ;;  %v5002_v48 = vpop.permute.xlu0 %2519 }
 0x4cc   : > { %v4907_v32 = vadd.f32 %v3212_v63, %v2294_v15  ;;  %vm5432_vm11 = vcmp.eq.s32.totalorder %v5002_v48, %v4948_v13 }
 0x4cd   : > { %v2341_v46 = vpack.c.bf16 %v4903_v61, %v4909_v18 }
 0x4ce   : > { %v2340_v36 = vpack.c.bf16 %v4907_v32, %v4905_v7 }
 0x4d0   : > { %v3446_v14 = vpop.f32.mrb[8].mxu1  ;;  %3472 = vmatprep.mubr.bf16.mxu0 %v2340_v36 }
 0x4d1   : > { %v2307_v37 = vpop.f32.mrb[9].mxu1  ;;  %3473 = vmatmul.mubr.bf16.gmra.mrb[20].mxu0 %v2341_v46  ;;  %v4921_v2 = vadd.f32 %v3446_v14, %v3212_v63  ;;  %v5008_v46 = vpop.permute.xlu1 %2522 }
 0x4d2   : > { %v3447_v6 = vpop.f32.mrb[10].mxu1  ;;  %v4917_v27 = vadd.f32 %v3212_v63, %v2307_v37  ;;  %vm5442_vm13 = vcmp.eq.s32.totalorder %v5008_v46, %v4948_v13 }
 0x4d3   : > { %v4915_v29 = vadd.f32 %v3447_v6, %v3212_v63  ;;  %v2310_v30 = vpop.f32.mrb[11].mxu1  ;;  %5449 = vst [vmem:[#allocation14_spill] sm:$0xff] %v4921_v2 }
 0x4d4   : > { %5447 = vst [vmem:[#allocation12_spill] sm:$0xff] %v4917_v27  ;;  %v4919_v26 = vadd.f32 %v3212_v63, %v2310_v30 }
 0x4d5   : > { %5446 = vst [vmem:[#allocation11_spill] sm:$0xff] %v4915_v29  ;;  %v2343_v10 = vpack.c.bf16 %v4915_v29, %v4921_v2 }
 0x4d6   : > { %5448 = vst [vmem:[#allocation13_spill] sm:$0xff] %v4919_v26  ;;  %v2342_v53 = vpack.c.bf16 %v4919_v26, %v4917_v27 }
 0x4d8   : > { %v3450_v31 = vpop.f32.mrb[12].mxu1  ;;  %3476 = vmatprep.mubr.bf16.mxu0 %v2342_v53  ;;  %v5022_v53 = vpop.permute.xlu0 %2525 }
 0x4d9   : > { %v2323_v56 = vpop.f32.mrb[13].mxu1  ;;  %3477 = vmatmul.mubr.bf16.gmra.mrb[24].mxu0 %v2343_v10  ;;  %v4933_v59 = vadd.f32 %v3450_v31, %v3212_v63  ;;  %vm5429_vm15 = vcmp.eq.s32.totalorder %v5022_v53, %v4948_v13 }
 0x4da   : > { %v3451_v43 = vpop.f32.mrb[14].mxu1  ;;  %v4929_v57 = vadd.f32 %v3212_v63, %v2323_v56 }
 0x4db   : > { %v4927_v17 = vadd.f32 %v3451_v43, %v3212_v63  ;;  %v2326_v0 = vpop.f32.mrb[15].mxu1  ;;  %5453 = vst [vmem:[#allocation18_spill] sm:$0xff] %v4933_v59 }
 0x4dc   : > { %5451 = vst [vmem:[#allocation16_spill] sm:$0xff] %v4929_v57  ;;  %v4931_v22 = vadd.f32 %v3212_v63, %v2326_v0 }
 0x4dd   : > { %5450 = vst [vmem:[#allocation15_spill] sm:$0xff] %v4927_v17  ;;  %v2345_v45 = vpack.c.bf16 %v4927_v17, %v4933_v59 }
 0x4de   : > { %5452 = vst [vmem:[#allocation17_spill] sm:$0xff] %v4931_v22  ;;  %v2344_v19 = vpack.c.bf16 %v4931_v22, %v4929_v57 }
 0x4e0   : > { %3480 = vmatprep.mubr.bf16.mxu0 %v2344_v19 }
 0x4e1   : > { %3481 = vmatmul.mubr.bf16.gmra.mrb[28].mxu0 %v2345_v45  ;;  %v5032_v45 = vpop.permute.xlu1 %2528 }
 0x4e2   : > { %vm2549_vm0 = vcmp.eq.s32.totalorder %v5032_v45, %v4948_v13 }
 0x59c   : > { %v3470_v35 = vpop.f32.mrb[16].mxu0 }
 0x59d   : > { %v2559_v39 = vsel %vm2538_vm2, %v3470_v35, 0.0  ;;  %v2404_v4 = vpop.f32.mrb[17].mxu0 }
 0x59e   : > { %v3471_v1 = vpop.f32.mrb[18].mxu0  ;;  %v2580_v5 = vsel %vm2573_vm3, %v2559_v39, 0.0  ;;  %v2557_v55 = vsel %vm2536_vm4, %v2404_v4, 0.0 }
 0x59f   : > { %2581 = vadd.xlane.f32.xlu0 %v2580_v5  ;;  %v2407_v54 = vpop.f32.mrb[19].mxu0  ;;  %v2574_v20 = vsel %vm2573_vm3, %v2557_v55, 0.0  ;;  %v2560_v51 = vsel %vm2539_vm6, %v3471_v1, 0.0  ;;  %v5041_v1 = vpop.permute.xlu0 %2531 }
 0x5a0   : > { %v2558_v9 = vsel %vm2537_vm5, %v2407_v54, 0.0  ;;  %v2583_v24 = vsel %vm2573_vm3, %v2560_v51, 0.0  ;;  %vm2550_vm1 = vcmp.eq.s32.totalorder %v5041_v1, %v4948_v13 }
 0x5a1   : > { %v2577_v8 = vsel %vm2573_vm3, %v2558_v9, 0.0 }
 0x5a2   : > { %2578 = vadd.xlane.f32.xlu1 %v2577_v8 }
 0x5a3   : > { %2575 = vadd.xlane.f32.xlu0 %v2574_v20  ;;  %v5051_v20 = vpop.permute.xlu1 %2534 }
 0x5a4   : > { %v3474_v44 = vpop.f32.mrb[20].mxu0 }
 0x5a5   : > { %v2563_v63 = vsel %vm2542_vm7, %v3474_v44, 0.0  ;;  %v2420_v60 = vpop.f32.mrb[21].mxu0 }
 0x5a6   : > { %v3475_v38 = vpop.f32.mrb[22].mxu0  ;;  %v2592_v52 = vsel %vm2573_vm3, %v2563_v63, 0.0  ;;  %v2561_v42 = vsel %vm2540_vm8, %v2420_v60, 0.0 }
 0x5a7   : > { %v2564_v58 = vsel %vm2543_vm9, %v3475_v38, 0.0  ;;  %2584 = vadd.xlane.f32.xlu0 %v2583_v24  ;;  %2593 = vadd.xlane.f32.xlu1 %v2592_v52  ;;  %v2423_v47 = vpop.f32.mrb[23].mxu0  ;;  %v2586_v15 = vsel %vm2573_vm3, %v2561_v42, 0.0 }
 0x5a8   : > { %v2595_v36 = vsel %vm2573_vm3, %v2564_v58, 0.0  ;;  %v2562_v14 = vsel %vm2541_vm10, %v2423_v47, 0.0 }
 0x5a9   : > { %v2589_v31 = vsel %vm2573_vm3, %v2562_v14, 0.0 }
 0x5ab   : > { %2587 = vadd.xlane.f32.xlu1 %v2586_v15  ;;  %2596 = vadd.xlane.f32.xlu0 %v2595_v36 }
 0x5ac   : > { %v3478_v37 = vpop.f32.mrb[24].mxu0 }
 0x5ad   : > { %v2567_v6 = vsel %vm5432_vm11, %v3478_v37, 0.0  ;;  %v2436_v30 = vpop.f32.mrb[25].mxu0 }
 0x5ae   : > { %v3479_v10 = vpop.f32.mrb[26].mxu0  ;;  %v2604_v56 = vsel %vm2573_vm3, %v2567_v6, 0.0  ;;  %v2565_v43 = vsel %vm2544_vm12, %v2436_v30, 0.0 }
 0x5af   : > { %v2568_v0 = vsel %vm5442_vm13, %v3479_v10, 0.0  ;;  %2590 = vadd.xlane.f32.xlu0 %v2589_v31  ;;  %2605 = vadd.xlane.f32.xlu1 %v2604_v56  ;;  %v2439_v19 = vpop.f32.mrb[27].mxu0  ;;  %v2598_v35 = vsel %vm2573_vm3, %v2565_v43, 0.0 }
 0x5b0   : > { %v2607_v39 = vsel %vm2573_vm3, %v2568_v0, 0.0  ;;  %v2566_v4 = vsel %vm2545_vm14, %v2439_v19, 0.0 }
 0x5b1   : > { %v2601_v8 = vsel %vm2573_vm3, %v2566_v4, 0.0 }
 0x5b3   : > { %2599 = vadd.xlane.f32.xlu1 %v2598_v35  ;;  %2608 = vadd.xlane.f32.xlu0 %v2607_v39 }
 0x5b4   : > { %v3482_v5 = vpop.f32.mrb[28].mxu0 }
 0x5b5   : > { %v2452_v55 = vpop.f32.mrb[29].mxu0  ;;  %v2571_v63 = vsel %vm2550_vm1, %v3482_v5, 0.0 }
 0x5b6   : > { %v2569_v54 = vsel %vm5429_vm15, %v2452_v55, 0.0  ;;  %v3483_v9 = vpop.f32.mrb[30].mxu0  ;;  %vm2551_vm15 = vcmp.eq.s32.totalorder %v5051_v20, %v4948_v13  ;;  %v2616_v52 = vsel %vm2573_vm3, %v2571_v63, 0.0 }
 0x5b7   : > { %2602 = vadd.xlane.f32.xlu0 %v2601_v8  ;;  %v2455_v51 = vpop.f32.mrb[31].mxu0  ;;  %v2610_v44 = vsel %vm2573_vm3, %v2569_v54, 0.0  ;;  %v2572_v24 = vsel %vm2551_vm15, %v3483_v9, 0.0 }
 0x5b8   : > { %v2570_v60 = vsel %vm2549_vm0, %v2455_v51, 0.0  ;;  %2611 = vadd.xlane.f32.xlu1 %v2610_v44  ;;  %v2619_v42 = vsel %vm2573_vm3, %v2572_v24, 0.0 }
 0x5b9   : > { %v2613_v38 = vsel %vm2573_vm3, %v2570_v60, 0.0 }
 0x5bb   : > { %2614 = vadd.xlane.f32.xlu0 %v2613_v38 }
 0x5bc   : > { %2617 = vadd.xlane.f32.xlu1 %v2616_v52 }
 0x5bf   : > { %2620 = vadd.xlane.f32.xlu0 %v2619_v42 }
 0x62c   : > { %v5070_v58 = vpop.xlane.xlu0 %2581 }
 0x62d   : > { %v2625_v0 = vsel %vm2538_vm2, %v5070_v58, -1e+30 }
 0x62e   : > { %v2641_v44 = vsel %vm2573_vm3, %v2625_v0, -inf }
 0x62f   : > { %v5072_v47 = vpop.xlane.xlu1 %2578 }
 0x630   : > { %v5074_v15 = vpop.xlane.xlu0 %2575  ;;  %v2624_v19 = vsel %vm2537_vm5, %v5072_v47, -1e+30 }
 0x631   : > { %v2623_v39 = vsel %vm2536_vm4, %v5074_v15, -1e+30  ;;  %v2640_v63 = vsel %vm2573_vm3, %v2624_v19, -inf }
 0x632   : > { %v2639_v24 = vsel %vm2573_vm3, %v2623_v39, -inf }
 0x634   : > { %v5076_v36 = vpop.xlane.xlu0 %2584  ;;  %v5078_v14 = vpop.xlane.xlu1 %2593 }
 0x635   : > { %v2629_v43 = vsel %vm2542_vm7, %v5078_v14, -1e+30  ;;  %v2626_v4 = vsel %vm2539_vm6, %v5076_v36, -1e+30 }
 0x636   : > { %v2647_v5 = vsel %vm2573_vm3, %v2629_v43, -inf  ;;  %v2642_v52 = vsel %vm2573_vm3, %v2626_v4, -inf }
 0x637   : > { %v2648_v0 = vmax.f32 %v2641_v44, %v2647_v5 }
 0x638   : > { %v5080_v37 = vpop.xlane.xlu1 %2587  ;;  %v5082_v6 = vpop.xlane.xlu0 %2596 }
 0x639   : > { %v2627_v54 = vsel %vm2540_vm8, %v5080_v37, -1e+30  ;;  %v2630_v9 = vsel %vm2543_vm9, %v5082_v6, -1e+30 }
 0x63a   : > { %v2643_v19 = vsel %vm2573_vm3, %v2627_v54, -inf }
 0x63c   : > { %v5084_v30 = vpop.xlane.xlu0 %2590  ;;  %v5086_v10 = vpop.xlane.xlu1 %2605 }
 0x63d   : > { %v2628_v35 = vsel %vm2541_vm10, %v5084_v30, -1e+30  ;;  %v2633_v38 = vsel %vm5432_vm11, %v5086_v10, -1e+30  ;;  %vm5454_vm11 = vcmp.eq.s32.totalorder %v5022_v53, %v4948_v13 }
 0x63e   : > { %v2645_v60 = vsel %vm2573_vm3, %v2628_v35, -inf  ;;  %v2649_v35 = vsel %vm2573_vm3, %v2630_v9, -inf  ;;  %v2655_v59 = vsel %vm2573_vm3, %v2633_v38, -inf }
 0x63f   : > { %v2646_v4 = vmax.f32 %v2640_v63, %v2645_v60  ;;  %v2644_v60 = vmax.f32 %v2639_v24, %v2643_v19  ;;  %v2650_v38 = vmax.f32 %v2642_v52, %v2649_v35  ;;  %v2656_v22 = vmax.f32 %v2648_v0, %v2655_v59 }
 0x640   : > { %v5088_v31 = vpop.xlane.xlu1 %2599  ;;  %v5090_v56 = vpop.xlane.xlu0 %2608 }
 0x641   : > { %v2631_v42 = vsel %vm2544_vm12, %v5088_v31, -1e+30  ;;  %v2634_v43 = vsel %vm5442_vm13, %v5090_v56, -1e+30 }
 0x642   : > { %v2651_v9 = vsel %vm2573_vm3, %v2631_v42, -inf }
 0x643   : > { %v2652_v42 = vmax.f32 %v2644_v60, %v2651_v9 }
 0x644   : > { %v5117_v55 = vpop.xlane.xlu0 %2602 }
 0x645   : > { %v2632_v8 = vsel %vm2545_vm14, %v5117_v55, -1e+30  ;;  %v5131_v51 = vpop.xlane.xlu1 %2611 }
 0x646   : > { %v2653_v11 = vsel %vm2573_vm3, %v2632_v8, -inf  ;;  %v2635_v17 = vsel %vm5454_vm11, %v5131_v51, -1e+30  ;;  %v2657_v8 = vsel %vm2573_vm3, %v2634_v43, -inf  ;;  %vm5441_vm11 = vcmask 57344  }
 0x647   : > { %v2654_v57 = vmax.f32 %v2646_v4, %v2653_v11  ;;  %v2659_v2 = vsel %vm2573_vm3, %v2635_v17, -inf  ;;  %v2658_v26 = vmax.f32 %v2650_v38, %v2657_v8 }
 0x648   : > { %v5153_v39 = vpop.xlane.xlu0 %2614  ;;  %v2660_v24 = vmax.f32 %v2652_v42, %v2659_v2 }
 0x649   : > { %v2636_v5 = vsel %vm2549_vm0, %v5153_v39, -1e+30  ;;  %v5164_v54 = vpop.xlane.xlu1 %2617 }
 0x64a   : > { %v2661_v44 = vsel %vm2573_vm3, %v2636_v5, -inf  ;;  %v2637_v63 = vsel %vm2550_vm1, %v5164_v54, -1e+30 }
 0x64b   : > { %v2663_v29 = vsel %vm2573_vm3, %v2637_v63, -inf  ;;  %v2662_v43 = vmax.f32 %v2654_v57, %v2661_v44  ;;  %v5455_v63 = vlaneseq  ;;  %v2622_v44 = vld [vmem:[#allocation3] sm:$0x1] }
 0x64c   : > { %v5175_v27 = vpop.xlane.xlu0 %2620  ;;  %v2664_v52 = vmax.f32 %v2656_v22, %v2663_v29 }
 0x64d   : > { %v2638_v5 = vsel %vm2551_vm15, %v5175_v27, -1e+30  ;;  %v2667_v59 = vmax.f32 %v2660_v24, %v2662_v43  ;;  %v5183_v9 = vshrl.u32 %v5455_v63, 7 }
 0x64e   : > { %v2665_v18 = vsel %vm2573_vm3, %v2638_v5, -inf }
 0x64f   : > { %v2666_v11 = vmax.f32 %v2658_v26, %v2665_v18  ;;  %v5186_v60 = vsub.s32 0, %v5183_v9 }
 0x651   : > { %v2668_v0 = vmax.f32 %v2664_v52, %v2666_v11 }
 0x653   : > { %v2669_v17 = vmax.f32 %v2667_v59, %v2668_v0 }
 0x655   : > { %v2670_v19 = vrot.slane %v2669_v17, 4 }
 0x657   : > { %v2671_v35 = vmax.f32 %v2669_v17, %v2670_v19 }
 0x659   : > { %v2672_v4 = vrot.slane %v2671_v35, 2 }
 0x65b   : > { %v2673_v57 = vmax.f32 %v2671_v35, %v2672_v4 }
 0x65d   : > { %v2674_v8 = vrot.slane %v2673_v57, 1 }
 0x65f   : > { %v2675_v38 = vmax.f32 %v2673_v57, %v2674_v8 }
 0x661   : > { %v2676_v2 = vmax.f32 %v2622_v44, %v2675_v38 }
 0x663   : > { %v2684_v18 = vrot.slane %v2676_v2, %v5186_v60  ;;  %2856 = vst.msk [vmem:[#allocation3] sm:$0x1] %vm5441_vm11, %v2676_v2  ;;  %v2677_v29 = vsub.f32 %v2622_v44, %v2676_v2  ;;  %vm5456_vm11 = vcmp.eq.s32.totalorder %v5002_v48, %v4948_v13 }
 0x665   : > { %v2687_v26 = vsel %vm2537_vm5, %v2684_v18, 0.0  ;;  %v2686_v22 = vsel %vm2536_vm4, %v2684_v18, 0.0  ;;  %v2689_v5 = vsel %vm2539_vm6, %v2684_v18, 0.0  ;;  %v2688_v24 = vsel %vm2538_vm2, %v2684_v18, 0.0 }
 0x666   : > { %v2705_v42 = vsel %vm2573_vm3, %v2687_v26, 0.0  ;;  %v2702_v43 = vsel %vm2573_vm3, %v2686_v22, 0.0  ;;  %v2711_v52 = vsel %vm2573_vm3, %v2689_v5, 0.0  ;;  %v2708_v11 = vsel %vm2573_vm3, %v2688_v24, 0.0 }
 0x667   : > { %2706 = vadd.xlane.f32.xlu0 %v2705_v42  ;;  %2703 = vadd.xlane.f32.xlu1 %v2702_v43  ;;  %v2691_v59 = vsel %vm2541_vm10, %v2684_v18, 0.0  ;;  %v2690_v0 = vsel %vm2540_vm8, %v2684_v18, 0.0  ;;  %v2678_v17 = vmul.f32 1.442695, %v2677_v29  ;;  %v2693_v4 = vsel %vm2543_vm9, %v2684_v18, 0.0 }
 0x668   : > { %v2717_v19 = vsel %vm2573_vm3, %v2691_v59, 0.0  ;;  %v2714_v35 = vsel %vm2573_vm3, %v2690_v0, 0.0  ;;  %v2692_v63 = vsel %vm2542_vm7, %v2684_v18, 0.0  ;;  %v2723_v57 = vsel %vm2573_vm3, %v2693_v4, 0.0 }
 0x669   : > { %3718 = vpow2.f32 %v2678_v17  ;;  %v2720_v8 = vsel %vm2573_vm3, %v2692_v63, 0.0  ;;  %v2695_v44 = vsel %vm2545_vm14, %v2684_v18, 0.0  ;;  %v2694_v38 = vsel %vm2544_vm12, %v2684_v18, 0.0 }
 0x66a   : > { %v2729_v2 = vsel %vm2573_vm3, %v2695_v44, 0.0  ;;  %v2726_v29 = vsel %vm2573_vm3, %v2694_v38, 0.0  ;;  %v2697_v26 = vsel %vm5442_vm13, %v2684_v18, 0.0  ;;  %v2696_v22 = vsel %vm5456_vm11, %v2684_v18, 0.0 }
 0x66b   : > { %2712 = vadd.xlane.f32.xlu0 %v2711_v52  ;;  %2709 = vadd.xlane.f32.xlu1 %v2708_v11  ;;  %v2735_v43 = vsel %vm2573_vm3, %v2697_v26, 0.0  ;;  %v2732_v5 = vsel %vm2573_vm3, %v2696_v22, 0.0  ;;  %v2699_v52 = vsel %vm2549_vm0, %v2684_v18, 0.0  ;;  %vm5457_vm13 = vcmp.eq.s32.totalorder %v5022_v53, %v4948_v13 }
 0x66c   : > { %v2698_v11 = vsel %vm5457_vm13, %v2684_v18, 0.0  ;;  %v2741_v59 = vsel %vm2573_vm3, %v2699_v52, 0.0  ;;  %v2701_v17 = vsel %vm2551_vm15, %v2684_v18, 0.0  ;;  %v3796_v63 = vmov 0.0  }
 0x66d   : > { %v2738_v0 = vsel %vm2573_vm3, %v2698_v11, 0.0  ;;  %3484 = vmatprep.subr.bf16.mxu1 %v3796_v63  ;;  %vm3797_vm13 = vmmov 0  }
 0x66e   : > { %3500 = vmatprep.mubr.msk.bf16.mxu1 %vm3797_vm13, %v3796_v63 }
 0x66f   : > { %2718 = vadd.xlane.f32.xlu0 %v2717_v19  ;;  %2715 = vadd.xlane.f32.xlu1 %v2714_v35  ;;  %v2700_v19 = vsel %vm2550_vm1, %v2684_v18, 0.0  ;;  %v2747_v35 = vsel %vm2573_vm3, %v2701_v17, 0.0 }
 0x670   : > { %v2744_v4 = vsel %vm2573_vm3, %v2700_v19, 0.0 }
 0x673   : > { %2724 = vadd.xlane.f32.xlu0 %v2723_v57  ;;  %2721 = vadd.xlane.f32.xlu1 %v2720_v8  ;;  %v5236_v42 = vpop.eup %3718 }
 0x674   : > { %v2862_v24 = vrot.slane %v5236_v42, %v5186_v60 }
 0x677   : > { %2730 = vadd.xlane.f32.xlu0 %v2729_v2  ;;  %2727 = vadd.xlane.f32.xlu1 %v2726_v29 }
 0x67b   : > { %2736 = vadd.xlane.f32.xlu0 %v2735_v43  ;;  %2733 = vadd.xlane.f32.xlu1 %v2732_v5 }
 0x67f   : > { %2742 = vadd.xlane.f32.xlu0 %v2741_v59  ;;  %2739 = vadd.xlane.f32.xlu1 %v2738_v0 }
 0x683   : > { %2748 = vadd.xlane.f32.xlu0 %v2747_v35  ;;  %2745 = vadd.xlane.f32.xlu1 %v2744_v4 }
 0x6f4   : > { %v2707_v57 = vpop.xlane.xlu0 %2706  ;;  %v2704_v8 = vpop.xlane.xlu1 %2703 }
 0x6f5   : > { %v2751_v44 = vsub.f32 %v5072_v47, %v2707_v57  ;;  %v2750_v38 = vsub.f32 %v5074_v15, %v2704_v8 }
 0x6f7   : > { %v2768_v18 = vmul.f32 1.442695, %v2751_v44  ;;  %v2766_v2 = vmul.f32 1.442695, %v2750_v38 }
 0x6f8   : > { %v2713_v29 = vpop.xlane.xlu0 %2712  ;;  %v2710_v26 = vpop.xlane.xlu1 %2709 }
 0x6f9   : > { %3720 = vpow2.f32 %v2768_v18  ;;  %v2753_v22 = vsub.f32 %v5076_v36, %v2713_v29  ;;  %v2752_v43 = vsub.f32 %v5070_v58, %v2710_v26 }
 0x6fa   : > { %3722 = vpow2.f32 %v2766_v2 }
 0x6fb   : > { %v2772_v5 = vmul.f32 1.442695, %v2753_v22  ;;  %v2770_v52 = vmul.f32 1.442695, %v2752_v43 }
 0x6fc   : > { %v2719_v11 = vpop.xlane.xlu0 %2718  ;;  %v2716_v59 = vpop.xlane.xlu1 %2715 }
 0x6fd   : > { %3724 = vpow2.f32 %v2772_v5  ;;  %v2755_v0 = vsub.f32 %v5084_v30, %v2719_v11  ;;  %v2754_v47 = vsub.f32 %v5080_v37, %v2716_v59 }
 0x6fe   : > { %3726 = vpow2.f32 %v2770_v52 }
 0x6ff   : > { %v2776_v15 = vmul.f32 1.442695, %v2755_v0  ;;  %v2774_v17 = vmul.f32 1.442695, %v2754_v47 }
 0x700   : > { %v2725_v19 = vpop.xlane.xlu0 %2724  ;;  %v2722_v35 = vpop.xlane.xlu1 %2721 }
 0x701   : > { %3728 = vpow2.f32 %v2776_v15  ;;  %v2757_v36 = vsub.f32 %v5082_v6, %v2725_v19  ;;  %v2756_v58 = vsub.f32 %v5078_v14, %v2722_v35 }
 0x702   : > { %3730 = vpow2.f32 %v2774_v17 }
 0x703   : > { %v3721_v4 = vpop.eup %3720  ;;  %v2780_v57 = vmul.f32 1.442695, %v2757_v36  ;;  %v2778_v8 = vmul.f32 1.442695, %v2756_v58 }
 0x704   : > { %v3723_v44 = vpop.eup %3722  ;;  %v2799_v30 = vsel %vm2537_vm5, %v3721_v4, 0.0  ;;  %v2731_v37 = vpop.xlane.xlu0 %2730  ;;  %v2866_v18 = vmul.f32 %v3721_v4, %v4895_v41  ;;  %vm5466_vm5 = vcmp.eq.s32.totalorder %v5022_v53, %v4948_v13  ;;  %v5469_v53 = vld [vmem:[#allocation18_spill] sm:$0xff] }
 0x705   : > { %v2728_v38 = vpop.xlane.xlu1 %2727  ;;  %v2815_v2 = vsel %vm2573_vm3, %v2799_v30, 0.0  ;;  %v2798_v6 = vsel %vm2536_vm4, %v3723_v44, 0.0  ;;  %3732 = vpow2.f32 %v2780_v57  ;;  %v2759_v14 = vsub.f32 %v5117_v55, %v2731_v37  ;;  %vm5463_vm4 = vmmov %vm5456_vm11 }
 0x706   : > { %v2814_v29 = vsel %vm2573_vm3, %v2798_v6, 0.0  ;;  %3734 = vpow2.f32 %v2778_v8  ;;  %v2758_v26 = vsub.f32 %v5088_v31, %v2728_v38  ;;  %v2865_v40 = vmul.f32 %v3723_v44, %v4893_v23 }
 0x707   : > { %v3725_v22 = vpop.eup %3724  ;;  %v2784_v43 = vmul.f32 1.442695, %v2759_v14  ;;  %v2816_v41 = vadd.f32 %v2815_v2, %v2814_v29 }
 0x708   : > { %v3727_v5 = vpop.eup %3726  ;;  %v2782_v52 = vmul.f32 1.442695, %v2758_v26  ;;  %v2737_v11 = vpop.xlane.xlu0 %2736  ;;  %v2881_v59 = vpack.c.bf16 %v2866_v18, %v2865_v40  ;;  %v2868_v21 = vmul.f32 %v3725_v22, %v4891_v25  ;;  %v2801_v55 = vsel %vm2539_vm6, %v3725_v22, 0.0 }
 0x709   : > { %v2734_v0 = vpop.xlane.xlu1 %2733  ;;  %v2800_v31 = vsel %vm2538_vm2, %v3727_v5, 0.0  ;;  %3736 = vpow2.f32 %v2784_v43  ;;  %v2761_v23 = vsub.f32 %v5090_v56, %v2737_v11  ;;  %v2867_v17 = vmul.f32 %v3727_v5, %v4897_v16  ;;  %v5458_v11 = vld [vmem:[#allocation10_spill] sm:$0xff] }
 0x70a   : > { %v2817_v47 = vsel %vm2573_vm3, %v2800_v31, 0.0  ;;  %3738 = vpow2.f32 %v2782_v52  ;;  %3485 = vmatpush3.bf16.msra.mxu1 %v2881_v59  ;;  %v2760_v15 = vsub.f32 %v5086_v10, %v2734_v0  ;;  %v2819_v49 = vsel %vm2573_vm3, %v2801_v55, 0.0 }
 0x70b   : > { %v3729_v25 = vpop.eup %3728  ;;  %v2818_v19 = vadd.f32 %v2817_v47, %v2816_v41  ;;  %v2788_v35 = vmul.f32 1.442695, %v2761_v23  ;;  %3486 = vmatprep.subr.bf16.mxu1 %v3796_v63  ;;  %v2882_v4 = vpack.c.bf16 %v2868_v21, %v2867_v17  ;;  %vm5462_vm2 = vcmp.eq.s32.totalorder %v5008_v46, %v4948_v13 }
 0x70c   : > { %v3731_v12 = vpop.eup %3730  ;;  %v2803_v56 = vsel %vm2541_vm10, %v3729_v25, 0.0  ;;  %v2786_v36 = vmul.f32 1.442695, %v2760_v15  ;;  %v2743_v58 = vpop.xlane.xlu0 %2742  ;;  %v2870_v10 = vmul.f32 %v3729_v25, %v4907_v32  ;;  %v5460_v15 = vld [vmem:[#allocation12_spill] sm:$0xff]  ;;  %vm3800_vm10 = vmmov (!%p3225_p6), 0  }
 0x70d   : > { %v2740_v57 = vpop.xlane.xlu1 %2739  ;;  %v2820_v8 = vadd.f32 %v2819_v49, %v2818_v19  ;;  %v2802_v16 = vsel %vm2540_vm8, %v3731_v12, 0.0  ;;  %3740 = vpow2.f32 %v2788_v35  ;;  %v2763_v30 = vsub.f32 %v5153_v39, %v2743_v58  ;;  %v5461_v49 = vld [vmem:[#allocation11_spill] sm:$0xff] }
 0x70e   : > { %v2821_v44 = vsel %vm2573_vm3, %v2802_v16, 0.0  ;;  %3742 = vpow2.f32 %v2786_v36  ;;  %3487 = vmatpush3.bf16.msra.mxu1 %v2882_v4  ;;  %v2762_v28 = vsub.f32 %v5131_v51, %v2740_v57  ;;  %v2869_v18 = vmul.f32 %v3731_v12, %v4905_v7  ;;  %v5464_v4 = vld [vmem:[#allocation14_spill] sm:$0xff] }
 0x70f   : > { %v3733_v37 = vpop.eup %3732  ;;  %v2822_v38 = vadd.f32 %v2821_v44, %v2820_v8  ;;  %3488 = vmatprep.subr.bf16.mxu1 %v3796_v63  ;;  %v2823_v3 = vsel %vm2573_vm3, %v2803_v56, 0.0  ;;  %v2792_v6 = vmul.f32 1.442695, %v2763_v30  ;;  %vm2857_vm8 = vcmp.eq.s32.totalorder %v5183_v9, %v4948_v13 }
 0x710   : > { %v3735_v2 = vpop.eup %3734  ;;  %v2805_v32 = vsel %vm2543_vm9, %v3733_v37, 0.0  ;;  %v2790_v14 = vmul.f32 1.442695, %v2762_v28  ;;  %v2749_v29 = vpop.xlane.xlu0 %2748  ;;  %v2872_v7 = vmul.f32 %v3733_v37, %v4903_v61  ;;  %v2883_v43 = vpack.c.bf16 %v2870_v10, %v2869_v18  ;;  %v5465_v37 = vld [vmem:[#allocation17_spill] sm:$0xff] }
 0x711   : > { %v2746_v39 = vpop.xlane.xlu1 %2745  ;;  %v2824_v26 = vadd.f32 %v2823_v3, %v2822_v38  ;;  %v2804_v51 = vsel %vm2542_vm7, %v3735_v2, 0.0  ;;  %v2765_v40 = vsub.f32 %v5175_v27, %v2749_v29  ;;  %3744 = vpow2.f32 %v2792_v6  ;;  %v5459_v27 = vld [vmem:[#allocation13_spill] sm:$0xff] }
 0x712   : > { %v2825_v22 = vsel %vm2573_vm3, %v2804_v51, 0.0  ;;  %v2764_v33 = vsub.f32 %v5164_v54, %v2746_v39  ;;  %3746 = vpow2.f32 %v2790_v14  ;;  %v2871_v59 = vmul.f32 %v3735_v2, %v5458_v11  ;;  %3489 = vmatpush3.bf16.msra.mxu1 %v2883_v43  ;;  %v5467_v2 = vld [vmem:[#allocation16_spill] sm:$0xff] }
 0x713   : > { %v3737_v5 = vpop.eup %3736  ;;  %v2826_v41 = vadd.f32 %v2825_v22, %v2824_v26  ;;  %v2796_v52 = vmul.f32 1.442695, %v2765_v40  ;;  %v2827_v50 = vsel %vm2573_vm3, %v2805_v32, 0.0  ;;  %3490 = vmatprep.subr.bf16.mxu1 %v3796_v63  ;;  %v5468_v26 = vld [vmem:[#allocation15_spill] sm:$0xff]  ;;  %vm5470_vm9 = vcmask 57344  }
 0x714   : > { %v3739_v0 = vpop.eup %3738  ;;  %v2794_v21 = vmul.f32 1.442695, %v2764_v33  ;;  %v2874_v55 = vmul.f32 %v3737_v5, %v5459_v27  ;;  %v2807_v61 = vsel %vm2545_vm14, %v3737_v5, 0.0  ;;  %v2884_v47 = vpack.c.bf16 %v2872_v7, %v2871_v59  ;;  %v3221_v5 = vld [vmem:[%s437_s27] ss:$0 sm:$0xff]  ;;  %v2891_v59 = vld [vmem:[#allocation5] sm:$0xff] }
 0x715   : > { %v2828_v31 = vadd.f32 %v2827_v50, %v2826_v41  ;;  %v2806_v54 = vsel %vm2544_vm12, %v3739_v0, 0.0  ;;  %3748 = vpow2.f32 %v2796_v52  ;;  %v2873_v17 = vmul.f32 %v3739_v0, %v5460_v15 }
 0x716   : > { %v2829_v23 = vsel %vm2573_vm3, %v2806_v54, 0.0  ;;  %3750 = vpow2.f32 %v2794_v21  ;;  %v2831_v34 = vsel %vm2573_vm3, %v2807_v61, 0.0  ;;  %3491 = vmatpush3.bf16.msra.mxu1 %v2884_v47  ;;  %vm2556_vm6 = vcmp.eq.s32.totalorder %v3221_v5, %v5183_v9 }
 0x717   : > { %v3741_v25 = vpop.eup %3740  ;;  %v2830_v19 = vadd.f32 %v2829_v23, %v2828_v31  ;;  %v2885_v12 = vpack.c.bf16 %v2874_v55, %v2873_v17  ;;  %3492 = vmatprep.subr.bf16.mxu1 %v3796_v63  ;;  %vm3222_vm7 = vmpackc.low %vm2556_vm6, %vm2556_vm6  ;;  %v3798_v50 = vmov 1.0|1.0   ;;  %v2851_v55 = vld [vmem:[#allocation4] sm:$0x1]  ;;  %v2864_v23 = vsel %vm2857_vm8, %v2862_v24, 0.0 }
 0x718   : > { %v3743_v35 = vpop.eup %3742  ;;  %v2876_v56 = vmul.f32 %v3741_v25, %v5461_v49  ;;  %v2809_v62 = vsel %vm5462_vm2, %v3741_v25, 0.0  ;;  %v2852_v54 = vmul.f32 %v5236_v42, %v2851_v55  ;;  %v3799_v49 = vmov (!%p3225_p6), 0.0  }
 0x719   : > { %v2832_v36 = vadd.f32 %v2831_v34, %v2830_v19  ;;  %v2808_v58 = vsel %vm5463_vm4, %v3743_v35, 0.0  ;;  %v2875_v57 = vmul.f32 %v3743_v35, %v5464_v4  ;;  %v2835_v44 = vsel %vm2573_vm3, %v2809_v62, 0.0  ;;  %3509 = vmatprep.subr.mxu0 (!%p3225_p6), %v3799_v49  ;;  %3511 = vmatprep.mubr.msk.f32.mxu0 (!%p3225_p6), %vm3800_vm10, %v3799_v49 }
 0x71a   : > { %v2833_v8 = vsel %vm2573_vm3, %v2808_v58, 0.0  ;;  %3493 = vmatpush3.bf16.msra.mxu1 %v2885_v12 }
 0x71b   : > { %v2834_v16 = vadd.f32 %v2833_v8, %v2832_v36  ;;  %v3745_v10 = vpop.eup %3744  ;;  %v2886_v30 = vpack.c.bf16 %v2876_v56, %v2875_v57  ;;  %3494 = vmatprep.subr.bf16.mxu1 %v3796_v63 }
 0x71c   : > { %v3747_v28 = vpop.eup %3746  ;;  %v2878_v38 = vmul.f32 %v3745_v10, %v5465_v37  ;;  %v2811_v48 = vsel %vm2549_vm0, %v3745_v10, 0.0 }
 0x71d   : > { %v2836_v46 = vadd.f32 %v2835_v44, %v2834_v16  ;;  %v2810_v18 = vsel %vm5466_vm5, %v3747_v28, 0.0  ;;  %v2877_v3 = vmul.f32 %v3747_v28, %v5467_v2  ;;  %v2839_v40 = vsel %vm2573_vm3, %v2811_v48, 0.0 }
 0x71e   : > { %v2837_v6 = vsel %vm2573_vm3, %v2810_v18, 0.0  ;;  %3495 = vmatpush3.bf16.msra.mxu1 %v2886_v30 }
 0x71f   : > { %v3749_v32 = vpop.eup %3748  ;;  %v2838_v29 = vadd.f32 %v2837_v6, %v2836_v46  ;;  %v2887_v39 = vpack.c.bf16 %v2878_v38, %v2877_v3  ;;  %3496 = vmatprep.subr.bf16.mxu1 %v3796_v63 }
 0x720   : > { %v3751_v14 = vpop.eup %3750  ;;  %v2880_v51 = vmul.f32 %v3749_v32, %v5468_v26  ;;  %v2813_v22 = vsel %vm2551_vm15, %v3749_v32, 0.0 }
 0x721   : > { %v2812_v45 = vsel %vm2550_vm1, %v3751_v14, 0.0  ;;  %v2879_v7 = vmul.f32 %v3751_v14, %v5469_v53  ;;  %v2840_v43 = vadd.f32 %v2839_v40, %v2838_v29  ;;  %v2843_v52 = vsel %vm2573_vm3, %v2813_v22, 0.0 }
 0x722   : > { %v2841_v33 = vsel %vm2573_vm3, %v2812_v45, 0.0  ;;  %3497 = vmatpush3.bf16.msra.mxu1 %v2887_v39 }
 0x723   : > { %v2842_v41 = vadd.f32 %v2841_v33, %v2840_v43  ;;  %v2888_v1 = vpack.c.bf16 %v2880_v51, %v2879_v7  ;;  %3498 = vmatprep.subr.bf16.mxu1 %v3796_v63 }
 0x725   : > { %v2844_v11 = vadd.f32 %v2843_v52, %v2842_v41 }
 0x726   : > { %3499 = vmatpush3.bf16.msra.mxu1 %v2888_v1 }
 0x727   : > { %v2845_v20 = vrot.slane %v2844_v11, 4  ;;  %3504 = vmatprep.subr.mxu1 %v3796_v63 }
 0x729   : > { %v2846_v0 = vadd.f32 %v2845_v20, %v2844_v11  ;;  %3501 = vmatmul.mubr.msk.bf16.vlgmr.msra.gmra.mrb[16].mxu1 %vm3222_vm7, %v3798_v50 }
 0x72a   : > { %3505 = vmatpush3.msra.mxu1 %v2891_v59  ;;  %3506 = vmatprep.mubr.msk.f32.mxu1 %vm3797_vm13, %v3796_v63 }
 0x72b   : > { %v2847_v21 = vrot.slane %v2846_v0, 2 }
 0x72d   : > { %v2848_v27 = vadd.f32 %v2847_v21, %v2846_v0 }
 0x72f   : > { %v2849_v61 = vrot.slane %v2848_v27, 1 }
 0x731   : > { %v2850_v31 = vadd.f32 %v2849_v61, %v2848_v27  ;;  %3507 = vmatmul.mubr.msk.f32.vlgmr.msra.gmra.mrb[20].mxu1 %vm2573_vm3, %v2864_v23 }
 0x733   : > { %v2853_v47 = vadd.f32 %v2852_v54, %v2850_v31 }
 0x735   : > { %2855 = vst.msk [vmem:[#allocation4] sm:$0x1] %vm5470_vm9, %v2853_v47 }
 0x73c   : > { %v3010_v12 = vld [vmem:[#allocation4] sm:$0x1] (!%p3225_p6) }
 0x73d   : > { %v3011_v24 = vadd.f32 (!%p3225_p6), 1e-16, %v3010_v12 }
 0x73f   : > { %3752 = vrcp.f32 (!%p3225_p6), %v3011_v24 }
 0x749   : > { %v3753_v56 = vpop.eup (!%p3225_p6), %3752 }
 0x74a   : > { %v3017_v62 = vrot.slane (!%p3225_p6), %v3753_v56, %v5186_v60 }
 0x74c   : > { %v3019_v36 = vsel (!%p3225_p6), %vm2857_vm8, %v3017_v62, 0.0 }
 0x7fc   : > { %v2926_v63 = vpop.f32.mrb[16].mxu1 }
 0x7fd   : > { %v3502_v15 = vpop.f32.mrb[17].mxu1 }
 0x7fe   : > { %v2929_v17 = vpop.f32.mrb[18].mxu1 }
 0x7ff   : > { %v3503_v25 = vpop.f32.mrb[19].mxu1 }
 0x801   : > { %3009 = sbr.rel (%p3225_p6) target bundleno = 2277 (0x8e5), region = 76 }
 0x804   : > { %v3001_v19 = vpop.f32.mrb[20].mxu1 }
 0x805   : > { %v3002_v35 = vadd.f32 %v3001_v19, %v2926_v63  ;;  %v3508_v34 = vpop.f32.mrb[21].mxu1 }
 0x807   : > { %3005 = vst [vmem:[#allocation5] sm:$0xff] %v3002_v35 }
 0x80e   : > { %v3020_v42 = vld [vmem:[#allocation5] sm:$0xff] }
 0x80f   : > { %3510 = vmatpush3.msra.mxu0 %v3020_v42 }
 0x810   : > { %3512 = vmatmul.mubr.msk.f32.vlgmr.msra.gmra.mrb[0].mxu0 %vm2573_vm3, %v3019_v36 }
 0x8e3   : > { %v3090_v58 = vpop.f32.mrb[0].mxu0 }
 0x8e4   : > { %3094 = vst [vmem:[#allocation6] sm:$0xff] %v3090_v58  ;;  %v3513_v4 = vpop.f32.mrb[1].mxu0 }
 0x8e5 PF: > { %p3518_p7 = scmp.eq.s32.totalorder %s3873_s22, 2  ;;  %s3801_s24 = smov [#allocation6]  }
 0x8e6   : > { %s3102_s27 = sshll.u32 %s3801_s24, 4  ;;  %s3103_s27 = int_to_ptr.vmem [resolvable:$true] %s3102_s27 }
 0x8e7   : > { %s3754_s25 = scalar_lea.vmem %s3103_s27, 128  ;;  %p3761_p11 = scmp.lt.s32.totalorder %s3103_s27, %s3103_s27 }
 0x8e8   : > { %p3755_p8 = scmp.ne.s32.totalorder %s3103_s27, %s3754_s25  ;;  %p3762_p12 = scmp.lt.s32.totalorder %s3754_s25, %s3754_s25 }
 0x8ea   : > { %p3756_p9 = pnand %p3755_p8, %p3518_p7  ;;  %p3763_p13 = por %p3762_p12, %p3761_p11 }
 0x8ec   : > { %p3757_p10 = pneg %p3756_p9 }
 0x8ee   : > { %p3764_p0 = pnand %p3763_p13, %p3757_p10 }
 0x8f0   : > { %3767 = shalt.err (!%p3764_p0)
}
 0x8f1   : > { %s3768_s28 = scalar_lea.hbm %s5428_s12, 128 }
 0x8f2   : > { %p3769_p1 = scmp.ne.s32.totalorder %s5428_s12, %s3768_s28  ;;  %p3774_p4 = scmp.lt.u32.totalorder %s3768_s28, %s5428_s12 }
 0x8f4   : > { %p3770_p2 = pnand %p3769_p1, %p3518_p7 }
 0x8f6   : > { %p3771_p3 = pneg %p3770_p2 }
 0x8f8   : > { %p3776_p5 = pnand %p3774_p4, %p3771_p3 }
 0x8fa   : > { %3779 = shalt.err (!%p3776_p5)
}
 0x8fb   : > { %3515 = dma.vmem_to_hbm [thread:$0]  (%p3518_p7), %s3103_s27, 128, %s5428_s12, [#allocation7]  }
 0x8fc   : > { %3785 = dma.done.wait (%p3518_p7), [#allocation7], 128  }
 0x8fd   : > { %3787 = vsyncadd (%p3518_p7), [#allocation7], 4294967168 }
 0x8fe PF: > { %s23_s21 = sadd.s32 1, %s3790_s21  }
 0x8ff   : > { %p20_p6 = scmp.ge.s32.totalorder %s23_s21, 5  }
 0x901   :  { %22 = sbr.rel (!%p20_p6) target bundleno = 1 (0x1), region = 109 }
 0x908   :  { %3115 = vsyncpa [#allocation7], 1 }
 0x909   :  { %3117 = vsyncpa [#allocation7 + $0x1], 1 }

</bundles_post_ra>
